<compile_context>
chip_gen: v7x
topology: tpu7x:2x2x1
jax: 0.10.0
libtpu: 0.0.40
codegen_flags: <defaults>
</compile_context>

<pallas_src>
import jax
import jax.numpy as jnp
from jax.experimental import pallas as pl
from jax.experimental.pallas import tpu as pltpu

EPS = 1e-5  # BatchNorm eps


def _make_kernel(bblk, L, Lp, P, ni, nf, ks_list, tap_offsets):
    nf4 = 4 * nf
    M = bblk * L
    f32 = jnp.float32

    def kernel(x_ref, w11_ref, wt_ref, bn_ref, o_ref, h_ref):
        # ---- bottleneck 1x1 conv (bias-free) over the whole zero-padded sequence ----
        # Padded rows stay exactly zero, so they double as the 'same' halo for the
        # three branch convolutions below.
        xpad = x_ref[...].reshape(bblk * Lp, ni)                    # (bblk*Lp, ni)
        wb = w11_ref[0]                                             # (ni, nf)
        h_ref[...] = jnp.dot(xpad, wb,
                             preferred_element_type=f32).reshape(bblk, Lp, nf)

        # ---- three conv branches: k accumulated MXU dots each (no im2col concat) ----
        branch_outs = []
        for ci, k in enumerate(ks_list):
            p = (k - 1) // 2
            s = P - p                                               # tap-0 offset in padded seq
            off = tap_offsets[ci]
            acc = jnp.zeros((M, nf), f32)
            for j in range(k):
                hj = h_ref[:, s + j:s + j + L, :].reshape(M, nf)    # (M, nf) shifted view load
                acc = acc + jnp.dot(hj.astype(jnp.bfloat16), wt_ref[off + j],
                                    preferred_element_type=f32)
            branch_outs.append(acc)

        # ---- maxconvpool branch: MaxPool1d(3, stride=1, pad=1) then 1x1 conv ----
        xc = x_ref[:, P:P + L, :]                                   # (bblk, L, ni)
        xl = x_ref[:, P - 1:P - 1 + L, :]
        xr = x_ref[:, P + 1:P + 1 + L, :]
        idx = jax.lax.broadcasted_iota(jnp.int32, (bblk, L, ni), 1)
        # PyTorch maxpool pads with -inf: drop the zero halo at the two boundaries.
        xl = jnp.where(idx >= 1, xl, xc)
        xr = jnp.where(idx <= L - 2, xr, xc)
        mpool = jnp.maximum(jnp.maximum(xl, xc), xr).reshape(M, ni)
        wmp = w11_ref[1]                                            # (ni, nf)
        branch_outs.append(jnp.dot(mpool, wmp, preferred_element_type=f32))

        # ---- concat -> folded eval BN -> ReLU, one lane-dense (M, 4*nf) store ----
        cat = jnp.concatenate(branch_outs, axis=-1)                 # (M, 4*nf)
        scale = bn_ref[0:1, :]
        shift = bn_ref[1:2, :]
        y = jnp.maximum(cat * scale + shift, 0.0)
        o_ref[...] = y.reshape(bblk, L, nf4)

    return kernel


def inception_forward(x_ncl, params, ks_list, *, block_b=None):
    """x_ncl: (B, ni, L) float32, PyTorch layout. Returns (B, 4*nf, L)."""
    B, ni, L = x_ncl.shape
    nf = params["w_bottleneck"].shape[0]
    nf4 = 4 * nf
    assert ni > 1, "bottleneck-free path (ni == 1) not implemented"
    assert L % 8 == 0
    assert all(k % 2 == 1 and k >= 3 for k in ks_list)

    kmax = max(ks_list)
    P = (kmax - 1) // 2                         # zero halo of the widest 'same' conv
    Lp = -(-(L + 2 * P) // 8) * 8               # round padded length up to 8 sublanes
    pad_r = Lp - L - P

    if block_b is None:                         # aim for M = block_b * L >= 256
        block_b = max(1, min(B, 256 // L if L <= 256 else 1))
        while B % block_b:
            block_b -= 1
    assert B % block_b == 0

    # (B, ni, L) -> (B, L, ni), zero-padded along the sequence axis.
    x_blc = jnp.transpose(x_ncl, (0, 2, 1)).astype(jnp.float32)
    x_pad = jnp.pad(x_blc, ((0, 0), (P, pad_r), (0, 0)))

    # 1x1-conv weights (bottleneck + maxconvpool conv), coalesced: (2, ni, nf), f32.
    w11 = jnp.stack([params["w_bottleneck"][:, :, 0].T,
                     params["w_mp"][:, :, 0].T]).astype(jnp.float32)

    # Branch-conv weights as per-tap (nf, nf) matrices, all taps packed: (T, nf, nf), bf16.
    taps = [jnp.transpose(w, (2, 1, 0)) for w in params["w_convs"]]  # tap[j][c,o] = w[o,c,j]
    w_taps = jnp.concatenate(taps, axis=0).astype(jnp.bfloat16)
    tap_offsets, off = [], 0
    for k in ks_list:
        tap_offsets.append(off)
        off += k
    T = off

    # Eval-mode BatchNorm folded to per-channel scale/shift, coalesced: (2, 4*nf).
    scale = params["gamma"] / jnp.sqrt(params["var"] + EPS)
    shift = params["beta"] - params["mean"] * scale
    bn = jnp.stack([scale, shift]).astype(jnp.float32)

    kernel = _make_kernel(block_b, L, Lp, P, ni, nf,
                          tuple(ks_list), tuple(tap_offsets))

    grid_spec = pltpu.PrefetchScalarGridSpec(
        num_scalar_prefetch=0,
        grid=(B // block_b,),
        in_specs=[
            pl.BlockSpec((block_b, Lp, ni), lambda b: (b, 0, 0)),   # padded input
            pl.BlockSpec((2, ni, nf), lambda b: (0, 0, 0)),         # 1x1 conv weights
            pl.BlockSpec((T, nf, nf), lambda b: (0, 0, 0)),         # branch conv taps (bf16)
            pl.BlockSpec((2, nf4), lambda b: (0, 0)),               # folded BN scale/shift
        ],
        out_specs=pl.BlockSpec((block_b, L, nf4), lambda b: (b, 0, 0)),
        scratch_shapes=[pltpu.VMEM((block_b, Lp, nf), jnp.float32)],  # bottleneck output
    )

    out_blc = pl.pallas_call(
        kernel,
        out_shape=jax.ShapeDtypeStruct((B, L, nf4), jnp.float32),
        grid_spec=grid_spec,
        compiler_params=pltpu.CompilerParams(dimension_semantics=("parallel",)),
    )(x_pad, w11, w_taps, bn)

    return jnp.transpose(out_blc, (0, 2, 1))    # (B, 4*nf, L), PyTorch layout


def inception_reference(x_ncl, params, ks_list):
    """Pure-JAX reference (eval mode) for correctness checking."""
    dn = ("NCH", "OIH", "NCH")
    hp = jax.lax.Precision.HIGHEST
    h = jax.lax.conv_general_dilated(x_ncl, params["w_bottleneck"], (1,), [(0, 0)],
                                     dimension_numbers=dn, precision=hp)
    branches = []
    for w, k in zip(params["w_convs"], ks_list):
        p = (k - 1) // 2
        branches.append(jax.lax.conv_general_dilated(h, w, (1,), [(p, p)],
                                                     dimension_numbers=dn, precision=hp))
    mp = jax.lax.reduce_window(x_ncl, -jnp.inf, jax.lax.max,
                               (1, 1, 3), (1, 1, 1), [(0, 0), (0, 0), (1, 1)])
    branches.append(jax.lax.conv_general_dilated(mp, params["w_mp"], (1,), [(0, 0)],
                                                 dimension_numbers=dn, precision=hp))
    y = jnp.concatenate(branches, axis=1)                       # (B, 4*nf, L)
    scale = params["gamma"] / jnp.sqrt(params["var"] + EPS)
    shift = params["beta"] - params["mean"] * scale
    y = y * scale[None, :, None] + shift[None, :, None]
    return jnp.maximum(y, 0.0)


def init_params(key, ni, nf, ks_list):
    keys = jax.random.split(key, 6 + len(ks_list))
    nf4 = 4 * nf
    b1 = 1.0 / jnp.sqrt(float(ni))
    params = {
        "w_bottleneck": jax.random.uniform(keys[0], (nf, ni, 1), jnp.float32, -b1, b1),
        "w_mp": jax.random.uniform(keys[1], (nf, ni, 1), jnp.float32, -b1, b1),
        "w_convs": [],
        "gamma": jax.random.uniform(keys[2], (nf4,), jnp.float32, 0.5, 1.5),
        "beta": 0.1 * jax.random.normal(keys[3], (nf4,), jnp.float32),
        "mean": 0.1 * jax.random.normal(keys[4], (nf4,), jnp.float32),
        "var": jax.random.uniform(keys[5], (nf4,), jnp.float32, 0.5, 1.5),
    }
    for i, k in enumerate(ks_list):
        bk = 1.0 / jnp.sqrt(nf * float(k))
        params["w_convs"].append(
            jax.random.uniform(keys[6 + i], (nf, nf, k), jnp.float32, -bk, bk))
    return params


if __name__ == "__main__":
    B, ni, nf, L = 2, 4, 32, 64
    ks = 40
    ks_list = [ks // 2 ** i for i in range(3)]
    ks_list = [k if k % 2 != 0 else k - 1 for k in ks_list]     # [39, 19, 9]

    key = jax.random.PRNGKey(0)
    k_x, k_p = jax.random.split(key)
    x = jax.random.normal(k_x, (B, ni, L), jnp.float32)
    params = init_params(k_p, ni, nf, ks_list)

    out = inception_forward(x, params, ks_list)
    jax.block_until_ready(out)

    ref = inception_reference(x, params, ks_list)
    assert out.shape == (B, 4 * nf, L), out.shape
    max_err = float(jnp.max(jnp.abs(out - ref)))
    # Branch-conv matmul operands are bf16 (f32 accumulation); tolerance covers the
    # resulting few-e-3 accumulation error vs. the HIGHEST-precision f32 reference.
    assert max_err < 3e-2, f"max abs error too large: {max_err}"

    print("KERNEL_OK")
</pallas_src>

<mosaic_0001>
module attributes {stable_mosaic.version = 11 : i64} {
  func.func @kernel(%arg0: i32, %arg1: memref<2x104x4xf32, #tpu.memory_space<vmem>>, %arg2: memref<2x4x32xf32, #tpu.memory_space<vmem>>, %arg3: memref<67x32x32xbf16, #tpu.memory_space<vmem>>, %arg4: memref<2x128xf32, #tpu.memory_space<vmem>>, %arg5: memref<2x64x128xf32, #tpu.memory_space<vmem>>, %arg6: memref<2x104x32xf32, #tpu.memory_space<vmem>>) attributes {dimension_semantics = [#tpu.dimension_semantics<parallel>], iteration_bounds = array<i64: 1>, scalar_prefetch = 0 : i64, scratch_operands = 1 : i64, tpu.core_type = #tpu.core_type<tc>, window_params = [{transform_indices = @transform_0, window_bounds = array<i64: 2, 104, 4>}, {pipeline_mode = #tpu.pipeline_mode<synchronous>, transform_indices = @transform_1, window_bounds = array<i64: 2, 4, 32>}, {pipeline_mode = #tpu.pipeline_mode<synchronous>, transform_indices = @transform_2, window_bounds = array<i64: 67, 32, 32>}, {pipeline_mode = #tpu.pipeline_mode<synchronous>, transform_indices = @transform_3, window_bounds = array<i64: 2, 128>}, {transform_indices = @transform_4, window_bounds = array<i64: 2, 64, 128>}]} {
    %c0 = arith.constant 0 : index
    %c0_0 = arith.constant 0 : index
    %c0_1 = arith.constant 0 : index
    %0 = vector.load %arg1[%c0, %c0_0, %c0_1] : memref<2x104x4xf32, #tpu.memory_space<vmem>>, vector<2x104x4xf32>
    %1 = vector.shape_cast %0 : vector<2x104x4xf32> to vector<208x4xf32>
    %c0_2 = arith.constant 0 : index
    %c0_3 = arith.constant 0 : index
    %c0_4 = arith.constant 0 : index
    %2 = vector.load %arg2[%c0_2, %c0_3, %c0_4] : memref<2x4x32xf32, #tpu.memory_space<vmem>>, vector<1x4x32xf32>
    %3 = vector.shape_cast %2 : vector<1x4x32xf32> to vector<4x32xf32>
    %cst = arith.constant dense<0.000000e+00> : vector<208x32xf32>
    %4 = tpu.matmul %1, %3, %cst {dimension_numbers = #tpu.dot_dimension_numbers<[1], [0], [0], [1], [0, 0, 1, 1], [], []>} : vector<208x4xf32>, vector<4x32xf32>, vector<208x32xf32> -> vector<208x32xf32>
    %5 = vector.shape_cast %4 : vector<208x32xf32> to vector<2x104x32xf32>
    %c0_5 = arith.constant 0 : index
    %c0_6 = arith.constant 0 : index
    %c0_7 = arith.constant 0 : index
    %6 = vector.load %arg6[%c0_5, %c0_6, %c0_7] : memref<2x104x32xf32, #tpu.memory_space<vmem>>, vector<2x104x32xf32>
    tpu.vector_store %arg6[%c0_5, %c0_6, %c0_7], %5 {strides = array<i32>} : memref<2x104x32xf32, #tpu.memory_space<vmem>>, vector<2x104x32xf32>,
    %cst_8 = arith.constant 0.000000e+00 : f32
    %7 = vector.broadcast %cst_8 : f32 to vector<128x32xf32>
    %c0_9 = arith.constant 0 : index
    %c0_10 = arith.constant 0 : index
    %c0_11 = arith.constant 0 : index
    %8 = vector.load %arg6[%c0_9, %c0_10, %c0_11] : memref<2x104x32xf32, #tpu.memory_space<vmem>>, vector<2x64x32xf32>
    %9 = vector.shape_cast %8 : vector<2x64x32xf32> to vector<128x32xf32>
    %10 = arith.truncf %9 : vector<128x32xf32> to vector<128x32xbf16>
    %c0_12 = arith.constant 0 : index
    %c0_13 = arith.constant 0 : index
    %c0_14 = arith.constant 0 : index
    %11 = vector.load %arg3[%c0_12, %c0_13, %c0_14] : memref<67x32x32xbf16, #tpu.memory_space<vmem>>, vector<1x32x32xbf16>
    %12 = vector.shape_cast %11 : vector<1x32x32xbf16> to vector<32x32xbf16>
    %cst_15 = arith.constant dense<0.000000e+00> : vector<128x32xf32>
    %13 = tpu.matmul %10, %12, %cst_15 {dimension_numbers = #tpu.dot_dimension_numbers<[1], [0], [0], [1], [0, 0, 1, 1], [], []>} : vector<128x32xbf16>, vector<32x32xbf16>, vector<128x32xf32> -> vector<128x32xf32>
    %14 = arith.addf %7, %13 : vector<128x32xf32>
    %c0_16 = arith.constant 0 : index
    %c1 = arith.constant 1 : index
    %c0_17 = arith.constant 0 : index
    %15 = vector.load %arg6[%c0_16, %c1, %c0_17] : memref<2x104x32xf32, #tpu.memory_space<vmem>>, vector<2x64x32xf32>
    %16 = vector.shape_cast %15 : vector<2x64x32xf32> to vector<128x32xf32>
    %17 = arith.truncf %16 : vector<128x32xf32> to vector<128x32xbf16>
    %c1_18 = arith.constant 1 : index
    %c0_19 = arith.constant 0 : index
    %c0_20 = arith.constant 0 : index
    %18 = vector.load %arg3[%c1_18, %c0_19, %c0_20] : memref<67x32x32xbf16, #tpu.memory_space<vmem>>, vector<1x32x32xbf16>
    %19 = vector.shape_cast %18 : vector<1x32x32xbf16> to vector<32x32xbf16>
    %cst_21 = arith.constant dense<0.000000e+00> : vector<128x32xf32>
    %20 = tpu.matmul %17, %19, %cst_21 {dimension_numbers = #tpu.dot_dimension_numbers<[1], [0], [0], [1], [0, 0, 1, 1], [], []>} : vector<128x32xbf16>, vector<32x32xbf16>, vector<128x32xf32> -> vector<128x32xf32>
    %21 = arith.addf %14, %20 : vector<128x32xf32>
    %c0_22 = arith.constant 0 : index
    %c2 = arith.constant 2 : index
    %c0_23 = arith.constant 0 : index
    %22 = vector.load %arg6[%c0_22, %c2, %c0_23] : memref<2x104x32xf32, #tpu.memory_space<vmem>>, vector<2x64x32xf32>
    %23 = vector.shape_cast %22 : vector<2x64x32xf32> to vector<128x32xf32>
    %24 = arith.truncf %23 : vector<128x32xf32> to vector<128x32xbf16>
    %c2_24 = arith.constant 2 : index
    %c0_25 = arith.constant 0 : index
    %c0_26 = arith.constant 0 : index
    %25 = vector.load %arg3[%c2_24, %c0_25, %c0_26] : memref<67x32x32xbf16, #tpu.memory_space<vmem>>, vector<1x32x32xbf16>
    %26 = vector.shape_cast %25 : vector<1x32x32xbf16> to vector<32x32xbf16>
    %cst_27 = arith.constant dense<0.000000e+00> : vector<128x32xf32>
    %27 = tpu.matmul %24, %26, %cst_27 {dimension_numbers = #tpu.dot_dimension_numbers<[1], [0], [0], [1], [0, 0, 1, 1], [], []>} : vector<128x32xbf16>, vector<32x32xbf16>, vector<128x32xf32> -> vector<128x32xf32>
    %28 = arith.addf %21, %27 : vector<128x32xf32>
    %c0_28 = arith.constant 0 : index
    %c3 = arith.constant 3 : index
    %c0_29 = arith.constant 0 : index
    %29 = vector.load %arg6[%c0_28, %c3, %c0_29] : memref<2x104x32xf32, #tpu.memory_space<vmem>>, vector<2x64x32xf32>
    %30 = vector.shape_cast %29 : vector<2x64x32xf32> to vector<128x32xf32>
    %31 = arith.truncf %30 : vector<128x32xf32> to vector<128x32xbf16>
    %c3_30 = arith.constant 3 : index
    %c0_31 = arith.constant 0 : index
    %c0_32 = arith.constant 0 : index
    %32 = vector.load %arg3[%c3_30, %c0_31, %c0_32] : memref<67x32x32xbf16, #tpu.memory_space<vmem>>, vector<1x32x32xbf16>
    %33 = vector.shape_cast %32 : vector<1x32x32xbf16> to vector<32x32xbf16>
    %cst_33 = arith.constant dense<0.000000e+00> : vector<128x32xf32>
    %34 = tpu.matmul %31, %33, %cst_33 {dimension_numbers = #tpu.dot_dimension_numbers<[1], [0], [0], [1], [0, 0, 1, 1], [], []>} : vector<128x32xbf16>, vector<32x32xbf16>, vector<128x32xf32> -> vector<128x32xf32>
    %35 = arith.addf %28, %34 : vector<128x32xf32>
    %c0_34 = arith.constant 0 : index
    %c4 = arith.constant 4 : index
    %c0_35 = arith.constant 0 : index
    %36 = vector.load %arg6[%c0_34, %c4, %c0_35] : memref<2x104x32xf32, #tpu.memory_space<vmem>>, vector<2x64x32xf32>
    %37 = vector.shape_cast %36 : vector<2x64x32xf32> to vector<128x32xf32>
    %38 = arith.truncf %37 : vector<128x32xf32> to vector<128x32xbf16>
    %c4_36 = arith.constant 4 : index
    %c0_37 = arith.constant 0 : index
    %c0_38 = arith.constant 0 : index
    %39 = vector.load %arg3[%c4_36, %c0_37, %c0_38] : memref<67x32x32xbf16, #tpu.memory_space<vmem>>, vector<1x32x32xbf16>
    %40 = vector.shape_cast %39 : vector<1x32x32xbf16> to vector<32x32xbf16>
    %cst_39 = arith.constant dense<0.000000e+00> : vector<128x32xf32>
    %41 = tpu.matmul %38, %40, %cst_39 {dimension_numbers = #tpu.dot_dimension_numbers<[1], [0], [0], [1], [0, 0, 1, 1], [], []>} : vector<128x32xbf16>, vector<32x32xbf16>, vector<128x32xf32> -> vector<128x32xf32>
    %42 = arith.addf %35, %41 : vector<128x32xf32>
    %c0_40 = arith.constant 0 : index
    %c5 = arith.constant 5 : index
    %c0_41 = arith.constant 0 : index
    %43 = vector.load %arg6[%c0_40, %c5, %c0_41] : memref<2x104x32xf32, #tpu.memory_space<vmem>>, vector<2x64x32xf32>
    %44 = vector.shape_cast %43 : vector<2x64x32xf32> to vector<128x32xf32>
    %45 = arith.truncf %44 : vector<128x32xf32> to vector<128x32xbf16>
    %c5_42 = arith.constant 5 : index
    %c0_43 = arith.constant 0 : index
    %c0_44 = arith.constant 0 : index
    %46 = vector.load %arg3[%c5_42, %c0_43, %c0_44] : memref<67x32x32xbf16, #tpu.memory_space<vmem>>, vector<1x32x32xbf16>
    %47 = vector.shape_cast %46 : vector<1x32x32xbf16> to vector<32x32xbf16>
    %cst_45 = arith.constant dense<0.000000e+00> : vector<128x32xf32>
    %48 = tpu.matmul %45, %47, %cst_45 {dimension_numbers = #tpu.dot_dimension_numbers<[1], [0], [0], [1], [0, 0, 1, 1], [], []>} : vector<128x32xbf16>, vector<32x32xbf16>, vector<128x32xf32> -> vector<128x32xf32>
    %49 = arith.addf %42, %48 : vector<128x32xf32>
    %c0_46 = arith.constant 0 : index
    %c6 = arith.constant 6 : index
    %c0_47 = arith.constant 0 : index
    %50 = vector.load %arg6[%c0_46, %c6, %c0_47] : memref<2x104x32xf32, #tpu.memory_space<vmem>>, vector<2x64x32xf32>
    %51 = vector.shape_cast %50 : vector<2x64x32xf32> to vector<128x32xf32>
    %52 = arith.truncf %51 : vector<128x32xf32> to vector<128x32xbf16>
    %c6_48 = arith.constant 6 : index
    %c0_49 = arith.constant 0 : index
    %c0_50 = arith.constant 0 : index
    %53 = vector.load %arg3[%c6_48, %c0_49, %c0_50] : memref<67x32x32xbf16, #tpu.memory_space<vmem>>, vector<1x32x32xbf16>
    %54 = vector.shape_cast %53 : vector<1x32x32xbf16> to vector<32x32xbf16>
    %cst_51 = arith.constant dense<0.000000e+00> : vector<128x32xf32>
    %55 = tpu.matmul %52, %54, %cst_51 {dimension_numbers = #tpu.dot_dimension_numbers<[1], [0], [0], [1], [0, 0, 1, 1], [], []>} : vector<128x32xbf16>, vector<32x32xbf16>, vector<128x32xf32> -> vector<128x32xf32>
    %56 = arith.addf %49, %55 : vector<128x32xf32>
    %c0_52 = arith.constant 0 : index
    %c7 = arith.constant 7 : index
    %c0_53 = arith.constant 0 : index
    %57 = vector.load %arg6[%c0_52, %c7, %c0_53] : memref<2x104x32xf32, #tpu.memory_space<vmem>>, vector<2x64x32xf32>
    %58 = vector.shape_cast %57 : vector<2x64x32xf32> to vector<128x32xf32>
    %59 = arith.truncf %58 : vector<128x32xf32> to vector<128x32xbf16>
    %c7_54 = arith.constant 7 : index
    %c0_55 = arith.constant 0 : index
    %c0_56 = arith.constant 0 : index
    %60 = vector.load %arg3[%c7_54, %c0_55, %c0_56] : memref<67x32x32xbf16, #tpu.memory_space<vmem>>, vector<1x32x32xbf16>
    %61 = vector.shape_cast %60 : vector<1x32x32xbf16> to vector<32x32xbf16>
    %cst_57 = arith.constant dense<0.000000e+00> : vector<128x32xf32>
    %62 = tpu.matmul %59, %61, %cst_57 {dimension_numbers = #tpu.dot_dimension_numbers<[1], [0], [0], [1], [0, 0, 1, 1], [], []>} : vector<128x32xbf16>, vector<32x32xbf16>, vector<128x32xf32> -> vector<128x32xf32>
    %63 = arith.addf %56, %62 : vector<128x32xf32>
    %c0_58 = arith.constant 0 : index
    %c8 = arith.constant 8 : index
    %c0_59 = arith.constant 0 : index
    %64 = vector.load %arg6[%c0_58, %c8, %c0_59] : memref<2x104x32xf32, #tpu.memory_space<vmem>>, vector<2x64x32xf32>
    %65 = vector.shape_cast %64 : vector<2x64x32xf32> to vector<128x32xf32>
    %66 = arith.truncf %65 : vector<128x32xf32> to vector<128x32xbf16>
    %c8_60 = arith.constant 8 : index
    %c0_61 = arith.constant 0 : index
    %c0_62 = arith.constant 0 : index
    %67 = vector.load %arg3[%c8_60, %c0_61, %c0_62] : memref<67x32x32xbf16, #tpu.memory_space<vmem>>, vector<1x32x32xbf16>
    %68 = vector.shape_cast %67 : vector<1x32x32xbf16> to vector<32x32xbf16>
    %cst_63 = arith.constant dense<0.000000e+00> : vector<128x32xf32>
    %69 = tpu.matmul %66, %68, %cst_63 {dimension_numbers = #tpu.dot_dimension_numbers<[1], [0], [0], [1], [0, 0, 1, 1], [], []>} : vector<128x32xbf16>, vector<32x32xbf16>, vector<128x32xf32> -> vector<128x32xf32>
    %70 = arith.addf %63, %69 : vector<128x32xf32>
    %c0_64 = arith.constant 0 : index
    %c9 = arith.constant 9 : index
    %c0_65 = arith.constant 0 : index
    %71 = vector.load %arg6[%c0_64, %c9, %c0_65] : memref<2x104x32xf32, #tpu.memory_space<vmem>>, vector<2x64x32xf32>
    %72 = vector.shape_cast %71 : vector<2x64x32xf32> to vector<128x32xf32>
    %73 = arith.truncf %72 : vector<128x32xf32> to vector<128x32xbf16>
    %c9_66 = arith.constant 9 : index
    %c0_67 = arith.constant 0 : index
    %c0_68 = arith.constant 0 : index
    %74 = vector.load %arg3[%c9_66, %c0_67, %c0_68] : memref<67x32x32xbf16, #tpu.memory_space<vmem>>, vector<1x32x32xbf16>
    %75 = vector.shape_cast %74 : vector<1x32x32xbf16> to vector<32x32xbf16>
    %cst_69 = arith.constant dense<0.000000e+00> : vector<128x32xf32>
    %76 = tpu.matmul %73, %75, %cst_69 {dimension_numbers = #tpu.dot_dimension_numbers<[1], [0], [0], [1], [0, 0, 1, 1], [], []>} : vector<128x32xbf16>, vector<32x32xbf16>, vector<128x32xf32> -> vector<128x32xf32>
    %77 = arith.addf %70, %76 : vector<128x32xf32>
    %c0_70 = arith.constant 0 : index
    %c10 = arith.constant 10 : index
    %c0_71 = arith.constant 0 : index
    %78 = vector.load %arg6[%c0_70, %c10, %c0_71] : memref<2x104x32xf32, #tpu.memory_space<vmem>>, vector<2x64x32xf32>
    %79 = vector.shape_cast %78 : vector<2x64x32xf32> to vector<128x32xf32>
    %80 = arith.truncf %79 : vector<128x32xf32> to vector<128x32xbf16>
    %c10_72 = arith.constant 10 : index
    %c0_73 = arith.constant 0 : index
    %c0_74 = arith.constant 0 : index
    %81 = vector.load %arg3[%c10_72, %c0_73, %c0_74] : memref<67x32x32xbf16, #tpu.memory_space<vmem>>, vector<1x32x32xbf16>
    %82 = vector.shape_cast %81 : vector<1x32x32xbf16> to vector<32x32xbf16>
    %cst_75 = arith.constant dense<0.000000e+00> : vector<128x32xf32>
    %83 = tpu.matmul %80, %82, %cst_75 {dimension_numbers = #tpu.dot_dimension_numbers<[1], [0], [0], [1], [0, 0, 1, 1], [], []>} : vector<128x32xbf16>, vector<32x32xbf16>, vector<128x32xf32> -> vector<128x32xf32>
    %84 = arith.addf %77, %83 : vector<128x32xf32>
    %c0_76 = arith.constant 0 : index
    %c11 = arith.constant 11 : index
    %c0_77 = arith.constant 0 : index
    %85 = vector.load %arg6[%c0_76, %c11, %c0_77] : memref<2x104x32xf32, #tpu.memory_space<vmem>>, vector<2x64x32xf32>
    %86 = vector.shape_cast %85 : vector<2x64x32xf32> to vector<128x32xf32>
    %87 = arith.truncf %86 : vector<128x32xf32> to vector<128x32xbf16>
    %c11_78 = arith.constant 11 : index
    %c0_79 = arith.constant 0 : index
    %c0_80 = arith.constant 0 : index
    %88 = vector.load %arg3[%c11_78, %c0_79, %c0_80] : memref<67x32x32xbf16, #tpu.memory_space<vmem>>, vector<1x32x32xbf16>
    %89 = vector.shape_cast %88 : vector<1x32x32xbf16> to vector<32x32xbf16>
    %cst_81 = arith.constant dense<0.000000e+00> : vector<128x32xf32>
    %90 = tpu.matmul %87, %89, %cst_81 {dimension_numbers = #tpu.dot_dimension_numbers<[1], [0], [0], [1], [0, 0, 1, 1], [], []>} : vector<128x32xbf16>, vector<32x32xbf16>, vector<128x32xf32> -> vector<128x32xf32>
    %91 = arith.addf %84, %90 : vector<128x32xf32>
    %c0_82 = arith.constant 0 : index
    %c12 = arith.constant 12 : index
    %c0_83 = arith.constant 0 : index
    %92 = vector.load %arg6[%c0_82, %c12, %c0_83] : memref<2x104x32xf32, #tpu.memory_space<vmem>>, vector<2x64x32xf32>
    %93 = vector.shape_cast %92 : vector<2x64x32xf32> to vector<128x32xf32>
    %94 = arith.truncf %93 : vector<128x32xf32> to vector<128x32xbf16>
    %c12_84 = arith.constant 12 : index
    %c0_85 = arith.constant 0 : index
    %c0_86 = arith.constant 0 : index
    %95 = vector.load %arg3[%c12_84, %c0_85, %c0_86] : memref<67x32x32xbf16, #tpu.memory_space<vmem>>, vector<1x32x32xbf16>
    %96 = vector.shape_cast %95 : vector<1x32x32xbf16> to vector<32x32xbf16>
    %cst_87 = arith.constant dense<0.000000e+00> : vector<128x32xf32>
    %97 = tpu.matmul %94, %96, %cst_87 {dimension_numbers = #tpu.dot_dimension_numbers<[1], [0], [0], [1], [0, 0, 1, 1], [], []>} : vector<128x32xbf16>, vector<32x32xbf16>, vector<128x32xf32> -> vector<128x32xf32>
    %98 = arith.addf %91, %97 : vector<128x32xf32>
    %c0_88 = arith.constant 0 : index
    %c13 = arith.constant 13 : index
    %c0_89 = arith.constant 0 : index
    %99 = vector.load %arg6[%c0_88, %c13, %c0_89] : memref<2x104x32xf32, #tpu.memory_space<vmem>>, vector<2x64x32xf32>
    %100 = vector.shape_cast %99 : vector<2x64x32xf32> to vector<128x32xf32>
    %101 = arith.truncf %100 : vector<128x32xf32> to vector<128x32xbf16>
    %c13_90 = arith.constant 13 : index
    %c0_91 = arith.constant 0 : index
    %c0_92 = arith.constant 0 : index
    %102 = vector.load %arg3[%c13_90, %c0_91, %c0_92] : memref<67x32x32xbf16, #tpu.memory_space<vmem>>, vector<1x32x32xbf16>
    %103 = vector.shape_cast %102 : vector<1x32x32xbf16> to vector<32x32xbf16>
    %cst_93 = arith.constant dense<0.000000e+00> : vector<128x32xf32>
    %104 = tpu.matmul %101, %103, %cst_93 {dimension_numbers = #tpu.dot_dimension_numbers<[1], [0], [0], [1], [0, 0, 1, 1], [], []>} : vector<128x32xbf16>, vector<32x32xbf16>, vector<128x32xf32> -> vector<128x32xf32>
    %105 = arith.addf %98, %104 : vector<128x32xf32>
    %c0_94 = arith.constant 0 : index
    %c14 = arith.constant 14 : index
    %c0_95 = arith.constant 0 : index
    %106 = vector.load %arg6[%c0_94, %c14, %c0_95] : memref<2x104x32xf32, #tpu.memory_space<vmem>>, vector<2x64x32xf32>
    %107 = vector.shape_cast %106 : vector<2x64x32xf32> to vector<128x32xf32>
    %108 = arith.truncf %107 : vector<128x32xf32> to vector<128x32xbf16>
    %c14_96 = arith.constant 14 : index
    %c0_97 = arith.constant 0 : index
    %c0_98 = arith.constant 0 : index
    %109 = vector.load %arg3[%c14_96, %c0_97, %c0_98] : memref<67x32x32xbf16, #tpu.memory_space<vmem>>, vector<1x32x32xbf16>
    %110 = vector.shape_cast %109 : vector<1x32x32xbf16> to vector<32x32xbf16>
    %cst_99 = arith.constant dense<0.000000e+00> : vector<128x32xf32>
    %111 = tpu.matmul %108, %110, %cst_99 {dimension_numbers = #tpu.dot_dimension_numbers<[1], [0], [0], [1], [0, 0, 1, 1], [], []>} : vector<128x32xbf16>, vector<32x32xbf16>, vector<128x32xf32> -> vector<128x32xf32>
    %112 = arith.addf %105, %111 : vector<128x32xf32>
    %c0_100 = arith.constant 0 : index
    %c15 = arith.constant 15 : index
    %c0_101 = arith.constant 0 : index
    %113 = vector.load %arg6[%c0_100, %c15, %c0_101] : memref<2x104x32xf32, #tpu.memory_space<vmem>>, vector<2x64x32xf32>
    %114 = vector.shape_cast %113 : vector<2x64x32xf32> to vector<128x32xf32>
    %115 = arith.truncf %114 : vector<128x32xf32> to vector<128x32xbf16>
    %c15_102 = arith.constant 15 : index
    %c0_103 = arith.constant 0 : index
    %c0_104 = arith.constant 0 : index
    %116 = vector.load %arg3[%c15_102, %c0_103, %c0_104] : memref<67x32x32xbf16, #tpu.memory_space<vmem>>, vector<1x32x32xbf16>
    %117 = vector.shape_cast %116 : vector<1x32x32xbf16> to vector<32x32xbf16>
    %cst_105 = arith.constant dense<0.000000e+00> : vector<128x32xf32>
    %118 = tpu.matmul %115, %117, %cst_105 {dimension_numbers = #tpu.dot_dimension_numbers<[1], [0], [0], [1], [0, 0, 1, 1], [], []>} : vector<128x32xbf16>, vector<32x32xbf16>, vector<128x32xf32> -> vector<128x32xf32>
    %119 = arith.addf %112, %118 : vector<128x32xf32>
    %c0_106 = arith.constant 0 : index
    %c16 = arith.constant 16 : index
    %c0_107 = arith.constant 0 : index
    %120 = vector.load %arg6[%c0_106, %c16, %c0_107] : memref<2x104x32xf32, #tpu.memory_space<vmem>>, vector<2x64x32xf32>
    %121 = vector.shape_cast %120 : vector<2x64x32xf32> to vector<128x32xf32>
    %122 = arith.truncf %121 : vector<128x32xf32> to vector<128x32xbf16>
    %c16_108 = arith.constant 16 : index
    %c0_109 = arith.constant 0 : index
    %c0_110 = arith.constant 0 : index
    %123 = vector.load %arg3[%c16_108, %c0_109, %c0_110] : memref<67x32x32xbf16, #tpu.memory_space<vmem>>, vector<1x32x32xbf16>
    %124 = vector.shape_cast %123 : vector<1x32x32xbf16> to vector<32x32xbf16>
    %cst_111 = arith.constant dense<0.000000e+00> : vector<128x32xf32>
    %125 = tpu.matmul %122, %124, %cst_111 {dimension_numbers = #tpu.dot_dimension_numbers<[1], [0], [0], [1], [0, 0, 1, 1], [], []>} : vector<128x32xbf16>, vector<32x32xbf16>, vector<128x32xf32> -> vector<128x32xf32>
    %126 = arith.addf %119, %125 : vector<128x32xf32>
    %c0_112 = arith.constant 0 : index
    %c17 = arith.constant 17 : index
    %c0_113 = arith.constant 0 : index
    %127 = vector.load %arg6[%c0_112, %c17, %c0_113] : memref<2x104x32xf32, #tpu.memory_space<vmem>>, vector<2x64x32xf32>
    %128 = vector.shape_cast %127 : vector<2x64x32xf32> to vector<128x32xf32>
    %129 = arith.truncf %128 : vector<128x32xf32> to vector<128x32xbf16>
    %c17_114 = arith.constant 17 : index
    %c0_115 = arith.constant 0 : index
    %c0_116 = arith.constant 0 : index
    %130 = vector.load %arg3[%c17_114, %c0_115, %c0_116] : memref<67x32x32xbf16, #tpu.memory_space<vmem>>, vector<1x32x32xbf16>
    %131 = vector.shape_cast %130 : vector<1x32x32xbf16> to vector<32x32xbf16>
    %cst_117 = arith.constant dense<0.000000e+00> : vector<128x32xf32>
    %132 = tpu.matmul %129, %131, %cst_117 {dimension_numbers = #tpu.dot_dimension_numbers<[1], [0], [0], [1], [0, 0, 1, 1], [], []>} : vector<128x32xbf16>, vector<32x32xbf16>, vector<128x32xf32> -> vector<128x32xf32>
    %133 = arith.addf %126, %132 : vector<128x32xf32>
    %c0_118 = arith.constant 0 : index
    %c18 = arith.constant 18 : index
    %c0_119 = arith.constant 0 : index
    %134 = vector.load %arg6[%c0_118, %c18, %c0_119] : memref<2x104x32xf32, #tpu.memory_space<vmem>>, vector<2x64x32xf32>
    %135 = vector.shape_cast %134 : vector<2x64x32xf32> to vector<128x32xf32>
    %136 = arith.truncf %135 : vector<128x32xf32> to vector<128x32xbf16>
    %c18_120 = arith.constant 18 : index
    %c0_121 = arith.constant 0 : index
    %c0_122 = arith.constant 0 : index
    %137 = vector.load %arg3[%c18_120, %c0_121, %c0_122] : memref<67x32x32xbf16, #tpu.memory_space<vmem>>, vector<1x32x32xbf16>
    %138 = vector.shape_cast %137 : vector<1x32x32xbf16> to vector<32x32xbf16>
    %cst_123 = arith.constant dense<0.000000e+00> : vector<128x32xf32>
    %139 = tpu.matmul %136, %138, %cst_123 {dimension_numbers = #tpu.dot_dimension_numbers<[1], [0], [0], [1], [0, 0, 1, 1], [], []>} : vector<128x32xbf16>, vector<32x32xbf16>, vector<128x32xf32> -> vector<128x32xf32>
    %140 = arith.addf %133, %139 : vector<128x32xf32>
    %c0_124 = arith.constant 0 : index
    %c19 = arith.constant 19 : index
    %c0_125 = arith.constant 0 : index
    %141 = vector.load %arg6[%c0_124, %c19, %c0_125] : memref<2x104x32xf32, #tpu.memory_space<vmem>>, vector<2x64x32xf32>
    %142 = vector.shape_cast %141 : vector<2x64x32xf32> to vector<128x32xf32>
    %143 = arith.truncf %142 : vector<128x32xf32> to vector<128x32xbf16>
    %c19_126 = arith.constant 19 : index
    %c0_127 = arith.constant 0 : index
    %c0_128 = arith.constant 0 : index
    %144 = vector.load %arg3[%c19_126, %c0_127, %c0_128] : memref<67x32x32xbf16, #tpu.memory_space<vmem>>, vector<1x32x32xbf16>
    %145 = vector.shape_cast %144 : vector<1x32x32xbf16> to vector<32x32xbf16>
    %cst_129 = arith.constant dense<0.000000e+00> : vector<128x32xf32>
    %146 = tpu.matmul %143, %145, %cst_129 {dimension_numbers = #tpu.dot_dimension_numbers<[1], [0], [0], [1], [0, 0, 1, 1], [], []>} : vector<128x32xbf16>, vector<32x32xbf16>, vector<128x32xf32> -> vector<128x32xf32>
    %147 = arith.addf %140, %146 : vector<128x32xf32>
    %c0_130 = arith.constant 0 : index
    %c20 = arith.constant 20 : index
    %c0_131 = arith.constant 0 : index
    %148 = vector.load %arg6[%c0_130, %c20, %c0_131] : memref<2x104x32xf32, #tpu.memory_space<vmem>>, vector<2x64x32xf32>
    %149 = vector.shape_cast %148 : vector<2x64x32xf32> to vector<128x32xf32>
    %150 = arith.truncf %149 : vector<128x32xf32> to vector<128x32xbf16>
    %c20_132 = arith.constant 20 : index
    %c0_133 = arith.constant 0 : index
    %c0_134 = arith.constant 0 : index
    %151 = vector.load %arg3[%c20_132, %c0_133, %c0_134] : memref<67x32x32xbf16, #tpu.memory_space<vmem>>, vector<1x32x32xbf16>
    %152 = vector.shape_cast %151 : vector<1x32x32xbf16> to vector<32x32xbf16>
    %cst_135 = arith.constant dense<0.000000e+00> : vector<128x32xf32>
    %153 = tpu.matmul %150, %152, %cst_135 {dimension_numbers = #tpu.dot_dimension_numbers<[1], [0], [0], [1], [0, 0, 1, 1], [], []>} : vector<128x32xbf16>, vector<32x32xbf16>, vector<128x32xf32> -> vector<128x32xf32>
    %154 = arith.addf %147, %153 : vector<128x32xf32>
    %c0_136 = arith.constant 0 : index
    %c21 = arith.constant 21 : index
    %c0_137 = arith.constant 0 : index
    %155 = vector.load %arg6[%c0_136, %c21, %c0_137] : memref<2x104x32xf32, #tpu.memory_space<vmem>>, vector<2x64x32xf32>
    %156 = vector.shape_cast %155 : vector<2x64x32xf32> to vector<128x32xf32>
    %157 = arith.truncf %156 : vector<128x32xf32> to vector<128x32xbf16>
    %c21_138 = arith.constant 21 : index
    %c0_139 = arith.constant 0 : index
    %c0_140 = arith.constant 0 : index
    %158 = vector.load %arg3[%c21_138, %c0_139, %c0_140] : memref<67x32x32xbf16, #tpu.memory_space<vmem>>, vector<1x32x32xbf16>
    %159 = vector.shape_cast %158 : vector<1x32x32xbf16> to vector<32x32xbf16>
    %cst_141 = arith.constant dense<0.000000e+00> : vector<128x32xf32>
    %160 = tpu.matmul %157, %159, %cst_141 {dimension_numbers = #tpu.dot_dimension_numbers<[1], [0], [0], [1], [0, 0, 1, 1], [], []>} : vector<128x32xbf16>, vector<32x32xbf16>, vector<128x32xf32> -> vector<128x32xf32>
    %161 = arith.addf %154, %160 : vector<128x32xf32>
    %c0_142 = arith.constant 0 : index
    %c22 = arith.constant 22 : index
    %c0_143 = arith.constant 0 : index
    %162 = vector.load %arg6[%c0_142, %c22, %c0_143] : memref<2x104x32xf32, #tpu.memory_space<vmem>>, vector<2x64x32xf32>
    %163 = vector.shape_cast %162 : vector<2x64x32xf32> to vector<128x32xf32>
    %164 = arith.truncf %163 : vector<128x32xf32> to vector<128x32xbf16>
    %c22_144 = arith.constant 22 : index
    %c0_145 = arith.constant 0 : index
    %c0_146 = arith.constant 0 : index
    %165 = vector.load %arg3[%c22_144, %c0_145, %c0_146] : memref<67x32x32xbf16, #tpu.memory_space<vmem>>, vector<1x32x32xbf16>
    %166 = vector.shape_cast %165 : vector<1x32x32xbf16> to vector<32x32xbf16>
    %cst_147 = arith.constant dense<0.000000e+00> : vector<128x32xf32>
    %167 = tpu.matmul %164, %166, %cst_147 {dimension_numbers = #tpu.dot_dimension_numbers<[1], [0], [0], [1], [0, 0, 1, 1], [], []>} : vector<128x32xbf16>, vector<32x32xbf16>, vector<128x32xf32> -> vector<128x32xf32>
    %168 = arith.addf %161, %167 : vector<128x32xf32>
    %c0_148 = arith.constant 0 : index
    %c23 = arith.constant 23 : index
    %c0_149 = arith.constant 0 : index
    %169 = vector.load %arg6[%c0_148, %c23, %c0_149] : memref<2x104x32xf32, #tpu.memory_space<vmem>>, vector<2x64x32xf32>
    %170 = vector.shape_cast %169 : vector<2x64x32xf32> to vector<128x32xf32>
    %171 = arith.truncf %170 : vector<128x32xf32> to vector<128x32xbf16>
    %c23_150 = arith.constant 23 : index
    %c0_151 = arith.constant 0 : index
    %c0_152 = arith.constant 0 : index
    %172 = vector.load %arg3[%c23_150, %c0_151, %c0_152] : memref<67x32x32xbf16, #tpu.memory_space<vmem>>, vector<1x32x32xbf16>
    %173 = vector.shape_cast %172 : vector<1x32x32xbf16> to vector<32x32xbf16>
    %cst_153 = arith.constant dense<0.000000e+00> : vector<128x32xf32>
    %174 = tpu.matmul %171, %173, %cst_153 {dimension_numbers = #tpu.dot_dimension_numbers<[1], [0], [0], [1], [0, 0, 1, 1], [], []>} : vector<128x32xbf16>, vector<32x32xbf16>, vector<128x32xf32> -> vector<128x32xf32>
    %175 = arith.addf %168, %174 : vector<128x32xf32>
    %c0_154 = arith.constant 0 : index
    %c24 = arith.constant 24 : index
    %c0_155 = arith.constant 0 : index
    %176 = vector.load %arg6[%c0_154, %c24, %c0_155] : memref<2x104x32xf32, #tpu.memory_space<vmem>>, vector<2x64x32xf32>
    %177 = vector.shape_cast %176 : vector<2x64x32xf32> to vector<128x32xf32>
    %178 = arith.truncf %177 : vector<128x32xf32> to vector<128x32xbf16>
    %c24_156 = arith.constant 24 : index
    %c0_157 = arith.constant 0 : index
    %c0_158 = arith.constant 0 : index
    %179 = vector.load %arg3[%c24_156, %c0_157, %c0_158] : memref<67x32x32xbf16, #tpu.memory_space<vmem>>, vector<1x32x32xbf16>
    %180 = vector.shape_cast %179 : vector<1x32x32xbf16> to vector<32x32xbf16>
    %cst_159 = arith.constant dense<0.000000e+00> : vector<128x32xf32>
    %181 = tpu.matmul %178, %180, %cst_159 {dimension_numbers = #tpu.dot_dimension_numbers<[1], [0], [0], [1], [0, 0, 1, 1], [], []>} : vector<128x32xbf16>, vector<32x32xbf16>, vector<128x32xf32> -> vector<128x32xf32>
    %182 = arith.addf %175, %181 : vector<128x32xf32>
    %c0_160 = arith.constant 0 : index
    %c25 = arith.constant 25 : index
    %c0_161 = arith.constant 0 : index
    %183 = vector.load %arg6[%c0_160, %c25, %c0_161] : memref<2x104x32xf32, #tpu.memory_space<vmem>>, vector<2x64x32xf32>
    %184 = vector.shape_cast %183 : vector<2x64x32xf32> to vector<128x32xf32>
    %185 = arith.truncf %184 : vector<128x32xf32> to vector<128x32xbf16>
    %c25_162 = arith.constant 25 : index
    %c0_163 = arith.constant 0 : index
    %c0_164 = arith.constant 0 : index
    %186 = vector.load %arg3[%c25_162, %c0_163, %c0_164] : memref<67x32x32xbf16, #tpu.memory_space<vmem>>, vector<1x32x32xbf16>
    %187 = vector.shape_cast %186 : vector<1x32x32xbf16> to vector<32x32xbf16>
    %cst_165 = arith.constant dense<0.000000e+00> : vector<128x32xf32>
    %188 = tpu.matmul %185, %187, %cst_165 {dimension_numbers = #tpu.dot_dimension_numbers<[1], [0], [0], [1], [0, 0, 1, 1], [], []>} : vector<128x32xbf16>, vector<32x32xbf16>, vector<128x32xf32> -> vector<128x32xf32>
    %189 = arith.addf %182, %188 : vector<128x32xf32>
    %c0_166 = arith.constant 0 : index
    %c26 = arith.constant 26 : index
    %c0_167 = arith.constant 0 : index
    %190 = vector.load %arg6[%c0_166, %c26, %c0_167] : memref<2x104x32xf32, #tpu.memory_space<vmem>>, vector<2x64x32xf32>
    %191 = vector.shape_cast %190 : vector<2x64x32xf32> to vector<128x32xf32>
    %192 = arith.truncf %191 : vector<128x32xf32> to vector<128x32xbf16>
    %c26_168 = arith.constant 26 : index
    %c0_169 = arith.constant 0 : index
    %c0_170 = arith.constant 0 : index
    %193 = vector.load %arg3[%c26_168, %c0_169, %c0_170] : memref<67x32x32xbf16, #tpu.memory_space<vmem>>, vector<1x32x32xbf16>
    %194 = vector.shape_cast %193 : vector<1x32x32xbf16> to vector<32x32xbf16>
    %cst_171 = arith.constant dense<0.000000e+00> : vector<128x32xf32>
    %195 = tpu.matmul %192, %194, %cst_171 {dimension_numbers = #tpu.dot_dimension_numbers<[1], [0], [0], [1], [0, 0, 1, 1], [], []>} : vector<128x32xbf16>, vector<32x32xbf16>, vector<128x32xf32> -> vector<128x32xf32>
    %196 = arith.addf %189, %195 : vector<128x32xf32>
    %c0_172 = arith.constant 0 : index
    %c27 = arith.constant 27 : index
    %c0_173 = arith.constant 0 : index
    %197 = vector.load %arg6[%c0_172, %c27, %c0_173] : memref<2x104x32xf32, #tpu.memory_space<vmem>>, vector<2x64x32xf32>
    %198 = vector.shape_cast %197 : vector<2x64x32xf32> to vector<128x32xf32>
    %199 = arith.truncf %198 : vector<128x32xf32> to vector<128x32xbf16>
    %c27_174 = arith.constant 27 : index
    %c0_175 = arith.constant 0 : index
    %c0_176 = arith.constant 0 : index
    %200 = vector.load %arg3[%c27_174, %c0_175, %c0_176] : memref<67x32x32xbf16, #tpu.memory_space<vmem>>, vector<1x32x32xbf16>
    %201 = vector.shape_cast %200 : vector<1x32x32xbf16> to vector<32x32xbf16>
    %cst_177 = arith.constant dense<0.000000e+00> : vector<128x32xf32>
    %202 = tpu.matmul %199, %201, %cst_177 {dimension_numbers = #tpu.dot_dimension_numbers<[1], [0], [0], [1], [0, 0, 1, 1], [], []>} : vector<128x32xbf16>, vector<32x32xbf16>, vector<128x32xf32> -> vector<128x32xf32>
    %203 = arith.addf %196, %202 : vector<128x32xf32>
    %c0_178 = arith.constant 0 : index
    %c28 = arith.constant 28 : index
    %c0_179 = arith.constant 0 : index
    %204 = vector.load %arg6[%c0_178, %c28, %c0_179] : memref<2x104x32xf32, #tpu.memory_space<vmem>>, vector<2x64x32xf32>
    %205 = vector.shape_cast %204 : vector<2x64x32xf32> to vector<128x32xf32>
    %206 = arith.truncf %205 : vector<128x32xf32> to vector<128x32xbf16>
    %c28_180 = arith.constant 28 : index
    %c0_181 = arith.constant 0 : index
    %c0_182 = arith.constant 0 : index
    %207 = vector.load %arg3[%c28_180, %c0_181, %c0_182] : memref<67x32x32xbf16, #tpu.memory_space<vmem>>, vector<1x32x32xbf16>
    %208 = vector.shape_cast %207 : vector<1x32x32xbf16> to vector<32x32xbf16>
    %cst_183 = arith.constant dense<0.000000e+00> : vector<128x32xf32>
    %209 = tpu.matmul %206, %208, %cst_183 {dimension_numbers = #tpu.dot_dimension_numbers<[1], [0], [0], [1], [0, 0, 1, 1], [], []>} : vector<128x32xbf16>, vector<32x32xbf16>, vector<128x32xf32> -> vector<128x32xf32>
    %210 = arith.addf %203, %209 : vector<128x32xf32>
    %c0_184 = arith.constant 0 : index
    %c29 = arith.constant 29 : index
    %c0_185 = arith.constant 0 : index
    %211 = vector.load %arg6[%c0_184, %c29, %c0_185] : memref<2x104x32xf32, #tpu.memory_space<vmem>>, vector<2x64x32xf32>
    %212 = vector.shape_cast %211 : vector<2x64x32xf32> to vector<128x32xf32>
    %213 = arith.truncf %212 : vector<128x32xf32> to vector<128x32xbf16>
    %c29_186 = arith.constant 29 : index
    %c0_187 = arith.constant 0 : index
    %c0_188 = arith.constant 0 : index
    %214 = vector.load %arg3[%c29_186, %c0_187, %c0_188] : memref<67x32x32xbf16, #tpu.memory_space<vmem>>, vector<1x32x32xbf16>
    %215 = vector.shape_cast %214 : vector<1x32x32xbf16> to vector<32x32xbf16>
    %cst_189 = arith.constant dense<0.000000e+00> : vector<128x32xf32>
    %216 = tpu.matmul %213, %215, %cst_189 {dimension_numbers = #tpu.dot_dimension_numbers<[1], [0], [0], [1], [0, 0, 1, 1], [], []>} : vector<128x32xbf16>, vector<32x32xbf16>, vector<128x32xf32> -> vector<128x32xf32>
    %217 = arith.addf %210, %216 : vector<128x32xf32>
    %c0_190 = arith.constant 0 : index
    %c30 = arith.constant 30 : index
    %c0_191 = arith.constant 0 : index
    %218 = vector.load %arg6[%c0_190, %c30, %c0_191] : memref<2x104x32xf32, #tpu.memory_space<vmem>>, vector<2x64x32xf32>
    %219 = vector.shape_cast %218 : vector<2x64x32xf32> to vector<128x32xf32>
    %220 = arith.truncf %219 : vector<128x32xf32> to vector<128x32xbf16>
    %c30_192 = arith.constant 30 : index
    %c0_193 = arith.constant 0 : index
    %c0_194 = arith.constant 0 : index
    %221 = vector.load %arg3[%c30_192, %c0_193, %c0_194] : memref<67x32x32xbf16, #tpu.memory_space<vmem>>, vector<1x32x32xbf16>
    %222 = vector.shape_cast %221 : vector<1x32x32xbf16> to vector<32x32xbf16>
    %cst_195 = arith.constant dense<0.000000e+00> : vector<128x32xf32>
    %223 = tpu.matmul %220, %222, %cst_195 {dimension_numbers = #tpu.dot_dimension_numbers<[1], [0], [0], [1], [0, 0, 1, 1], [], []>} : vector<128x32xbf16>, vector<32x32xbf16>, vector<128x32xf32> -> vector<128x32xf32>
    %224 = arith.addf %217, %223 : vector<128x32xf32>
    %c0_196 = arith.constant 0 : index
    %c31 = arith.constant 31 : index
    %c0_197 = arith.constant 0 : index
    %225 = vector.load %arg6[%c0_196, %c31, %c0_197] : memref<2x104x32xf32, #tpu.memory_space<vmem>>, vector<2x64x32xf32>
    %226 = vector.shape_cast %225 : vector<2x64x32xf32> to vector<128x32xf32>
    %227 = arith.truncf %226 : vector<128x32xf32> to vector<128x32xbf16>
    %c31_198 = arith.constant 31 : index
    %c0_199 = arith.constant 0 : index
    %c0_200 = arith.constant 0 : index
    %228 = vector.load %arg3[%c31_198, %c0_199, %c0_200] : memref<67x32x32xbf16, #tpu.memory_space<vmem>>, vector<1x32x32xbf16>
    %229 = vector.shape_cast %228 : vector<1x32x32xbf16> to vector<32x32xbf16>
    %cst_201 = arith.constant dense<0.000000e+00> : vector<128x32xf32>
    %230 = tpu.matmul %227, %229, %cst_201 {dimension_numbers = #tpu.dot_dimension_numbers<[1], [0], [0], [1], [0, 0, 1, 1], [], []>} : vector<128x32xbf16>, vector<32x32xbf16>, vector<128x32xf32> -> vector<128x32xf32>
    %231 = arith.addf %224, %230 : vector<128x32xf32>
    %c0_202 = arith.constant 0 : index
    %c32 = arith.constant 32 : index
    %c0_203 = arith.constant 0 : index
    %232 = vector.load %arg6[%c0_202, %c32, %c0_203] : memref<2x104x32xf32, #tpu.memory_space<vmem>>, vector<2x64x32xf32>
    %233 = vector.shape_cast %232 : vector<2x64x32xf32> to vector<128x32xf32>
    %234 = arith.truncf %233 : vector<128x32xf32> to vector<128x32xbf16>
    %c32_204 = arith.constant 32 : index
    %c0_205 = arith.constant 0 : index
    %c0_206 = arith.constant 0 : index
    %235 = vector.load %arg3[%c32_204, %c0_205, %c0_206] : memref<67x32x32xbf16, #tpu.memory_space<vmem>>, vector<1x32x32xbf16>
    %236 = vector.shape_cast %235 : vector<1x32x32xbf16> to vector<32x32xbf16>
    %cst_207 = arith.constant dense<0.000000e+00> : vector<128x32xf32>
    %237 = tpu.matmul %234, %236, %cst_207 {dimension_numbers = #tpu.dot_dimension_numbers<[1], [0], [0], [1], [0, 0, 1, 1], [], []>} : vector<128x32xbf16>, vector<32x32xbf16>, vector<128x32xf32> -> vector<128x32xf32>
    %238 = arith.addf %231, %237 : vector<128x32xf32>
    %c0_208 = arith.constant 0 : index
    %c33 = arith.constant 33 : index
    %c0_209 = arith.constant 0 : index
    %239 = vector.load %arg6[%c0_208, %c33, %c0_209] : memref<2x104x32xf32, #tpu.memory_space<vmem>>, vector<2x64x32xf32>
    %240 = vector.shape_cast %239 : vector<2x64x32xf32> to vector<128x32xf32>
    %241 = arith.truncf %240 : vector<128x32xf32> to vector<128x32xbf16>
    %c33_210 = arith.constant 33 : index
    %c0_211 = arith.constant 0 : index
    %c0_212 = arith.constant 0 : index
    %242 = vector.load %arg3[%c33_210, %c0_211, %c0_212] : memref<67x32x32xbf16, #tpu.memory_space<vmem>>, vector<1x32x32xbf16>
    %243 = vector.shape_cast %242 : vector<1x32x32xbf16> to vector<32x32xbf16>
    %cst_213 = arith.constant dense<0.000000e+00> : vector<128x32xf32>
    %244 = tpu.matmul %241, %243, %cst_213 {dimension_numbers = #tpu.dot_dimension_numbers<[1], [0], [0], [1], [0, 0, 1, 1], [], []>} : vector<128x32xbf16>, vector<32x32xbf16>, vector<128x32xf32> -> vector<128x32xf32>
    %245 = arith.addf %238, %244 : vector<128x32xf32>
    %c0_214 = arith.constant 0 : index
    %c34 = arith.constant 34 : index
    %c0_215 = arith.constant 0 : index
    %246 = vector.load %arg6[%c0_214, %c34, %c0_215] : memref<2x104x32xf32, #tpu.memory_space<vmem>>, vector<2x64x32xf32>
    %247 = vector.shape_cast %246 : vector<2x64x32xf32> to vector<128x32xf32>
    %248 = arith.truncf %247 : vector<128x32xf32> to vector<128x32xbf16>
    %c34_216 = arith.constant 34 : index
    %c0_217 = arith.constant 0 : index
    %c0_218 = arith.constant 0 : index
    %249 = vector.load %arg3[%c34_216, %c0_217, %c0_218] : memref<67x32x32xbf16, #tpu.memory_space<vmem>>, vector<1x32x32xbf16>
    %250 = vector.shape_cast %249 : vector<1x32x32xbf16> to vector<32x32xbf16>
    %cst_219 = arith.constant dense<0.000000e+00> : vector<128x32xf32>
    %251 = tpu.matmul %248, %250, %cst_219 {dimension_numbers = #tpu.dot_dimension_numbers<[1], [0], [0], [1], [0, 0, 1, 1], [], []>} : vector<128x32xbf16>, vector<32x32xbf16>, vector<128x32xf32> -> vector<128x32xf32>
    %252 = arith.addf %245, %251 : vector<128x32xf32>
    %c0_220 = arith.constant 0 : index
    %c35 = arith.constant 35 : index
    %c0_221 = arith.constant 0 : index
    %253 = vector.load %arg6[%c0_220, %c35, %c0_221] : memref<2x104x32xf32, #tpu.memory_space<vmem>>, vector<2x64x32xf32>
    %254 = vector.shape_cast %253 : vector<2x64x32xf32> to vector<128x32xf32>
    %255 = arith.truncf %254 : vector<128x32xf32> to vector<128x32xbf16>
    %c35_222 = arith.constant 35 : index
    %c0_223 = arith.constant 0 : index
    %c0_224 = arith.constant 0 : index
    %256 = vector.load %arg3[%c35_222, %c0_223, %c0_224] : memref<67x32x32xbf16, #tpu.memory_space<vmem>>, vector<1x32x32xbf16>
    %257 = vector.shape_cast %256 : vector<1x32x32xbf16> to vector<32x32xbf16>
    %cst_225 = arith.constant dense<0.000000e+00> : vector<128x32xf32>
    %258 = tpu.matmul %255, %257, %cst_225 {dimension_numbers = #tpu.dot_dimension_numbers<[1], [0], [0], [1], [0, 0, 1, 1], [], []>} : vector<128x32xbf16>, vector<32x32xbf16>, vector<128x32xf32> -> vector<128x32xf32>
    %259 = arith.addf %252, %258 : vector<128x32xf32>
    %c0_226 = arith.constant 0 : index
    %c36 = arith.constant 36 : index
    %c0_227 = arith.constant 0 : index
    %260 = vector.load %arg6[%c0_226, %c36, %c0_227] : memref<2x104x32xf32, #tpu.memory_space<vmem>>, vector<2x64x32xf32>
    %261 = vector.shape_cast %260 : vector<2x64x32xf32> to vector<128x32xf32>
    %262 = arith.truncf %261 : vector<128x32xf32> to vector<128x32xbf16>
    %c36_228 = arith.constant 36 : index
    %c0_229 = arith.constant 0 : index
    %c0_230 = arith.constant 0 : index
    %263 = vector.load %arg3[%c36_228, %c0_229, %c0_230] : memref<67x32x32xbf16, #tpu.memory_space<vmem>>, vector<1x32x32xbf16>
    %264 = vector.shape_cast %263 : vector<1x32x32xbf16> to vector<32x32xbf16>
    %cst_231 = arith.constant dense<0.000000e+00> : vector<128x32xf32>
    %265 = tpu.matmul %262, %264, %cst_231 {dimension_numbers = #tpu.dot_dimension_numbers<[1], [0], [0], [1], [0, 0, 1, 1], [], []>} : vector<128x32xbf16>, vector<32x32xbf16>, vector<128x32xf32> -> vector<128x32xf32>
    %266 = arith.addf %259, %265 : vector<128x32xf32>
    %c0_232 = arith.constant 0 : index
    %c37 = arith.constant 37 : index
    %c0_233 = arith.constant 0 : index
    %267 = vector.load %arg6[%c0_232, %c37, %c0_233] : memref<2x104x32xf32, #tpu.memory_space<vmem>>, vector<2x64x32xf32>
    %268 = vector.shape_cast %267 : vector<2x64x32xf32> to vector<128x32xf32>
    %269 = arith.truncf %268 : vector<128x32xf32> to vector<128x32xbf16>
    %c37_234 = arith.constant 37 : index
    %c0_235 = arith.constant 0 : index
    %c0_236 = arith.constant 0 : index
    %270 = vector.load %arg3[%c37_234, %c0_235, %c0_236] : memref<67x32x32xbf16, #tpu.memory_space<vmem>>, vector<1x32x32xbf16>
    %271 = vector.shape_cast %270 : vector<1x32x32xbf16> to vector<32x32xbf16>
    %cst_237 = arith.constant dense<0.000000e+00> : vector<128x32xf32>
    %272 = tpu.matmul %269, %271, %cst_237 {dimension_numbers = #tpu.dot_dimension_numbers<[1], [0], [0], [1], [0, 0, 1, 1], [], []>} : vector<128x32xbf16>, vector<32x32xbf16>, vector<128x32xf32> -> vector<128x32xf32>
    %273 = arith.addf %266, %272 : vector<128x32xf32>
    %c0_238 = arith.constant 0 : index
    %c38 = arith.constant 38 : index
    %c0_239 = arith.constant 0 : index
    %274 = vector.load %arg6[%c0_238, %c38, %c0_239] : memref<2x104x32xf32, #tpu.memory_space<vmem>>, vector<2x64x32xf32>
    %275 = vector.shape_cast %274 : vector<2x64x32xf32> to vector<128x32xf32>
    %276 = arith.truncf %275 : vector<128x32xf32> to vector<128x32xbf16>
    %c38_240 = arith.constant 38 : index
    %c0_241 = arith.constant 0 : index
    %c0_242 = arith.constant 0 : index
    %277 = vector.load %arg3[%c38_240, %c0_241, %c0_242] : memref<67x32x32xbf16, #tpu.memory_space<vmem>>, vector<1x32x32xbf16>
    %278 = vector.shape_cast %277 : vector<1x32x32xbf16> to vector<32x32xbf16>
    %cst_243 = arith.constant dense<0.000000e+00> : vector<128x32xf32>
    %279 = tpu.matmul %276, %278, %cst_243 {dimension_numbers = #tpu.dot_dimension_numbers<[1], [0], [0], [1], [0, 0, 1, 1], [], []>} : vector<128x32xbf16>, vector<32x32xbf16>, vector<128x32xf32> -> vector<128x32xf32>
    %280 = arith.addf %273, %279 : vector<128x32xf32>
    %cst_244 = arith.constant 0.000000e+00 : f32
    %281 = vector.broadcast %cst_244 : f32 to vector<128x32xf32>
    %c0_245 = arith.constant 0 : index
    %c10_246 = arith.constant 10 : index
    %c0_247 = arith.constant 0 : index
    %282 = vector.load %arg6[%c0_245, %c10_246, %c0_247] : memref<2x104x32xf32, #tpu.memory_space<vmem>>, vector<2x64x32xf32>
    %283 = vector.shape_cast %282 : vector<2x64x32xf32> to vector<128x32xf32>
    %284 = arith.truncf %283 : vector<128x32xf32> to vector<128x32xbf16>
    %c39 = arith.constant 39 : index
    %c0_248 = arith.constant 0 : index
    %c0_249 = arith.constant 0 : index
    %285 = vector.load %arg3[%c39, %c0_248, %c0_249] : memref<67x32x32xbf16, #tpu.memory_space<vmem>>, vector<1x32x32xbf16>
    %286 = vector.shape_cast %285 : vector<1x32x32xbf16> to vector<32x32xbf16>
    %cst_250 = arith.constant dense<0.000000e+00> : vector<128x32xf32>
    %287 = tpu.matmul %284, %286, %cst_250 {dimension_numbers = #tpu.dot_dimension_numbers<[1], [0], [0], [1], [0, 0, 1, 1], [], []>} : vector<128x32xbf16>, vector<32x32xbf16>, vector<128x32xf32> -> vector<128x32xf32>
    %288 = arith.addf %281, %287 : vector<128x32xf32>
    %c0_251 = arith.constant 0 : index
    %c11_252 = arith.constant 11 : index
    %c0_253 = arith.constant 0 : index
    %289 = vector.load %arg6[%c0_251, %c11_252, %c0_253] : memref<2x104x32xf32, #tpu.memory_space<vmem>>, vector<2x64x32xf32>
    %290 = vector.shape_cast %289 : vector<2x64x32xf32> to vector<128x32xf32>
    %291 = arith.truncf %290 : vector<128x32xf32> to vector<128x32xbf16>
    %c40 = arith.constant 40 : index
    %c0_254 = arith.constant 0 : index
    %c0_255 = arith.constant 0 : index
    %292 = vector.load %arg3[%c40, %c0_254, %c0_255] : memref<67x32x32xbf16, #tpu.memory_space<vmem>>, vector<1x32x32xbf16>
    %293 = vector.shape_cast %292 : vector<1x32x32xbf16> to vector<32x32xbf16>
    %cst_256 = arith.constant dense<0.000000e+00> : vector<128x32xf32>
    %294 = tpu.matmul %291, %293, %cst_256 {dimension_numbers = #tpu.dot_dimension_numbers<[1], [0], [0], [1], [0, 0, 1, 1], [], []>} : vector<128x32xbf16>, vector<32x32xbf16>, vector<128x32xf32> -> vector<128x32xf32>
    %295 = arith.addf %288, %294 : vector<128x32xf32>
    %c0_257 = arith.constant 0 : index
    %c12_258 = arith.constant 12 : index
    %c0_259 = arith.constant 0 : index
    %296 = vector.load %arg6[%c0_257, %c12_258, %c0_259] : memref<2x104x32xf32, #tpu.memory_space<vmem>>, vector<2x64x32xf32>
    %297 = vector.shape_cast %296 : vector<2x64x32xf32> to vector<128x32xf32>
    %298 = arith.truncf %297 : vector<128x32xf32> to vector<128x32xbf16>
    %c41 = arith.constant 41 : index
    %c0_260 = arith.constant 0 : index
    %c0_261 = arith.constant 0 : index
    %299 = vector.load %arg3[%c41, %c0_260, %c0_261] : memref<67x32x32xbf16, #tpu.memory_space<vmem>>, vector<1x32x32xbf16>
    %300 = vector.shape_cast %299 : vector<1x32x32xbf16> to vector<32x32xbf16>
    %cst_262 = arith.constant dense<0.000000e+00> : vector<128x32xf32>
    %301 = tpu.matmul %298, %300, %cst_262 {dimension_numbers = #tpu.dot_dimension_numbers<[1], [0], [0], [1], [0, 0, 1, 1], [], []>} : vector<128x32xbf16>, vector<32x32xbf16>, vector<128x32xf32> -> vector<128x32xf32>
    %302 = arith.addf %295, %301 : vector<128x32xf32>
    %c0_263 = arith.constant 0 : index
    %c13_264 = arith.constant 13 : index
    %c0_265 = arith.constant 0 : index
    %303 = vector.load %arg6[%c0_263, %c13_264, %c0_265] : memref<2x104x32xf32, #tpu.memory_space<vmem>>, vector<2x64x32xf32>
    %304 = vector.shape_cast %303 : vector<2x64x32xf32> to vector<128x32xf32>
    %305 = arith.truncf %304 : vector<128x32xf32> to vector<128x32xbf16>
    %c42 = arith.constant 42 : index
    %c0_266 = arith.constant 0 : index
    %c0_267 = arith.constant 0 : index
    %306 = vector.load %arg3[%c42, %c0_266, %c0_267] : memref<67x32x32xbf16, #tpu.memory_space<vmem>>, vector<1x32x32xbf16>
    %307 = vector.shape_cast %306 : vector<1x32x32xbf16> to vector<32x32xbf16>
    %cst_268 = arith.constant dense<0.000000e+00> : vector<128x32xf32>
    %308 = tpu.matmul %305, %307, %cst_268 {dimension_numbers = #tpu.dot_dimension_numbers<[1], [0], [0], [1], [0, 0, 1, 1], [], []>} : vector<128x32xbf16>, vector<32x32xbf16>, vector<128x32xf32> -> vector<128x32xf32>
    %309 = arith.addf %302, %308 : vector<128x32xf32>
    %c0_269 = arith.constant 0 : index
    %c14_270 = arith.constant 14 : index
    %c0_271 = arith.constant 0 : index
    %310 = vector.load %arg6[%c0_269, %c14_270, %c0_271] : memref<2x104x32xf32, #tpu.memory_space<vmem>>, vector<2x64x32xf32>
    %311 = vector.shape_cast %310 : vector<2x64x32xf32> to vector<128x32xf32>
    %312 = arith.truncf %311 : vector<128x32xf32> to vector<128x32xbf16>
    %c43 = arith.constant 43 : index
    %c0_272 = arith.constant 0 : index
    %c0_273 = arith.constant 0 : index
    %313 = vector.load %arg3[%c43, %c0_272, %c0_273] : memref<67x32x32xbf16, #tpu.memory_space<vmem>>, vector<1x32x32xbf16>
    %314 = vector.shape_cast %313 : vector<1x32x32xbf16> to vector<32x32xbf16>
    %cst_274 = arith.constant dense<0.000000e+00> : vector<128x32xf32>
    %315 = tpu.matmul %312, %314, %cst_274 {dimension_numbers = #tpu.dot_dimension_numbers<[1], [0], [0], [1], [0, 0, 1, 1], [], []>} : vector<128x32xbf16>, vector<32x32xbf16>, vector<128x32xf32> -> vector<128x32xf32>
    %316 = arith.addf %309, %315 : vector<128x32xf32>
    %c0_275 = arith.constant 0 : index
    %c15_276 = arith.constant 15 : index
    %c0_277 = arith.constant 0 : index
    %317 = vector.load %arg6[%c0_275, %c15_276, %c0_277] : memref<2x104x32xf32, #tpu.memory_space<vmem>>, vector<2x64x32xf32>
    %318 = vector.shape_cast %317 : vector<2x64x32xf32> to vector<128x32xf32>
    %319 = arith.truncf %318 : vector<128x32xf32> to vector<128x32xbf16>
    %c44 = arith.constant 44 : index
    %c0_278 = arith.constant 0 : index
    %c0_279 = arith.constant 0 : index
    %320 = vector.load %arg3[%c44, %c0_278, %c0_279] : memref<67x32x32xbf16, #tpu.memory_space<vmem>>, vector<1x32x32xbf16>
    %321 = vector.shape_cast %320 : vector<1x32x32xbf16> to vector<32x32xbf16>
    %cst_280 = arith.constant dense<0.000000e+00> : vector<128x32xf32>
    %322 = tpu.matmul %319, %321, %cst_280 {dimension_numbers = #tpu.dot_dimension_numbers<[1], [0], [0], [1], [0, 0, 1, 1], [], []>} : vector<128x32xbf16>, vector<32x32xbf16>, vector<128x32xf32> -> vector<128x32xf32>
    %323 = arith.addf %316, %322 : vector<128x32xf32>
    %c0_281 = arith.constant 0 : index
    %c16_282 = arith.constant 16 : index
    %c0_283 = arith.constant 0 : index
    %324 = vector.load %arg6[%c0_281, %c16_282, %c0_283] : memref<2x104x32xf32, #tpu.memory_space<vmem>>, vector<2x64x32xf32>
    %325 = vector.shape_cast %324 : vector<2x64x32xf32> to vector<128x32xf32>
    %326 = arith.truncf %325 : vector<128x32xf32> to vector<128x32xbf16>
    %c45 = arith.constant 45 : index
    %c0_284 = arith.constant 0 : index
    %c0_285 = arith.constant 0 : index
    %327 = vector.load %arg3[%c45, %c0_284, %c0_285] : memref<67x32x32xbf16, #tpu.memory_space<vmem>>, vector<1x32x32xbf16>
    %328 = vector.shape_cast %327 : vector<1x32x32xbf16> to vector<32x32xbf16>
    %cst_286 = arith.constant dense<0.000000e+00> : vector<128x32xf32>
    %329 = tpu.matmul %326, %328, %cst_286 {dimension_numbers = #tpu.dot_dimension_numbers<[1], [0], [0], [1], [0, 0, 1, 1], [], []>} : vector<128x32xbf16>, vector<32x32xbf16>, vector<128x32xf32> -> vector<128x32xf32>
    %330 = arith.addf %323, %329 : vector<128x32xf32>
    %c0_287 = arith.constant 0 : index
    %c17_288 = arith.constant 17 : index
    %c0_289 = arith.constant 0 : index
    %331 = vector.load %arg6[%c0_287, %c17_288, %c0_289] : memref<2x104x32xf32, #tpu.memory_space<vmem>>, vector<2x64x32xf32>
    %332 = vector.shape_cast %331 : vector<2x64x32xf32> to vector<128x32xf32>
    %333 = arith.truncf %332 : vector<128x32xf32> to vector<128x32xbf16>
    %c46 = arith.constant 46 : index
    %c0_290 = arith.constant 0 : index
    %c0_291 = arith.constant 0 : index
    %334 = vector.load %arg3[%c46, %c0_290, %c0_291] : memref<67x32x32xbf16, #tpu.memory_space<vmem>>, vector<1x32x32xbf16>
    %335 = vector.shape_cast %334 : vector<1x32x32xbf16> to vector<32x32xbf16>
    %cst_292 = arith.constant dense<0.000000e+00> : vector<128x32xf32>
    %336 = tpu.matmul %333, %335, %cst_292 {dimension_numbers = #tpu.dot_dimension_numbers<[1], [0], [0], [1], [0, 0, 1, 1], [], []>} : vector<128x32xbf16>, vector<32x32xbf16>, vector<128x32xf32> -> vector<128x32xf32>
    %337 = arith.addf %330, %336 : vector<128x32xf32>
    %c0_293 = arith.constant 0 : index
    %c18_294 = arith.constant 18 : index
    %c0_295 = arith.constant 0 : index
    %338 = vector.load %arg6[%c0_293, %c18_294, %c0_295] : memref<2x104x32xf32, #tpu.memory_space<vmem>>, vector<2x64x32xf32>
    %339 = vector.shape_cast %338 : vector<2x64x32xf32> to vector<128x32xf32>
    %340 = arith.truncf %339 : vector<128x32xf32> to vector<128x32xbf16>
    %c47 = arith.constant 47 : index
    %c0_296 = arith.constant 0 : index
    %c0_297 = arith.constant 0 : index
    %341 = vector.load %arg3[%c47, %c0_296, %c0_297] : memref<67x32x32xbf16, #tpu.memory_space<vmem>>, vector<1x32x32xbf16>
    %342 = vector.shape_cast %341 : vector<1x32x32xbf16> to vector<32x32xbf16>
    %cst_298 = arith.constant dense<0.000000e+00> : vector<128x32xf32>
    %343 = tpu.matmul %340, %342, %cst_298 {dimension_numbers = #tpu.dot_dimension_numbers<[1], [0], [0], [1], [0, 0, 1, 1], [], []>} : vector<128x32xbf16>, vector<32x32xbf16>, vector<128x32xf32> -> vector<128x32xf32>
    %344 = arith.addf %337, %343 : vector<128x32xf32>
    %c0_299 = arith.constant 0 : index
    %c19_300 = arith.constant 19 : index
    %c0_301 = arith.constant 0 : index
    %345 = vector.load %arg6[%c0_299, %c19_300, %c0_301] : memref<2x104x32xf32, #tpu.memory_space<vmem>>, vector<2x64x32xf32>
    %346 = vector.shape_cast %345 : vector<2x64x32xf32> to vector<128x32xf32>
    %347 = arith.truncf %346 : vector<128x32xf32> to vector<128x32xbf16>
    %c48 = arith.constant 48 : index
    %c0_302 = arith.constant 0 : index
    %c0_303 = arith.constant 0 : index
    %348 = vector.load %arg3[%c48, %c0_302, %c0_303] : memref<67x32x32xbf16, #tpu.memory_space<vmem>>, vector<1x32x32xbf16>
    %349 = vector.shape_cast %348 : vector<1x32x32xbf16> to vector<32x32xbf16>
    %cst_304 = arith.constant dense<0.000000e+00> : vector<128x32xf32>
    %350 = tpu.matmul %347, %349, %cst_304 {dimension_numbers = #tpu.dot_dimension_numbers<[1], [0], [0], [1], [0, 0, 1, 1], [], []>} : vector<128x32xbf16>, vector<32x32xbf16>, vector<128x32xf32> -> vector<128x32xf32>
    %351 = arith.addf %344, %350 : vector<128x32xf32>
    %c0_305 = arith.constant 0 : index
    %c20_306 = arith.constant 20 : index
    %c0_307 = arith.constant 0 : index
    %352 = vector.load %arg6[%c0_305, %c20_306, %c0_307] : memref<2x104x32xf32, #tpu.memory_space<vmem>>, vector<2x64x32xf32>
    %353 = vector.shape_cast %352 : vector<2x64x32xf32> to vector<128x32xf32>
    %354 = arith.truncf %353 : vector<128x32xf32> to vector<128x32xbf16>
    %c49 = arith.constant 49 : index
    %c0_308 = arith.constant 0 : index
    %c0_309 = arith.constant 0 : index
    %355 = vector.load %arg3[%c49, %c0_308, %c0_309] : memref<67x32x32xbf16, #tpu.memory_space<vmem>>, vector<1x32x32xbf16>
    %356 = vector.shape_cast %355 : vector<1x32x32xbf16> to vector<32x32xbf16>
    %cst_310 = arith.constant dense<0.000000e+00> : vector<128x32xf32>
    %357 = tpu.matmul %354, %356, %cst_310 {dimension_numbers = #tpu.dot_dimension_numbers<[1], [0], [0], [1], [0, 0, 1, 1], [], []>} : vector<128x32xbf16>, vector<32x32xbf16>, vector<128x32xf32> -> vector<128x32xf32>
    %358 = arith.addf %351, %357 : vector<128x32xf32>
    %c0_311 = arith.constant 0 : index
    %c21_312 = arith.constant 21 : index
    %c0_313 = arith.constant 0 : index
    %359 = vector.load %arg6[%c0_311, %c21_312, %c0_313] : memref<2x104x32xf32, #tpu.memory_space<vmem>>, vector<2x64x32xf32>
    %360 = vector.shape_cast %359 : vector<2x64x32xf32> to vector<128x32xf32>
    %361 = arith.truncf %360 : vector<128x32xf32> to vector<128x32xbf16>
    %c50 = arith.constant 50 : index
    %c0_314 = arith.constant 0 : index
    %c0_315 = arith.constant 0 : index
    %362 = vector.load %arg3[%c50, %c0_314, %c0_315] : memref<67x32x32xbf16, #tpu.memory_space<vmem>>, vector<1x32x32xbf16>
    %363 = vector.shape_cast %362 : vector<1x32x32xbf16> to vector<32x32xbf16>
    %cst_316 = arith.constant dense<0.000000e+00> : vector<128x32xf32>
    %364 = tpu.matmul %361, %363, %cst_316 {dimension_numbers = #tpu.dot_dimension_numbers<[1], [0], [0], [1], [0, 0, 1, 1], [], []>} : vector<128x32xbf16>, vector<32x32xbf16>, vector<128x32xf32> -> vector<128x32xf32>
    %365 = arith.addf %358, %364 : vector<128x32xf32>
    %c0_317 = arith.constant 0 : index
    %c22_318 = arith.constant 22 : index
    %c0_319 = arith.constant 0 : index
    %366 = vector.load %arg6[%c0_317, %c22_318, %c0_319] : memref<2x104x32xf32, #tpu.memory_space<vmem>>, vector<2x64x32xf32>
    %367 = vector.shape_cast %366 : vector<2x64x32xf32> to vector<128x32xf32>
    %368 = arith.truncf %367 : vector<128x32xf32> to vector<128x32xbf16>
    %c51 = arith.constant 51 : index
    %c0_320 = arith.constant 0 : index
    %c0_321 = arith.constant 0 : index
    %369 = vector.load %arg3[%c51, %c0_320, %c0_321] : memref<67x32x32xbf16, #tpu.memory_space<vmem>>, vector<1x32x32xbf16>
    %370 = vector.shape_cast %369 : vector<1x32x32xbf16> to vector<32x32xbf16>
    %cst_322 = arith.constant dense<0.000000e+00> : vector<128x32xf32>
    %371 = tpu.matmul %368, %370, %cst_322 {dimension_numbers = #tpu.dot_dimension_numbers<[1], [0], [0], [1], [0, 0, 1, 1], [], []>} : vector<128x32xbf16>, vector<32x32xbf16>, vector<128x32xf32> -> vector<128x32xf32>
    %372 = arith.addf %365, %371 : vector<128x32xf32>
    %c0_323 = arith.constant 0 : index
    %c23_324 = arith.constant 23 : index
    %c0_325 = arith.constant 0 : index
    %373 = vector.load %arg6[%c0_323, %c23_324, %c0_325] : memref<2x104x32xf32, #tpu.memory_space<vmem>>, vector<2x64x32xf32>
    %374 = vector.shape_cast %373 : vector<2x64x32xf32> to vector<128x32xf32>
    %375 = arith.truncf %374 : vector<128x32xf32> to vector<128x32xbf16>
    %c52 = arith.constant 52 : index
    %c0_326 = arith.constant 0 : index
    %c0_327 = arith.constant 0 : index
    %376 = vector.load %arg3[%c52, %c0_326, %c0_327] : memref<67x32x32xbf16, #tpu.memory_space<vmem>>, vector<1x32x32xbf16>
    %377 = vector.shape_cast %376 : vector<1x32x32xbf16> to vector<32x32xbf16>
    %cst_328 = arith.constant dense<0.000000e+00> : vector<128x32xf32>
    %378 = tpu.matmul %375, %377, %cst_328 {dimension_numbers = #tpu.dot_dimension_numbers<[1], [0], [0], [1], [0, 0, 1, 1], [], []>} : vector<128x32xbf16>, vector<32x32xbf16>, vector<128x32xf32> -> vector<128x32xf32>
    %379 = arith.addf %372, %378 : vector<128x32xf32>
    %c0_329 = arith.constant 0 : index
    %c24_330 = arith.constant 24 : index
    %c0_331 = arith.constant 0 : index
    %380 = vector.load %arg6[%c0_329, %c24_330, %c0_331] : memref<2x104x32xf32, #tpu.memory_space<vmem>>, vector<2x64x32xf32>
    %381 = vector.shape_cast %380 : vector<2x64x32xf32> to vector<128x32xf32>
    %382 = arith.truncf %381 : vector<128x32xf32> to vector<128x32xbf16>
    %c53 = arith.constant 53 : index
    %c0_332 = arith.constant 0 : index
    %c0_333 = arith.constant 0 : index
    %383 = vector.load %arg3[%c53, %c0_332, %c0_333] : memref<67x32x32xbf16, #tpu.memory_space<vmem>>, vector<1x32x32xbf16>
    %384 = vector.shape_cast %383 : vector<1x32x32xbf16> to vector<32x32xbf16>
    %cst_334 = arith.constant dense<0.000000e+00> : vector<128x32xf32>
    %385 = tpu.matmul %382, %384, %cst_334 {dimension_numbers = #tpu.dot_dimension_numbers<[1], [0], [0], [1], [0, 0, 1, 1], [], []>} : vector<128x32xbf16>, vector<32x32xbf16>, vector<128x32xf32> -> vector<128x32xf32>
    %386 = arith.addf %379, %385 : vector<128x32xf32>
    %c0_335 = arith.constant 0 : index
    %c25_336 = arith.constant 25 : index
    %c0_337 = arith.constant 0 : index
    %387 = vector.load %arg6[%c0_335, %c25_336, %c0_337] : memref<2x104x32xf32, #tpu.memory_space<vmem>>, vector<2x64x32xf32>
    %388 = vector.shape_cast %387 : vector<2x64x32xf32> to vector<128x32xf32>
    %389 = arith.truncf %388 : vector<128x32xf32> to vector<128x32xbf16>
    %c54 = arith.constant 54 : index
    %c0_338 = arith.constant 0 : index
    %c0_339 = arith.constant 0 : index
    %390 = vector.load %arg3[%c54, %c0_338, %c0_339] : memref<67x32x32xbf16, #tpu.memory_space<vmem>>, vector<1x32x32xbf16>
    %391 = vector.shape_cast %390 : vector<1x32x32xbf16> to vector<32x32xbf16>
    %cst_340 = arith.constant dense<0.000000e+00> : vector<128x32xf32>
    %392 = tpu.matmul %389, %391, %cst_340 {dimension_numbers = #tpu.dot_dimension_numbers<[1], [0], [0], [1], [0, 0, 1, 1], [], []>} : vector<128x32xbf16>, vector<32x32xbf16>, vector<128x32xf32> -> vector<128x32xf32>
    %393 = arith.addf %386, %392 : vector<128x32xf32>
    %c0_341 = arith.constant 0 : index
    %c26_342 = arith.constant 26 : index
    %c0_343 = arith.constant 0 : index
    %394 = vector.load %arg6[%c0_341, %c26_342, %c0_343] : memref<2x104x32xf32, #tpu.memory_space<vmem>>, vector<2x64x32xf32>
    %395 = vector.shape_cast %394 : vector<2x64x32xf32> to vector<128x32xf32>
    %396 = arith.truncf %395 : vector<128x32xf32> to vector<128x32xbf16>
    %c55 = arith.constant 55 : index
    %c0_344 = arith.constant 0 : index
    %c0_345 = arith.constant 0 : index
    %397 = vector.load %arg3[%c55, %c0_344, %c0_345] : memref<67x32x32xbf16, #tpu.memory_space<vmem>>, vector<1x32x32xbf16>
    %398 = vector.shape_cast %397 : vector<1x32x32xbf16> to vector<32x32xbf16>
    %cst_346 = arith.constant dense<0.000000e+00> : vector<128x32xf32>
    %399 = tpu.matmul %396, %398, %cst_346 {dimension_numbers = #tpu.dot_dimension_numbers<[1], [0], [0], [1], [0, 0, 1, 1], [], []>} : vector<128x32xbf16>, vector<32x32xbf16>, vector<128x32xf32> -> vector<128x32xf32>
    %400 = arith.addf %393, %399 : vector<128x32xf32>
    %c0_347 = arith.constant 0 : index
    %c27_348 = arith.constant 27 : index
    %c0_349 = arith.constant 0 : index
    %401 = vector.load %arg6[%c0_347, %c27_348, %c0_349] : memref<2x104x32xf32, #tpu.memory_space<vmem>>, vector<2x64x32xf32>
    %402 = vector.shape_cast %401 : vector<2x64x32xf32> to vector<128x32xf32>
    %403 = arith.truncf %402 : vector<128x32xf32> to vector<128x32xbf16>
    %c56 = arith.constant 56 : index
    %c0_350 = arith.constant 0 : index
    %c0_351 = arith.constant 0 : index
    %404 = vector.load %arg3[%c56, %c0_350, %c0_351] : memref<67x32x32xbf16, #tpu.memory_space<vmem>>, vector<1x32x32xbf16>
    %405 = vector.shape_cast %404 : vector<1x32x32xbf16> to vector<32x32xbf16>
    %cst_352 = arith.constant dense<0.000000e+00> : vector<128x32xf32>
    %406 = tpu.matmul %403, %405, %cst_352 {dimension_numbers = #tpu.dot_dimension_numbers<[1], [0], [0], [1], [0, 0, 1, 1], [], []>} : vector<128x32xbf16>, vector<32x32xbf16>, vector<128x32xf32> -> vector<128x32xf32>
    %407 = arith.addf %400, %406 : vector<128x32xf32>
    %c0_353 = arith.constant 0 : index
    %c28_354 = arith.constant 28 : index
    %c0_355 = arith.constant 0 : index
    %408 = vector.load %arg6[%c0_353, %c28_354, %c0_355] : memref<2x104x32xf32, #tpu.memory_space<vmem>>, vector<2x64x32xf32>
    %409 = vector.shape_cast %408 : vector<2x64x32xf32> to vector<128x32xf32>
    %410 = arith.truncf %409 : vector<128x32xf32> to vector<128x32xbf16>
    %c57 = arith.constant 57 : index
    %c0_356 = arith.constant 0 : index
    %c0_357 = arith.constant 0 : index
    %411 = vector.load %arg3[%c57, %c0_356, %c0_357] : memref<67x32x32xbf16, #tpu.memory_space<vmem>>, vector<1x32x32xbf16>
    %412 = vector.shape_cast %411 : vector<1x32x32xbf16> to vector<32x32xbf16>
    %cst_358 = arith.constant dense<0.000000e+00> : vector<128x32xf32>
    %413 = tpu.matmul %410, %412, %cst_358 {dimension_numbers = #tpu.dot_dimension_numbers<[1], [0], [0], [1], [0, 0, 1, 1], [], []>} : vector<128x32xbf16>, vector<32x32xbf16>, vector<128x32xf32> -> vector<128x32xf32>
    %414 = arith.addf %407, %413 : vector<128x32xf32>
    %cst_359 = arith.constant 0.000000e+00 : f32
    %415 = vector.broadcast %cst_359 : f32 to vector<128x32xf32>
    %c0_360 = arith.constant 0 : index
    %c15_361 = arith.constant 15 : index
    %c0_362 = arith.constant 0 : index
    %416 = vector.load %arg6[%c0_360, %c15_361, %c0_362] : memref<2x104x32xf32, #tpu.memory_space<vmem>>, vector<2x64x32xf32>
    %417 = vector.shape_cast %416 : vector<2x64x32xf32> to vector<128x32xf32>
    %418 = arith.truncf %417 : vector<128x32xf32> to vector<128x32xbf16>
    %c58 = arith.constant 58 : index
    %c0_363 = arith.constant 0 : index
    %c0_364 = arith.constant 0 : index
    %419 = vector.load %arg3[%c58, %c0_363, %c0_364] : memref<67x32x32xbf16, #tpu.memory_space<vmem>>, vector<1x32x32xbf16>
    %420 = vector.shape_cast %419 : vector<1x32x32xbf16> to vector<32x32xbf16>
    %cst_365 = arith.constant dense<0.000000e+00> : vector<128x32xf32>
    %421 = tpu.matmul %418, %420, %cst_365 {dimension_numbers = #tpu.dot_dimension_numbers<[1], [0], [0], [1], [0, 0, 1, 1], [], []>} : vector<128x32xbf16>, vector<32x32xbf16>, vector<128x32xf32> -> vector<128x32xf32>
    %422 = arith.addf %415, %421 : vector<128x32xf32>
    %c0_366 = arith.constant 0 : index
    %c16_367 = arith.constant 16 : index
    %c0_368 = arith.constant 0 : index
    %423 = vector.load %arg6[%c0_366, %c16_367, %c0_368] : memref<2x104x32xf32, #tpu.memory_space<vmem>>, vector<2x64x32xf32>
    %424 = vector.shape_cast %423 : vector<2x64x32xf32> to vector<128x32xf32>
    %425 = arith.truncf %424 : vector<128x32xf32> to vector<128x32xbf16>
    %c59 = arith.constant 59 : index
    %c0_369 = arith.constant 0 : index
    %c0_370 = arith.constant 0 : index
    %426 = vector.load %arg3[%c59, %c0_369, %c0_370] : memref<67x32x32xbf16, #tpu.memory_space<vmem>>, vector<1x32x32xbf16>
    %427 = vector.shape_cast %426 : vector<1x32x32xbf16> to vector<32x32xbf16>
    %cst_371 = arith.constant dense<0.000000e+00> : vector<128x32xf32>
    %428 = tpu.matmul %425, %427, %cst_371 {dimension_numbers = #tpu.dot_dimension_numbers<[1], [0], [0], [1], [0, 0, 1, 1], [], []>} : vector<128x32xbf16>, vector<32x32xbf16>, vector<128x32xf32> -> vector<128x32xf32>
    %429 = arith.addf %422, %428 : vector<128x32xf32>
    %c0_372 = arith.constant 0 : index
    %c17_373 = arith.constant 17 : index
    %c0_374 = arith.constant 0 : index
    %430 = vector.load %arg6[%c0_372, %c17_373, %c0_374] : memref<2x104x32xf32, #tpu.memory_space<vmem>>, vector<2x64x32xf32>
    %431 = vector.shape_cast %430 : vector<2x64x32xf32> to vector<128x32xf32>
    %432 = arith.truncf %431 : vector<128x32xf32> to vector<128x32xbf16>
    %c60 = arith.constant 60 : index
    %c0_375 = arith.constant 0 : index
    %c0_376 = arith.constant 0 : index
    %433 = vector.load %arg3[%c60, %c0_375, %c0_376] : memref<67x32x32xbf16, #tpu.memory_space<vmem>>, vector<1x32x32xbf16>
    %434 = vector.shape_cast %433 : vector<1x32x32xbf16> to vector<32x32xbf16>
    %cst_377 = arith.constant dense<0.000000e+00> : vector<128x32xf32>
    %435 = tpu.matmul %432, %434, %cst_377 {dimension_numbers = #tpu.dot_dimension_numbers<[1], [0], [0], [1], [0, 0, 1, 1], [], []>} : vector<128x32xbf16>, vector<32x32xbf16>, vector<128x32xf32> -> vector<128x32xf32>
    %436 = arith.addf %429, %435 : vector<128x32xf32>
    %c0_378 = arith.constant 0 : index
    %c18_379 = arith.constant 18 : index
    %c0_380 = arith.constant 0 : index
    %437 = vector.load %arg6[%c0_378, %c18_379, %c0_380] : memref<2x104x32xf32, #tpu.memory_space<vmem>>, vector<2x64x32xf32>
    %438 = vector.shape_cast %437 : vector<2x64x32xf32> to vector<128x32xf32>
    %439 = arith.truncf %438 : vector<128x32xf32> to vector<128x32xbf16>
    %c61 = arith.constant 61 : index
    %c0_381 = arith.constant 0 : index
    %c0_382 = arith.constant 0 : index
    %440 = vector.load %arg3[%c61, %c0_381, %c0_382] : memref<67x32x32xbf16, #tpu.memory_space<vmem>>, vector<1x32x32xbf16>
    %441 = vector.shape_cast %440 : vector<1x32x32xbf16> to vector<32x32xbf16>
    %cst_383 = arith.constant dense<0.000000e+00> : vector<128x32xf32>
    %442 = tpu.matmul %439, %441, %cst_383 {dimension_numbers = #tpu.dot_dimension_numbers<[1], [0], [0], [1], [0, 0, 1, 1], [], []>} : vector<128x32xbf16>, vector<32x32xbf16>, vector<128x32xf32> -> vector<128x32xf32>
    %443 = arith.addf %436, %442 : vector<128x32xf32>
    %c0_384 = arith.constant 0 : index
    %c19_385 = arith.constant 19 : index
    %c0_386 = arith.constant 0 : index
    %444 = vector.load %arg6[%c0_384, %c19_385, %c0_386] : memref<2x104x32xf32, #tpu.memory_space<vmem>>, vector<2x64x32xf32>
    %445 = vector.shape_cast %444 : vector<2x64x32xf32> to vector<128x32xf32>
    %446 = arith.truncf %445 : vector<128x32xf32> to vector<128x32xbf16>
    %c62 = arith.constant 62 : index
    %c0_387 = arith.constant 0 : index
    %c0_388 = arith.constant 0 : index
    %447 = vector.load %arg3[%c62, %c0_387, %c0_388] : memref<67x32x32xbf16, #tpu.memory_space<vmem>>, vector<1x32x32xbf16>
    %448 = vector.shape_cast %447 : vector<1x32x32xbf16> to vector<32x32xbf16>
    %cst_389 = arith.constant dense<0.000000e+00> : vector<128x32xf32>
    %449 = tpu.matmul %446, %448, %cst_389 {dimension_numbers = #tpu.dot_dimension_numbers<[1], [0], [0], [1], [0, 0, 1, 1], [], []>} : vector<128x32xbf16>, vector<32x32xbf16>, vector<128x32xf32> -> vector<128x32xf32>
    %450 = arith.addf %443, %449 : vector<128x32xf32>
    %c0_390 = arith.constant 0 : index
    %c20_391 = arith.constant 20 : index
    %c0_392 = arith.constant 0 : index
    %451 = vector.load %arg6[%c0_390, %c20_391, %c0_392] : memref<2x104x32xf32, #tpu.memory_space<vmem>>, vector<2x64x32xf32>
    %452 = vector.shape_cast %451 : vector<2x64x32xf32> to vector<128x32xf32>
    %453 = arith.truncf %452 : vector<128x32xf32> to vector<128x32xbf16>
    %c63 = arith.constant 63 : index
    %c0_393 = arith.constant 0 : index
    %c0_394 = arith.constant 0 : index
    %454 = vector.load %arg3[%c63, %c0_393, %c0_394] : memref<67x32x32xbf16, #tpu.memory_space<vmem>>, vector<1x32x32xbf16>
    %455 = vector.shape_cast %454 : vector<1x32x32xbf16> to vector<32x32xbf16>
    %cst_395 = arith.constant dense<0.000000e+00> : vector<128x32xf32>
    %456 = tpu.matmul %453, %455, %cst_395 {dimension_numbers = #tpu.dot_dimension_numbers<[1], [0], [0], [1], [0, 0, 1, 1], [], []>} : vector<128x32xbf16>, vector<32x32xbf16>, vector<128x32xf32> -> vector<128x32xf32>
    %457 = arith.addf %450, %456 : vector<128x32xf32>
    %c0_396 = arith.constant 0 : index
    %c21_397 = arith.constant 21 : index
    %c0_398 = arith.constant 0 : index
    %458 = vector.load %arg6[%c0_396, %c21_397, %c0_398] : memref<2x104x32xf32, #tpu.memory_space<vmem>>, vector<2x64x32xf32>
    %459 = vector.shape_cast %458 : vector<2x64x32xf32> to vector<128x32xf32>
    %460 = arith.truncf %459 : vector<128x32xf32> to vector<128x32xbf16>
    %c64 = arith.constant 64 : index
    %c0_399 = arith.constant 0 : index
    %c0_400 = arith.constant 0 : index
    %461 = vector.load %arg3[%c64, %c0_399, %c0_400] : memref<67x32x32xbf16, #tpu.memory_space<vmem>>, vector<1x32x32xbf16>
    %462 = vector.shape_cast %461 : vector<1x32x32xbf16> to vector<32x32xbf16>
    %cst_401 = arith.constant dense<0.000000e+00> : vector<128x32xf32>
    %463 = tpu.matmul %460, %462, %cst_401 {dimension_numbers = #tpu.dot_dimension_numbers<[1], [0], [0], [1], [0, 0, 1, 1], [], []>} : vector<128x32xbf16>, vector<32x32xbf16>, vector<128x32xf32> -> vector<128x32xf32>
    %464 = arith.addf %457, %463 : vector<128x32xf32>
    %c0_402 = arith.constant 0 : index
    %c22_403 = arith.constant 22 : index
    %c0_404 = arith.constant 0 : index
    %465 = vector.load %arg6[%c0_402, %c22_403, %c0_404] : memref<2x104x32xf32, #tpu.memory_space<vmem>>, vector<2x64x32xf32>
    %466 = vector.shape_cast %465 : vector<2x64x32xf32> to vector<128x32xf32>
    %467 = arith.truncf %466 : vector<128x32xf32> to vector<128x32xbf16>
    %c65 = arith.constant 65 : index
    %c0_405 = arith.constant 0 : index
    %c0_406 = arith.constant 0 : index
    %468 = vector.load %arg3[%c65, %c0_405, %c0_406] : memref<67x32x32xbf16, #tpu.memory_space<vmem>>, vector<1x32x32xbf16>
    %469 = vector.shape_cast %468 : vector<1x32x32xbf16> to vector<32x32xbf16>
    %cst_407 = arith.constant dense<0.000000e+00> : vector<128x32xf32>
    %470 = tpu.matmul %467, %469, %cst_407 {dimension_numbers = #tpu.dot_dimension_numbers<[1], [0], [0], [1], [0, 0, 1, 1], [], []>} : vector<128x32xbf16>, vector<32x32xbf16>, vector<128x32xf32> -> vector<128x32xf32>
    %471 = arith.addf %464, %470 : vector<128x32xf32>
    %c0_408 = arith.constant 0 : index
    %c23_409 = arith.constant 23 : index
    %c0_410 = arith.constant 0 : index
    %472 = vector.load %arg6[%c0_408, %c23_409, %c0_410] : memref<2x104x32xf32, #tpu.memory_space<vmem>>, vector<2x64x32xf32>
    %473 = vector.shape_cast %472 : vector<2x64x32xf32> to vector<128x32xf32>
    %474 = arith.truncf %473 : vector<128x32xf32> to vector<128x32xbf16>
    %c66 = arith.constant 66 : index
    %c0_411 = arith.constant 0 : index
    %c0_412 = arith.constant 0 : index
    %475 = vector.load %arg3[%c66, %c0_411, %c0_412] : memref<67x32x32xbf16, #tpu.memory_space<vmem>>, vector<1x32x32xbf16>
    %476 = vector.shape_cast %475 : vector<1x32x32xbf16> to vector<32x32xbf16>
    %cst_413 = arith.constant dense<0.000000e+00> : vector<128x32xf32>
    %477 = tpu.matmul %474, %476, %cst_413 {dimension_numbers = #tpu.dot_dimension_numbers<[1], [0], [0], [1], [0, 0, 1, 1], [], []>} : vector<128x32xbf16>, vector<32x32xbf16>, vector<128x32xf32> -> vector<128x32xf32>
    %478 = arith.addf %471, %477 : vector<128x32xf32>
    %c0_414 = arith.constant 0 : index
    %c19_415 = arith.constant 19 : index
    %c0_416 = arith.constant 0 : index
    %479 = vector.load %arg1[%c0_414, %c19_415, %c0_416] : memref<2x104x4xf32, #tpu.memory_space<vmem>>, vector<2x64x4xf32>
    %c0_417 = arith.constant 0 : index
    %c18_418 = arith.constant 18 : index
    %c0_419 = arith.constant 0 : index
    %480 = vector.load %arg1[%c0_417, %c18_418, %c0_419] : memref<2x104x4xf32, #tpu.memory_space<vmem>>, vector<2x64x4xf32>
    %c0_420 = arith.constant 0 : index
    %c20_421 = arith.constant 20 : index
    %c0_422 = arith.constant 0 : index
    %481 = vector.load %arg1[%c0_420, %c20_421, %c0_422] : memref<2x104x4xf32, #tpu.memory_space<vmem>>, vector<2x64x4xf32>
    %482 = tpu.iota {dimensions = array<i32: 1>} : vector<2x64x4xi32>
    %c1_i32 = arith.constant 1 : i32
    %483 = vector.broadcast %c1_i32 : i32 to vector<2x64x4xi32>
    %484 = arith.cmpi sge, %482, %483 : vector<2x64x4xi32>
    %485 = arith.select %484, %480, %479 : vector<2x64x4xi1>, vector<2x64x4xf32>
    %c62_i32 = arith.constant 62 : i32
    %486 = vector.broadcast %c62_i32 : i32 to vector<2x64x4xi32>
    %487 = arith.cmpi sle, %482, %486 : vector<2x64x4xi32>
    %488 = arith.select %487, %481, %479 : vector<2x64x4xi1>, vector<2x64x4xf32>
    %489 = arith.maximumf %485, %479 : vector<2x64x4xf32>
    %490 = arith.maximumf %489, %488 : vector<2x64x4xf32>
    %491 = vector.shape_cast %490 : vector<2x64x4xf32> to vector<128x4xf32>
    %c1_423 = arith.constant 1 : index
    %c0_424 = arith.constant 0 : index
    %c0_425 = arith.constant 0 : index
    %492 = vector.load %arg2[%c1_423, %c0_424, %c0_425] : memref<2x4x32xf32, #tpu.memory_space<vmem>>, vector<1x4x32xf32>
    %493 = vector.shape_cast %492 : vector<1x4x32xf32> to vector<4x32xf32>
    %cst_426 = arith.constant dense<0.000000e+00> : vector<128x32xf32>
    %494 = tpu.matmul %491, %493, %cst_426 {dimension_numbers = #tpu.dot_dimension_numbers<[1], [0], [0], [1], [0, 0, 1, 1], [], []>} : vector<128x4xf32>, vector<4x32xf32>, vector<128x32xf32> -> vector<128x32xf32>
    %495 = tpu.concatenate %280, %414, %478, %494 in 1 : vector<128x32xf32>, vector<128x32xf32>, vector<128x32xf32>, vector<128x32xf32> -> vector<128x128xf32>
    %c0_427 = arith.constant 0 : index
    %c0_428 = arith.constant 0 : index
    %496 = vector.load %arg4[%c0_427, %c0_428] : memref<2x128xf32, #tpu.memory_space<vmem>>, vector<1x128xf32>
    %c1_429 = arith.constant 1 : index
    %c0_430 = arith.constant 0 : index
    %497 = vector.load %arg4[%c1_429, %c0_430] : memref<2x128xf32, #tpu.memory_space<vmem>>, vector<1x128xf32>
    %498 = vector.broadcast %496 : vector<1x128xf32> to vector<128x128xf32>
    %499 = arith.mulf %495, %498 : vector<128x128xf32>
    %500 = vector.broadcast %497 : vector<1x128xf32> to vector<128x128xf32>
    %501 = arith.addf %499, %500 : vector<128x128xf32>
    %cst_431 = arith.constant 0.000000e+00 : f32
    %502 = vector.broadcast %cst_431 : f32 to vector<128x128xf32>
    %503 = arith.maximumf %501, %502 : vector<128x128xf32>
    %504 = vector.shape_cast %503 : vector<128x128xf32> to vector<2x64x128xf32>
    %c0_432 = arith.constant 0 : index
    %c0_433 = arith.constant 0 : index
    %c0_434 = arith.constant 0 : index
    %505 = vector.load %arg5[%c0_432, %c0_433, %c0_434] : memref<2x64x128xf32, #tpu.memory_space<vmem>>, vector<2x64x128xf32>
    tpu.vector_store %arg5[%c0_432, %c0_433, %c0_434], %504 {strides = array<i32>} : memref<2x64x128xf32, #tpu.memory_space<vmem>>, vector<2x64x128xf32>,
    return
  }
  func.func @transform_0(%arg0: i32) -> (i32, i32, i32) {
    %c0_i32 = arith.constant 0 : i32
    %c0_i32_0 = arith.constant 0 : i32
    %c0_i32_1 = arith.constant 0 : i32
    return %arg0, %c0_i32, %c0_i32_0 : i32, i32, i32
  }
  func.func @transform_1(%arg0: i32) -> (i32, i32, i32) {
    %c0_i32 = arith.constant 0 : i32
    %c0_i32_0 = arith.constant 0 : i32
    %c0_i32_1 = arith.constant 0 : i32
    %c0_i32_2 = arith.constant 0 : i32
    return %c0_i32, %c0_i32_0, %c0_i32_1 : i32, i32, i32
  }
  func.func @transform_2(%arg0: i32) -> (i32, i32, i32) {
    %c0_i32 = arith.constant 0 : i32
    %c0_i32_0 = arith.constant 0 : i32
    %c0_i32_1 = arith.constant 0 : i32
    %c0_i32_2 = arith.constant 0 : i32
    return %c0_i32, %c0_i32_0, %c0_i32_1 : i32, i32, i32
  }
  func.func @transform_3(%arg0: i32) -> (i32, i32) {
    %c0_i32 = arith.constant 0 : i32
    %c0_i32_0 = arith.constant 0 : i32
    %c0_i32_1 = arith.constant 0 : i32
    return %c0_i32, %c0_i32_0 : i32, i32
  }
  func.func @transform_4(%arg0: i32) -> (i32, i32, i32) {
    %c0_i32 = arith.constant 0 : i32
    %c0_i32_0 = arith.constant 0 : i32
    %c0_i32_1 = arith.constant 0 : i32
    return %arg0, %c0_i32, %c0_i32_0 : i32, i32, i32
  }
}

</mosaic_0001>

<bundles_post_ra>
// kernel: tpu_custom_call.1
= control target key start
LH: loop header
LB: loop body
LE: loop exit
PB: predicated region body
PF: predicated region fallthrough
CT: control target
= control target key end

     0   :  { %vm125_vm0 = vcmask 1043456   ;;  %vm46_vm1 = vcmask 31744   ;;  %s18718_s0 = inlined_call_operand.vmem [shape: f32[2,104,4], index: 0, kind: input, shape index: {}]   ;;  %s18719_s1 = inlined_call_operand.vmem [shape: f32[2,4,32], index: 1, kind: input, shape index: {}]   ;;  %s18720_s2 = inlined_call_operand.vmem [shape: bf16[67,32,32], index: 2, kind: input, shape index: {}]   ;;  %s18721_s3 = inlined_call_operand.vmem [shape: f32[2,128], index: 3, kind: input, shape index: {}]   ;;  %s18722_s4 = inlined_call_operand.hbm [shape: f32[2,64,128], index: 4, kind: output, shape index: {}]  }
   0x1   :  { %v45_v0 = vld [vmem:[%s18719_s1] sm:$0xf]  ;;  %v20_v2 = vld [vmem:[%s18718_s0 + $0x8] sm:$0xff]  ;;  %v21_v3 = vld [vmem:[%s18718_s0 + $0x10] sm:$0xff] }
   0x2   :  { %v19_v1 = vld [vmem:[%s18718_s0] sm:$0xff]  ;;  %13198 = vmatprep.subr.msk.mxu0 %vm125_vm0, %v45_v0  ;;  %v22_v4 = vld [vmem:[%s18718_s0 + $0x18] sm:$0xff]  ;;  %v24_v6 = vld [vmem:[%s18718_s0 + $0x28] sm:$0xff] }
   0x3   :  { %13200 = vmatprep.mubr.msk.f32.mxu0 %vm46_vm1, %v19_v1  ;;  %13199 = vmatpush3.msk.msra.mxu0 %vm125_vm0, %v45_v0  ;;  %v23_v5 = vld [vmem:[%s18718_s0 + $0x20] sm:$0xff]  ;;  %v25_v7 = vld [vmem:[%s18718_s0 + $0x30] sm:$0xff]  ;;  %v26_v9 = vld [vmem:[%s18718_s0 + $0x38] sm:$0xff] }
   0x4   :  { %13201 = vmatmul.mubr.msk.f32.vlgmr.msra.gmra.mrb[0].mxu0 %vm46_vm1, %v20_v2  ;;  %v15639_v8 = vld [vmem:[%s18720_s2 + $0x10] sm:$0xff]   ;;  %v27_v10 = vld [vmem:[%s18718_s0 + $0x40] sm:$0xff]  ;;  %v28_v11 = vld [vmem:[%s18718_s0 + $0x48] sm:$0xff] }
   0x5   :  { %13203 = vmatprep.mubr.msk.f32.mxu0 %vm46_vm1, %v21_v3  ;;  %13239 = vmatprep.subr.bf16.mxu0 %v15639_v8  ;;  %v29_v12 = vld [vmem:[%s18718_s0 + $0x50] sm:$0xff]  ;;  %v30_v13 = vld [vmem:[%s18718_s0 + $0x58] sm:$0xff]  ;;  %v31_v14 = vld [vmem:[%s18718_s0 + $0x60] sm:$0xff] }
   0x6   :  { %13240 = vmatpush3.bf16.msra.mxu0 %v15639_v8  ;;  %v32_v15 = vld [vmem:[%s18718_s0 + $0x68] sm:$0xff]  ;;  %v33_v16 = vld [vmem:[%s18718_s0 + $0x70] sm:$0xff]  ;;  %v34_v17 = vld [vmem:[%s18718_s0 + $0x78] sm:$0xff] }
   0x7   :  { %v35_v18 = vld [vmem:[%s18718_s0 + $0x80] sm:$0xff]  ;;  %v36_v19 = vld [vmem:[%s18718_s0 + $0x88] sm:$0xff]  ;;  %v37_v20 = vld [vmem:[%s18718_s0 + $0x90] sm:$0xff] }
   0x8   :  { %13204 = vmatmul.mubr.msk.f32.gmra.mrb[2].mxu0 %vm46_vm1, %v22_v4  ;;  %v38_v21 = vld [vmem:[%s18718_s0 + $0x98] sm:$0xff]  ;;  %v39_v22 = vld [vmem:[%s18718_s0 + $0xa0] sm:$0xff]  ;;  %v40_v23 = vld [vmem:[%s18718_s0 + $0xa8] sm:$0xff] }
   0x9   :  { %13206 = vmatprep.mubr.msk.f32.mxu0 %vm46_vm1, %v23_v5  ;;  %v41_v24 = vld [vmem:[%s18718_s0 + $0xb0] sm:$0xff]  ;;  %v42_v25 = vld [vmem:[%s18718_s0 + $0xb8] sm:$0xff]  ;;  %v43_v26 = vld [vmem:[%s18718_s0 + $0xc0] sm:$0xff] }
   0xa   :  { %v44_v27 = vld [vmem:[%s18718_s0 + $0xc8] sm:$0xff]  ;;  %v15640_v28 = vld [vmem:[%s18720_s2 + $0x18] sm:$0xff]  }
   0xb   :  { %13241 = vmatprep.subr.bf16.mxu0 %v15640_v28 }
   0xc   :  { %13207 = vmatmul.mubr.msk.f32.gmra.mrb[4].mxu0 %vm46_vm1, %v24_v6 }
   0xd   :  { %13209 = vmatprep.mubr.msk.f32.mxu0 %vm46_vm1, %v25_v7  ;;  %13242 = vmatpush3.bf16.msra.mxu0 %v15640_v28 }
  0x10   :  { %13210 = vmatmul.mubr.msk.f32.gmra.mrb[6].mxu0 %vm46_vm1, %v26_v9 }
  0x11   :  { %13212 = vmatprep.mubr.msk.f32.mxu0 %vm46_vm1, %v27_v10 }
  0x14   :  { %13213 = vmatmul.mubr.msk.f32.gmra.mrb[8].mxu0 %vm46_vm1, %v28_v11 }
  0x15   :  { %13215 = vmatprep.mubr.msk.f32.mxu0 %vm46_vm1, %v29_v12 }
  0x18   :  { %13216 = vmatmul.mubr.msk.f32.gmra.mrb[10].mxu0 %vm46_vm1, %v30_v13 }
  0x19   :  { %13218 = vmatprep.mubr.msk.f32.mxu0 %vm46_vm1, %v31_v14 }
  0x1c   :  { %13219 = vmatmul.mubr.msk.f32.gmra.mrb[12].mxu0 %vm46_vm1, %v32_v15 }
  0x1d   :  { %13221 = vmatprep.mubr.msk.f32.mxu0 %vm46_vm1, %v33_v16 }
  0x20   :  { %13222 = vmatmul.mubr.msk.f32.gmra.mrb[14].mxu0 %vm46_vm1, %v34_v17 }
  0x21   :  { %13224 = vmatprep.mubr.msk.f32.mxu0 %vm46_vm1, %v35_v18 }
  0x24   :  { %13225 = vmatmul.mubr.msk.f32.gmra.mrb[16].mxu0 %vm46_vm1, %v36_v19 }
  0x25   :  { %13227 = vmatprep.mubr.msk.f32.mxu0 %vm46_vm1, %v37_v20 }
  0x28   :  { %13228 = vmatmul.mubr.msk.f32.gmra.mrb[18].mxu0 %vm46_vm1, %v38_v21 }
  0x29   :  { %13230 = vmatprep.mubr.msk.f32.mxu0 %vm46_vm1, %v39_v22 }
  0x2c   :  { %13231 = vmatmul.mubr.msk.f32.gmra.mrb[20].mxu0 %vm46_vm1, %v40_v23 }
  0x2d   :  { %13233 = vmatprep.mubr.msk.f32.mxu0 %vm46_vm1, %v41_v24 }
  0x30   :  { %13234 = vmatmul.mubr.msk.f32.gmra.mrb[22].mxu0 %vm46_vm1, %v42_v25 }
  0x31   :  { %13236 = vmatprep.mubr.msk.f32.mxu0 %vm46_vm1, %v43_v26 }
  0x34   :  { %13237 = vmatmul.mubr.msk.f32.gmra.mrb[24].mxu0 %vm46_vm1, %v44_v27 }
  0x35   :  { %9 = vsyncpa [#allocation4], 0  ;;  %v15961_v29 = vld [vmem:[%s18720_s2 + $0x40] sm:$0xff]   ;;  %v15968_v30 = vld [vmem:[%s18720_s2 + $0x48] sm:$0xff]   ;;  %vm324_vm2 = vcmask 261120   ;;  %s15812_s27 = smov 32  }
  0x36   :  { %14605 = vmatprep.subr.bf16.mxu1 %v15961_v29  ;;  %18872 = vst [vmem:[#allocation6_spill] sm:$0xff] %v15968_v30  ;;  %v15975_v31 = vld [vmem:[%s18720_s2] sm:$0xff]   ;;  %v15981_v32 = vld [vmem:[%s18720_s2 + $0x50] sm:$0xff]   ;;  %v15644_v57 = vld [vmem:[%s18720_s2 + $0x8] sm:$0xff]   ;;  %vm11396_vm5 = vcmask 785408   ;;  %vm11379_vm6 = vcmask 523264  }
  0x37   :  { %14607 = vmatpush3.bf16.msra.mxu1 %v15961_v29  ;;  %13259 = vmatprep.subr.bf16.mxu0 %v15975_v31  ;;  %v16067_v12 = vld [vmem:[%s18720_s2 + $0x20] sm:$0xff]  }
  0x38   :  { %14606 = vmatprep.subr.bf16.mxu1 %v15968_v30 }
  0x3b   :  { %14608 = vmatpush3.bf16.msra.mxu1 %v15968_v30 }
  0x3c   :  { %13339 = vmatprep.subr.bf16.mxu1 %v15981_v32 }
  0xd7   :  { %v13202_v33 = vpop.f32.mrb[0].mxu0 }
  0xd8   :  { %326 = vst.msk [vmem:[#allocation2 + $0x8] sm:$0xff] %vm324_vm2, %v13202_v33  ;;  %v195_v34 = vpop.f32.mrb[1].mxu0 }
  0xd9   :  { %325 = vst.msk [vmem:[#allocation2] sm:$0xff] %vm324_vm2, %v195_v34 }
  0xdb   :  { %v13205_v35 = vpop.f32.mrb[2].mxu0 }
  0xdc   :  { %328 = vst.msk [vmem:[#allocation2 + $0x18] sm:$0xff] %vm324_vm2, %v13205_v35  ;;  %v205_v36 = vpop.f32.mrb[3].mxu0 }
  0xdd   :  { %327 = vst.msk [vmem:[#allocation2 + $0x10] sm:$0xff] %vm324_vm2, %v205_v36 }
  0xdf   :  { %v13208_v37 = vpop.f32.mrb[4].mxu0  ;;  %v15990_v41 = vld [vmem:[#allocation2 + $0x8] sm:$0xff] }
  0xe0   :  { %330 = vst.msk [vmem:[#allocation2 + $0x28] sm:$0xff] %vm324_vm2, %v13208_v37  ;;  %v215_v38 = vpop.f32.mrb[5].mxu0  ;;  %v379_v40 = vld [vmem:[#allocation2 + $0x1] sm:$0xff]  ;;  %18873 = vst [vmem:[#allocation7_spill] sm:$0xff] %v15990_v41 }
  0xe1   :  { %329 = vst.msk [vmem:[#allocation2 + $0x20] sm:$0xff] %vm324_vm2, %v215_v38 }
  0xe3   :  { %v13211_v39 = vpop.f32.mrb[6].mxu0  ;;  %v16038_v63 = vld [vmem:[#allocation2 + $0x18] sm:$0xff] }
  0xe4   :  { %332 = vst.msk [vmem:[#allocation2 + $0x38] sm:$0xff] %vm324_vm2, %v13211_v39  ;;  %v225_v42 = vpop.f32.mrb[7].mxu0  ;;  %v15993_v43 = vld [vmem:[#allocation2 + $0x9] sm:$0xff]  ;;  %v15995_v44 = vld [vmem:[#allocation2 + $0x11] sm:$0xff]  ;;  %18882 = vst [vmem:[#allocation16_spill] sm:$0xff] %v16038_v63 }
  0xe5   :  { %18874 = vst [vmem:[#allocation8_spill] sm:$0xff] %v15993_v43  ;;  %18875 = vst [vmem:[#allocation9_spill] sm:$0xff] %v15995_v44  ;;  %v15997_v45 = vld [vmem:[#allocation2 + $0xd] sm:$0xff]  ;;  %v395_v46 = vpack.c.bf16 %v15993_v43, %v379_v40  ;;  %v16003_v48 = vld [vmem:[#allocation2 + $0x15] sm:$0xff] }
  0xe6   :  { %331 = vst.msk [vmem:[#allocation2 + $0x30] sm:$0xff] %vm324_vm2, %v225_v42  ;;  %v16001_v47 = vld [vmem:[#allocation2 + $0x10] sm:$0xff]  ;;  %v16019_v55 = vpack.c.bf16 %v16003_v48, %v15997_v45 }
  0xe7   :  { %18876 = vst [vmem:[#allocation10_spill] sm:$0xff] %v16001_v47  ;;  %v16005_v49 = vld [vmem:[#allocation2 + $0xa] sm:$0xff]  ;;  %v16011_v52 = vld [vmem:[#allocation2 + $0x12] sm:$0xff]  ;;  %v13214_v56 = vpop.f32.mrb[8].mxu0  ;;  %13243 = vmatprep.mubr.msk.bf16.mxu0 %vm324_vm2, %v395_v46 }
  0xe8   :  { %v16009_v51 = vld [vmem:[#allocation2 + $0xe] sm:$0xff]  ;;  %v16013_v53 = vld [vmem:[#allocation2 + $0x16] sm:$0xff]  ;;  %18877 = vst [vmem:[#allocation11_spill] sm:$0xff] %v16019_v55  ;;  %v16027_v58 = vpack.c.bf16 %v16011_v52, %v16005_v49  ;;  %334 = vst.msk [vmem:[#allocation2 + $0x48] sm:$0xff] %vm324_vm2, %v13214_v56  ;;  %v235_v60 = vpop.f32.mrb[9].mxu0 }
  0xe9   :  { %v16031_v59 = vpack.c.bf16 %v16013_v53, %v16009_v51  ;;  %v16034_v61 = vld [vmem:[#allocation2 + $0x19] sm:$0xff]  ;;  %v16036_v62 = vld [vmem:[#allocation2 + $0x21] sm:$0xff]  ;;  %333 = vst.msk [vmem:[#allocation2 + $0x40] sm:$0xff] %vm324_vm2, %v235_v60  ;;  %v16110_v36 = vld [vmem:[#allocation2 + $0xf] sm:$0xff] }
  0xea   :  { %18878 = vst [vmem:[#allocation12_spill] sm:$0xff] %v16027_v58  ;;  %18880 = vst [vmem:[#allocation14_spill] sm:$0xff] %v16034_v61  ;;  %v396_v0 = vpack.c.bf16 %v16034_v61, %v15995_v44  ;;  %v16043_v1 = vld [vmem:[#allocation2 + $0x1d] sm:$0xff]  ;;  %v16047_v3 = vld [vmem:[#allocation2 + $0x25] sm:$0xff] }
  0xeb   :  { %18879 = vst [vmem:[#allocation13_spill] sm:$0xff] %v16031_v59  ;;  %18881 = vst [vmem:[#allocation15_spill] sm:$0xff] %v16036_v62  ;;  %v16045_v2 = vld [vmem:[#allocation2 + $0x20] sm:$0xff]  ;;  %v16061_v9 = vpack.c.bf16 %v16047_v3, %v16043_v1  ;;  %v13217_v10 = vpop.f32.mrb[10].mxu0  ;;  %v16088_v22 = vld [vmem:[#allocation2 + $0x28] sm:$0xff] }
  0xec   :  { %18883 = vst [vmem:[#allocation17_spill] sm:$0xff] %v16045_v2  ;;  %v16051_v5 = vld [vmem:[#allocation2 + $0x1a] sm:$0xff]  ;;  %v16055_v7 = vld [vmem:[#allocation2 + $0x22] sm:$0xff]  ;;  %13244 = vmatmul.mubr.msk.bf16.vlgmr.msra.gmra.mrb[28].mxu0 %vm324_vm2, %v396_v0  ;;  %336 = vst.msk [vmem:[#allocation2 + $0x58] sm:$0xff] %vm324_vm2, %v13217_v10  ;;  %v245_v15 = vpop.f32.mrb[11].mxu0 }
  0xed   :  { %v16053_v6 = vld [vmem:[#allocation2 + $0x1e] sm:$0xff]  ;;  %18884 = vst [vmem:[#allocation18_spill] sm:$0xff] %v16061_v9  ;;  %v16069_v13 = vld [vmem:[#allocation2 + $0x26] sm:$0xff]  ;;  %v16073_v14 = vpack.c.bf16 %v16055_v7, %v16051_v5  ;;  %v16078_v18 = vld [vmem:[#allocation2 + $0x31] sm:$0xff]  ;;  %13260 = vmatpush3.bf16.msra.mxu0 %v15975_v31 }
  0xee   :  { %v1034_v11 = vld [vmem:[#allocation2 + $0x24] sm:$0xff]  ;;  %v1035_v17 = vld [vmem:[#allocation2 + $0x2c] sm:$0xff]  ;;  %18887 = vst [vmem:[#allocation21_spill] sm:$0xff] %v16078_v18  ;;  %v16083_v19 = vpack.c.bf16 %v16069_v13, %v16053_v6  ;;  %335 = vst.msk [vmem:[#allocation2 + $0x50] sm:$0xff] %vm324_vm2, %v245_v15  ;;  %13261 = vmatprep.subr.bf16.mxu0 %v15644_v57 }
  0xef   :  { %18885 = vst [vmem:[#allocation19_spill] sm:$0xff] %v16073_v14  ;;  %v16076_v16 = vld [vmem:[#allocation2 + $0x29] sm:$0xff]  ;;  %v1048_v21 = vpack.c.bf16 %v1035_v17, %v1034_v11  ;;  %18889 = vst [vmem:[#allocation23_spill] sm:$0xff] %v16088_v22  ;;  %v16096_v26 = vld [vmem:[#allocation2 + $0x35] sm:$0xff]  ;;  %v13220_v33 = vpop.f32.mrb[12].mxu0 }
  0xf0   :  { %18886 = vst [vmem:[#allocation20_spill] sm:$0xff] %v16076_v16  ;;  %18888 = vst [vmem:[#allocation22_spill] sm:$0xff] %v16083_v19  ;;  %v397_v20 = vpack.c.bf16 %v16076_v16, %v16036_v62  ;;  %v16090_v23 = vld [vmem:[#allocation2 + $0x2d] sm:$0xff]  ;;  %v16108_v35 = vld [vmem:[#allocation2 + $0x36] sm:$0xff]  ;;  %v255_v38 = vpop.f32.mrb[13].mxu0 }
  0xf1   :  { %v16092_v24 = vld [vmem:[#allocation2 + $0x30] sm:$0xff]  ;;  %13327 = vmatprep.mubr.msk.bf16.mxu1 %vm324_vm2, %v1048_v21  ;;  %v16114_v37 = vpack.c.bf16 %v16096_v26, %v16090_v23  ;;  %338 = vst.msk [vmem:[#allocation2 + $0x68] sm:$0xff] %vm324_vm2, %v13220_v33  ;;  %v16117_v39 = vld [vmem:[#allocation2 + $0x39] sm:$0xff]  ;;  %13262 = vmatpush3.bf16.msra.mxu0 %v15644_v57  ;;  %337 = vst.msk [vmem:[#allocation2 + $0x60] sm:$0xff] %vm324_vm2, %v255_v38 }
  0xf2   :  { %v16098_v27 = vld [vmem:[#allocation2 + $0x2a] sm:$0xff]  ;;  %13247 = vmatprep.mubr.msk.bf16.mxu0 %vm324_vm2, %v397_v20  ;;  %v16106_v34 = vld [vmem:[#allocation2 + $0x32] sm:$0xff]  ;;  %18891 = vst [vmem:[#allocation25_spill] sm:$0xff] %v16117_v39  ;;  %v1037_v42 = vld [vmem:[#allocation2 + $0x3c] sm:$0xff]  ;;  %v398_v60 = vpack.c.bf16 %v16117_v39, %v16078_v18  ;;  %13279 = vmatprep.subr.bf16.mxu0 %v16067_v12 }
  0xf3   :  { %v16100_v28 = vld [vmem:[#allocation2 + $0x2e] sm:$0xff]  ;;  %18890 = vst [vmem:[#allocation24_spill] sm:$0xff] %v16114_v37  ;;  %v16121_v46 = vpack.c.bf16 %v16106_v34, %v16098_v27  ;;  %v16134_v57 = vld [vmem:[#allocation2 + $0x17] sm:$0xff]  ;;  %v16136_v11 = vld [vmem:[#allocation2 + $0x1f] sm:$0xff]  ;;  %v13223_v17 = vpop.f32.mrb[14].mxu0 }
  0xf4   :  { %v1036_v40 = vld [vmem:[#allocation2 + $0x34] sm:$0xff]  ;;  %v16125_v56 = vpack.c.bf16 %v16108_v35, %v16100_v28  ;;  %v15646_v10 = vld [vmem:[%s18720_s2 + $0x58] sm:$0xff]   ;;  %18894 = vst [vmem:[#allocation28_spill] sm:$0xff] %v16134_v57  ;;  %18895 = vst [vmem:[#allocation29_spill] sm:$0xff] %v16136_v11  ;;  %v16140_v15 = vpack.c.bf16 %v16134_v57, %v16110_v36  ;;  %13248 = vmatmul.mubr.msk.bf16.gmra.mrb[32].mxu0 %vm324_vm2, %v398_v60  ;;  %v265_v33 = vpop.f32.mrb[15].mxu0 }
  0xf5   :  { %18892 = vst [vmem:[#allocation26_spill] sm:$0xff] %v16121_v46  ;;  %v1049_v0 = vpack.c.bf16 %v1037_v42, %v1036_v40  ;;  %v16144_v20 = vld [vmem:[#allocation2 + $0x27] sm:$0xff]  ;;  %v16146_v21 = vld [vmem:[#allocation2 + $0x2f] sm:$0xff]  ;;  %340 = vst.msk [vmem:[#allocation2 + $0x78] sm:$0xff] %vm324_vm2, %v13223_v17 }
  0xf6   :  { %18893 = vst [vmem:[#allocation27_spill] sm:$0xff] %v16125_v56  ;;  %18896 = vst [vmem:[#allocation30_spill] sm:$0xff] %v16140_v15  ;;  %v16150_v38 = vld [vmem:[#allocation2 + $0x37] sm:$0xff]  ;;  %v16154_v40 = vpack.c.bf16 %v16144_v20, %v16136_v11  ;;  %v16162_v60 = vld [vmem:[#allocation2 + $0xc] sm:$0xff] }
  0xf7   :  { %13328 = vmatmul.mubr.msk.bf16.vlgmr.msra.gmra.mrb[0].mxu1 %vm324_vm2, %v1049_v0  ;;  %18897 = vst [vmem:[#allocation31_spill] sm:$0xff] %v16144_v20  ;;  %18898 = vst [vmem:[#allocation32_spill] sm:$0xff] %v16146_v21  ;;  %v16160_v42 = vld [vmem:[%s18720_s2 + $0x60] sm:$0xff]   ;;  %v16166_v0 = vpack.c.bf16 %v16150_v38, %v16146_v21  ;;  %v13226_v17 = vpop.f32.mrb[16].mxu0  ;;  %v16177_v4 = vld [vmem:[#allocation2 + $0x24] sm:$0xff] }
  0xf8   :  { %13340 = vmatpush3.bf16.msra.mxu1 %v15981_v32  ;;  %18899 = vst [vmem:[#allocation33_spill] sm:$0xff] %v16150_v38  ;;  %18900 = vst [vmem:[#allocation34_spill] sm:$0xff] %v16154_v40  ;;  %v16168_v32 = vld [vmem:[#allocation2 + $0x14] sm:$0xff]  ;;  %v16179_v50 = vld [vmem:[#allocation2 + $0x2c] sm:$0xff] }
  0xf9   :  { %339 = vst.msk [vmem:[#allocation2 + $0x70] sm:$0xff] %vm324_vm2, %v265_v33  ;;  %13341 = vmatprep.subr.bf16.mxu1 %v15646_v10  ;;  %18901 = vst [vmem:[#allocation35_spill] sm:$0xff] %v16162_v60  ;;  %v16172_v25 = vpack.c.bf16 %v16168_v32, %v16162_v60  ;;  %v275_v33 = vpop.f32.mrb[17].mxu0  ;;  %v16181_v31 = vld [vmem:[#allocation2 + $0x34] sm:$0xff]  ;;  %v16183_v8 = vld [vmem:[#allocation2 + $0x3c] sm:$0xff]  ;;  %v16187_v54 = vpack.c.bf16 %v16179_v50, %v16177_v4 }
  0xfa   :  { %18902 = vst [vmem:[#allocation36_spill] sm:$0xff] %v16166_v0  ;;  %18903 = vst [vmem:[#allocation37_spill] sm:$0xff] %v16168_v32  ;;  %v351_v32 = vld [vmem:[#allocation2] sm:$0xff] }
  0xfb   :  { %18904 = vst [vmem:[#allocation38_spill] sm:$0xff] %v16172_v25  ;;  %342 = vst.msk [vmem:[#allocation2 + $0x88] sm:$0xff] %vm324_vm2, %v13226_v17  ;;  %v13229_v0 = vpop.f32.mrb[18].mxu0  ;;  %v1208_v20 = vld [vmem:[#allocation2 + $0x5] sm:$0xff] }
  0xfc   :  { %13342 = vmatpush3.bf16.msra.mxu1 %v15646_v10  ;;  %341 = vst.msk [vmem:[#allocation2 + $0x80] sm:$0xff] %vm324_vm2, %v275_v33  ;;  %18905 = vst [vmem:[#allocation39_spill] sm:$0xff] %v16177_v4  ;;  %v16189_v17 = vld [vmem:[#allocation2 + $0x78] sm:$0xff]  ;;  %v16193_v10 = vpack.c.bf16 %v16183_v8, %v16181_v31  ;;  %v285_v33 = vpop.f32.mrb[19].mxu0 }
  0xfd   :  { %13359 = vmatprep.subr.bf16.mxu1 %v16160_v42  ;;  %18906 = vst [vmem:[#allocation40_spill] sm:$0xff] %v16179_v50  ;;  %18907 = vst [vmem:[#allocation41_spill] sm:$0xff] %v16181_v31 }
  0xfe   :  { %18908 = vst [vmem:[#allocation42_spill] sm:$0xff] %v16183_v8  ;;  %18909 = vst [vmem:[#allocation43_spill] sm:$0xff] %v16187_v54 }
  0xff   :  { %18910 = vst [vmem:[#allocation44_spill] sm:$0xff] %v16193_v10  ;;  %344 = vst.msk [vmem:[#allocation2 + $0x98] sm:$0xff] %vm324_vm2, %v13229_v0  ;;  %v13232_v55 = vpop.f32.mrb[20].mxu0 }
 0x100   :  { %v387_v40 = vld [vmem:[#allocation2 + $0x69] sm:$0xff]  ;;  %v16196_v15 = vld [vmem:[#allocation2 + $0x71] sm:$0xff]  ;;  %343 = vst.msk [vmem:[#allocation2 + $0x90] sm:$0xff] %vm324_vm2, %v285_v33  ;;  %346 = vst.msk [vmem:[#allocation2 + $0xa8] sm:$0xff] %vm324_vm2, %v13232_v55  ;;  %v295_v33 = vpop.f32.mrb[21].mxu0 }
 0x101   :  { %18911 = vst [vmem:[#allocation45_spill] sm:$0xff] %v16196_v15  ;;  %v1038_v56 = vld [vmem:[#allocation2 + $0x6c] sm:$0xff]  ;;  %v399_v19 = vpack.c.bf16 %v16196_v15, %v387_v40  ;;  %v1039_v59 = vld [vmem:[#allocation2 + $0x74] sm:$0xff]  ;;  %345 = vst.msk [vmem:[#allocation2 + $0xa0] sm:$0xff] %vm324_vm2, %v295_v33 }
 0x102   :  { %v16200_v54 = vld [vmem:[#allocation2 + $0x70] sm:$0xff]  ;;  %v1050_v37 = vpack.c.bf16 %v1039_v59, %v1038_v56  ;;  %v16207_v10 = vld [vmem:[#allocation2 + $0x88] sm:$0xff] }
 0x103   :  { %13251 = vmatprep.mubr.msk.bf16.mxu0 %vm324_vm2, %v399_v19  ;;  %v16205_v0 = vld [vmem:[#allocation2 + $0x75] sm:$0xff]  ;;  %v16213_v8 = vld [vmem:[#allocation2 + $0x81] sm:$0xff]  ;;  %v13235_v16 = vpop.f32.mrb[22].mxu0 }
 0x104   :  { %13331 = vmatprep.mubr.msk.bf16.mxu1 %vm324_vm2, %v1050_v37  ;;  %v16211_v40 = vld [vmem:[#allocation2 + $0x79] sm:$0xff]  ;;  %18913 = vst [vmem:[#allocation47_spill] sm:$0xff] %v16213_v8  ;;  %v1041_v19 = vld [vmem:[#allocation2 + $0x84] sm:$0xff]  ;;  %348 = vst.msk [vmem:[#allocation2 + $0xb8] sm:$0xff] %vm324_vm2, %v13235_v16  ;;  %v305_v33 = vpop.f32.mrb[23].mxu0 }
 0x105   :  { %18912 = vst [vmem:[#allocation46_spill] sm:$0xff] %v16211_v40  ;;  %v1040_v56 = vld [vmem:[#allocation2 + $0x7c] sm:$0xff]  ;;  %v400_v9 = vpack.c.bf16 %v16213_v8, %v16211_v40  ;;  %v16226_v25 = vld [vmem:[#allocation2 + $0x72] sm:$0xff]  ;;  %v16239_v55 = vld [vmem:[#allocation2 + $0x85] sm:$0xff] }
 0x106   :  { %v16218_v31 = vld [vmem:[#allocation2 + $0x80] sm:$0xff]  ;;  %v16224_v37 = vpack.c.bf16 %v1040_v56, %v1039_v59  ;;  %v1051_v4 = vpack.c.bf16 %v1041_v19, %v1040_v56  ;;  %v16228_v46 = vld [vmem:[#allocation2 + $0x76] sm:$0xff]  ;;  %347 = vst.msk [vmem:[#allocation2 + $0xb0] sm:$0xff] %vm324_vm2, %v305_v33 }
 0x107   :  { %v16220_v50 = vld [vmem:[#allocation2 + $0x7d] sm:$0xff]  ;;  %13252 = vmatmul.mubr.msk.bf16.gmra.mrb[36].mxu0 %vm324_vm2, %v400_v9  ;;  %v16251_v15 = vld [vmem:[#allocation2 + $0x89] sm:$0xff]  ;;  %v16314_v11 = vld [vmem:[#allocation2 + $0x92] sm:$0xff] }
 0x108   :  { %18914 = vst [vmem:[#allocation48_spill] sm:$0xff] %v16224_v37  ;;  %v16230_v14 = vld [vmem:[#allocation2 + $0x7a] sm:$0xff]  ;;  %v16236_v39 = vpack.c.bf16 %v16220_v50, %v16205_v0  ;;  %13332 = vmatmul.mubr.msk.bf16.gmra.mrb[4].mxu1 %vm324_vm2, %v1051_v4  ;;  %18917 = vst [vmem:[#allocation51_spill] sm:$0xff] %v16251_v15  ;;  %v1042_v9 = vld [vmem:[#allocation2 + $0x8c] sm:$0xff] }
 0x109   :  { %v16241_v59 = vld [vmem:[#allocation2 + $0x98] sm:$0xff]  ;;  %v16247_v37 = vpack.c.bf16 %v16230_v14, %v16226_v25  ;;  %v16262_v58 = vld [vmem:[#allocation2 + $0x90] sm:$0xff]  ;;  %v16268_v61 = vpack.c.bf16 %v1042_v9, %v1041_v19  ;;  %v16270_v43 = vld [vmem:[#allocation2 + $0x82] sm:$0xff]  ;;  %v13238_v19 = vpop.f32.mrb[24].mxu0 }
 0x10a   :  { %18915 = vst [vmem:[#allocation49_spill] sm:$0xff] %v16236_v39  ;;  %v16243_v56 = vld [vmem:[#allocation2 + $0x7e] sm:$0xff]  ;;  %v16253_v39 = vld [vmem:[#allocation2 + $0x91] sm:$0xff]  ;;  %v16281_v60 = vld [vmem:[#allocation2 + $0x86] sm:$0xff] }
 0x10b   :  { %18916 = vst [vmem:[#allocation50_spill] sm:$0xff] %v16247_v37  ;;  %18918 = vst [vmem:[#allocation52_spill] sm:$0xff] %v16253_v39  ;;  %v16257_v40 = vpack.c.bf16 %v16243_v56, %v16228_v46  ;;  %v401_v18 = vpack.c.bf16 %v16253_v39, %v16251_v15  ;;  %v1043_v37 = vld [vmem:[#allocation2 + $0x94] sm:$0xff]  ;;  %v16272_v44 = vld [vmem:[#allocation2 + $0x8a] sm:$0xff]  ;;  %v1226_v39 = vpack.c.bf16 %v16090_v23, %v16047_v3 }
 0x10c   :  { %v16264_v16 = vld [vmem:[#allocation2 + $0x8d] sm:$0xff]  ;;  %18920 = vst [vmem:[#allocation54_spill] sm:$0xff] %v16268_v61  ;;  %v1052_v62 = vpack.c.bf16 %v1043_v37, %v1042_v9  ;;  %v16287_v9 = vpack.c.bf16 %v16272_v44, %v16270_v43  ;;  %v16290_v61 = vld [vmem:[#allocation2 + $0x99] sm:$0xff]  ;;  %v16292_v33 = vld [vmem:[#allocation2 + $0xa1] sm:$0xff] }
 0x10d   :  { %18919 = vst [vmem:[#allocation53_spill] sm:$0xff] %v16257_v40  ;;  %v16278_v40 = vpack.c.bf16 %v16264_v16, %v16239_v55  ;;  %13255 = vmatprep.mubr.msk.bf16.mxu0 %vm324_vm2, %v401_v18  ;;  %v16283_v4 = vld [vmem:[#allocation2 + $0x8e] sm:$0xff]  ;;  %18923 = vst [vmem:[#allocation57_spill] sm:$0xff] %v16290_v61  ;;  %v1044_v8 = vld [vmem:[#allocation2 + $0x9c] sm:$0xff]  ;;  %v315_v18 = vpop.f32.mrb[25].mxu0  ;;  %v402_v15 = vpack.c.bf16 %v16292_v33, %v16290_v61 }
 0x10e   :  { %18922 = vst [vmem:[#allocation56_spill] sm:$0xff] %v16287_v9  ;;  %13335 = vmatprep.mubr.msk.bf16.mxu1 %vm324_vm2, %v1052_v62  ;;  %18924 = vst [vmem:[#allocation58_spill] sm:$0xff] %v16292_v33  ;;  %v16301_v38 = vld [vmem:[#allocation2 + $0xa4] sm:$0xff]  ;;  %v16303_v9 = vld [vmem:[#allocation2 + $0x95] sm:$0xff] }
 0x10f   :  { %18921 = vst [vmem:[#allocation55_spill] sm:$0xff] %v16278_v40  ;;  %350 = vst.msk [vmem:[#allocation2 + $0xc8] sm:$0xff] %vm324_vm2, %v13238_v19  ;;  %v16297_v40 = vpack.c.bf16 %v16283_v4, %v16281_v60  ;;  %v16305_v62 = vld [vmem:[#allocation2 + $0x9d] sm:$0xff]  ;;  %v16310_v19 = vpack.c.bf16 %v1044_v8, %v1043_v37  ;;  %v1053_v21 = vpack.c.bf16 %v16301_v38, %v1044_v8  ;;  %13256 = vmatmul.mubr.msk.bf16.gmra.mrb[40].mxu0 %vm324_vm2, %v402_v15 }
 0x110   :  { %18926 = vst [vmem:[#allocation60_spill] sm:$0xff] %v16301_v38  ;;  %349 = vst.msk [vmem:[#allocation2 + $0xc0] sm:$0xff] %vm324_vm2, %v315_v18  ;;  %v16316_v33 = vld [vmem:[#allocation2 + $0x9a] sm:$0xff]  ;;  %v16320_v57 = vpack.c.bf16 %v16305_v62, %v16303_v9  ;;  %v1224_v18 = vpack.c.bf16 %v15997_v45, %v1208_v20  ;;  %v16343_v20 = vld [vmem:[#allocation2 + $0x87] sm:$0xff] }
 0x111   :  { %18925 = vst [vmem:[#allocation59_spill] sm:$0xff] %v16297_v40  ;;  %18927 = vst [vmem:[#allocation61_spill] sm:$0xff] %v16310_v19  ;;  %v367_v40 = vpack.c.bf16 %v15990_v41, %v351_v32  ;;  %v16324_v30 = vld [vmem:[#allocation2 + $0x96] sm:$0xff]  ;;  %v16326_v37 = vld [vmem:[#allocation2 + $0x9e] sm:$0xff]  ;;  %v16330_v8 = vpack.c.bf16 %v16316_v33, %v16314_v11  ;;  %13336 = vmatmul.mubr.msk.bf16.gmra.mrb[8].mxu1 %vm324_vm2, %v1053_v21 }
 0x112   :  { %18928 = vst [vmem:[#allocation62_spill] sm:$0xff] %v16320_v57  ;;  %v16336_v32 = vpack.c.bf16 %v16326_v37, %v16324_v30  ;;  %13343 = vmatprep.mubr.msk.bf16.mxu1 %vm324_vm2, %v1224_v18  ;;  %v16339_v15 = vld [vmem:[#allocation2 + $0x77] sm:$0xff]  ;;  %v16341_v45 = vld [vmem:[#allocation2 + $0x7f] sm:$0xff]  ;;  %v16345_v57 = vld [vmem:[#allocation2 + $0x8f] sm:$0xff]  ;;  %v368_v18 = vpack.c.bf16 %v16038_v63, %v16001_v47 }
 0x113   :  { %18929 = vst [vmem:[#allocation63_spill] sm:$0xff] %v16330_v8  ;;  %13263 = vmatprep.mubr.msk.bf16.mxu0 %vm324_vm2, %v367_v40  ;;  %v16349_v38 = vpack.c.bf16 %v16341_v45, %v16339_v15  ;;  %v16353_v21 = vpack.c.bf16 %v16345_v57, %v16343_v20  ;;  %v16355_v40 = vld [vmem:[#allocation2 + $0x97] sm:$0xff]  ;;  %v1225_v8 = vpack.c.bf16 %v16043_v1, %v16003_v48  ;;  %v16383_v48 = vld [vmem:[%s18720_s2 + $0x30] sm:$0xff]  }
 0x114   :  { %18930 = vst [vmem:[#allocation64_spill] sm:$0xff] %v16336_v32  ;;  %v16357_v32 = vld [vmem:[#allocation2 + $0x9f] sm:$0xff] }
 0x115   :  { %18931 = vst [vmem:[#allocation65_spill] sm:$0xff] %v16349_v38  ;;  %18932 = vst [vmem:[#allocation66_spill] sm:$0xff] %v16353_v21  ;;  %v16363_v19 = vpack.c.bf16 %v16357_v32, %v16355_v40  ;;  %v15648_v38 = vld [vmem:[%s18720_s2 + $0x28] sm:$0xff]   ;;  %v369_v21 = vpack.c.bf16 %v16088_v22, %v16045_v2  ;;  %v16390_v1 = vld [vmem:[%s18720_s2 + $0x70] sm:$0xff]  }
 0x116   :  { %v15650_v61 = vld [vmem:[%s18720_s2 + $0x68] sm:$0xff]   ;;  %v16394_v23 = vld [vmem:[#allocation2 + $0x20] sm:$0xff]  ;;  %v16411_v22 = vld [vmem:[#allocation2 + $0x88] sm:$0xff] }
 0x117   :  { %18933 = vst [vmem:[#allocation67_spill] sm:$0xff] %v16363_v19  ;;  %13264 = vmatmul.mubr.msk.bf16.vlgmr.msra.gmra.mrb[28].mxu0 %vm324_vm2, %v368_v18  ;;  %v16392_v3 = vld [vmem:[#allocation2 + $0x18] sm:$0xff]  ;;  %18935 = vst [vmem:[#allocation69_spill] sm:$0xff] %v16394_v23  ;;  %v16401_v18 = vld [vmem:[#allocation2 + $0x30] sm:$0xff] }
 0x118   :  { %13280 = vmatpush3.bf16.msra.mxu0 %v16067_v12  ;;  %13267 = vmatprep.mubr.msk.bf16.mxu0 %vm324_vm2, %v369_v21  ;;  %18934 = vst [vmem:[#allocation68_spill] sm:$0xff] %v16392_v3  ;;  %v16396_v12 = vld [vmem:[#allocation2 + $0x38] sm:$0xff]  ;;  %18937 = vst [vmem:[#allocation71_spill] sm:$0xff] %v16401_v18  ;;  %v16409_v19 = vld [vmem:[#allocation2 + $0x80] sm:$0xff] }
 0x119   :  { %13344 = vmatmul.mubr.msk.bf16.vlgmr.msra.gmra.mrb[12].mxu1 %vm324_vm2, %v1225_v8  ;;  %13281 = vmatprep.subr.bf16.mxu0 %v15648_v38  ;;  %v16399_v8 = vld [vmem:[#allocation2 + $0x28] sm:$0xff]  ;;  %v16407_v21 = vld [vmem:[#allocation2 + $0x3d] sm:$0xff]  ;;  %18939 = vst [vmem:[#allocation73_spill] sm:$0xff] %v16409_v19  ;;  %18940 = vst [vmem:[#allocation74_spill] sm:$0xff] %v16411_v22 }
 0x11a   :  { %13347 = vmatprep.mubr.msk.bf16.mxu1 %vm324_vm2, %v1226_v39  ;;  %13360 = vmatpush3.bf16.msra.mxu1 %v16160_v42  ;;  %18936 = vst [vmem:[#allocation70_spill] sm:$0xff] %v16399_v8  ;;  %v16405_v39 = vpack.c.bf16 %v16394_v23, %v16392_v3  ;;  %v16415_v63 = vpack.c.bf16 %v16401_v18, %v16399_v8  ;;  %v1216_v42 = vld [vmem:[#allocation2 + $0x6d] sm:$0xff]  ;;  %v16419_v41 = vld [vmem:[#allocation2 + $0x98] sm:$0xff] }
 0x11b   :  { %13361 = vmatprep.subr.bf16.mxu1 %v15650_v61  ;;  %v16417_v2 = vld [vmem:[#allocation2 + $0x90] sm:$0xff]  ;;  %18943 = vst [vmem:[#allocation77_spill] sm:$0xff] %v16419_v41  ;;  %v370_v23 = vpack.c.bf16 %v16396_v12, %v16092_v24  ;;  %v359_v3 = vld [vmem:[#allocation2 + $0x68] sm:$0xff]  ;;  %v16428_v47 = vld [vmem:[#allocation2 + $0x19] sm:$0xff]  ;;  %v1228_v8 = vpack.c.bf16 %v16205_v0, %v1216_v42 }
 0x11c   :  { %18938 = vst [vmem:[#allocation72_spill] sm:$0xff] %v16405_v39  ;;  %18941 = vst [vmem:[#allocation75_spill] sm:$0xff] %v16415_v63  ;;  %13282 = vmatpush3.bf16.msra.mxu0 %v15648_v38  ;;  %v16423_v39 = vpack.c.bf16 %v16411_v22, %v16409_v19  ;;  %v16432_v63 = vpack.c.bf16 %v16419_v41, %v16417_v2  ;;  %v1227_v38 = vpack.c.bf16 %v16407_v21, %v16096_v26  ;;  %v16437_v22 = vld [vmem:[#allocation2 + $0x21] sm:$0xff]  ;;  %v16441_v19 = vld [vmem:[#allocation2 + $0x31] sm:$0xff] }
 0x11d   :  { %18942 = vst [vmem:[#allocation76_spill] sm:$0xff] %v16417_v2  ;;  %13299 = vmatprep.subr.bf16.mxu0 %v16383_v48  ;;  %18945 = vst [vmem:[#allocation79_spill] sm:$0xff] %v16428_v47  ;;  %v371_v18 = vpack.c.bf16 %v16200_v54, %v359_v3  ;;  %v16458_v3 = vld [vmem:[#allocation2 + $0x89] sm:$0xff]  ;;  %v16461_v0 = vld [vmem:[#allocation2 + $0x91] sm:$0xff] }
 0x11e   :  { %18944 = vst [vmem:[#allocation78_spill] sm:$0xff] %v16423_v39  ;;  %18946 = vst [vmem:[#allocation80_spill] sm:$0xff] %v16432_v63  ;;  %13362 = vmatpush3.bf16.msra.mxu1 %v15650_v61  ;;  %v16439_v39 = vld [vmem:[#allocation2 + $0x29] sm:$0xff]  ;;  %v16448_v63 = vpack.c.bf16 %v16437_v22, %v16428_v47  ;;  %v16456_v61 = vld [vmem:[#allocation2 + $0x81] sm:$0xff] }
 0x11f   :  { %18947 = vst [vmem:[#allocation81_spill] sm:$0xff] %v16437_v22  ;;  %18948 = vst [vmem:[#allocation82_spill] sm:$0xff] %v16439_v39  ;;  %13268 = vmatmul.mubr.msk.bf16.gmra.mrb[32].mxu0 %vm324_vm2, %v370_v23  ;;  %13379 = vmatprep.subr.bf16.mxu1 %v16390_v1  ;;  %v16452_v26 = vpack.c.bf16 %v16441_v19, %v16439_v39  ;;  %v16463_v23 = vld [vmem:[#allocation2 + $0x99] sm:$0xff]  ;;  %v16467_v42 = vpack.c.bf16 %v16458_v3, %v16456_v61  ;;  %v16485_v39 = vld [vmem:[#allocation2 + $0x82] sm:$0xff] }
 0x120   :  { %18949 = vst [vmem:[#allocation83_spill] sm:$0xff] %v16441_v19  ;;  %18950 = vst [vmem:[#allocation84_spill] sm:$0xff] %v16448_v63  ;;  %13271 = vmatprep.mubr.msk.bf16.mxu0 %vm324_vm2, %v371_v18  ;;  %v16469_v63 = vld [vmem:[#allocation2 + $0x1a] sm:$0xff]  ;;  %v16475_v18 = vpack.c.bf16 %v16463_v23, %v16461_v0  ;;  %v16479_v19 = vld [vmem:[#allocation2 + $0x32] sm:$0xff] }
 0x121   :  { %18951 = vst [vmem:[#allocation85_spill] sm:$0xff] %v16452_v26  ;;  %13348 = vmatmul.mubr.msk.bf16.gmra.mrb[0].mxu1 %vm324_vm2, %v1227_v38  ;;  %18952 = vst [vmem:[#allocation86_spill] sm:$0xff] %v16456_v61  ;;  %v16471_v26 = vld [vmem:[#allocation2 + $0x22] sm:$0xff]  ;;  %v16477_v38 = vld [vmem:[#allocation2 + $0x2a] sm:$0xff] }
 0x122   :  { %18953 = vst [vmem:[#allocation87_spill] sm:$0xff] %v16458_v3  ;;  %13351 = vmatprep.mubr.msk.bf16.mxu1 %vm324_vm2, %v1228_v8  ;;  %18954 = vst [vmem:[#allocation88_spill] sm:$0xff] %v16461_v0  ;;  %v16483_v8 = vpack.c.bf16 %v16471_v26, %v16469_v63  ;;  %v372_v3 = vpack.c.bf16 %v16218_v31, %v16189_v17  ;;  %v16493_v61 = vld [vmem:[#allocation2 + $0x8a] sm:$0xff]  ;;  %v1229_v0 = vpack.c.bf16 %v16239_v55, %v16220_v50  ;;  %v3704_v55 = vld [vmem:[#allocation2 + $0x33] sm:$0xff] }
 0x123   :  { %18955 = vst [vmem:[#allocation89_spill] sm:$0xff] %v16463_v23  ;;  %18956 = vst [vmem:[#allocation90_spill] sm:$0xff] %v16467_v42  ;;  %v16489_v42 = vpack.c.bf16 %v16479_v19, %v16477_v38  ;;  %v16497_v23 = vld [vmem:[#allocation2 + $0x9a] sm:$0xff]  ;;  %v3703_v50 = vld [vmem:[#allocation2 + $0x2b] sm:$0xff] }
 0x124   :  { %18957 = vst [vmem:[#allocation91_spill] sm:$0xff] %v16469_v63  ;;  %18958 = vst [vmem:[#allocation92_spill] sm:$0xff] %v16471_v26  ;;  %v16505_v26 = vpack.c.bf16 %v16493_v61, %v16485_v39  ;;  %v3702_v63 = vld [vmem:[#allocation2 + $0x23] sm:$0xff]  ;;  %v3714_v47 = vld [vmem:[#allocation2 + $0xab] sm:$0xff] }
 0x125   :  { %18959 = vst [vmem:[#allocation93_spill] sm:$0xff] %v16475_v18  ;;  %18960 = vst [vmem:[#allocation94_spill] sm:$0xff] %v16477_v38  ;;  %v16495_v18 = vld [vmem:[#allocation2 + $0x92] sm:$0xff]  ;;  %v16514_v38 = vld [vmem:[#allocation2 + $0x1b] sm:$0xff] }
 0x126   :  { %18961 = vst [vmem:[#allocation95_spill] sm:$0xff] %v16479_v19  ;;  %18962 = vst [vmem:[#allocation96_spill] sm:$0xff] %v16483_v8  ;;  %v373_v8 = vpack.c.bf16 %v16262_v58, %v16207_v10  ;;  %v1230_v19 = vpack.c.bf16 %v16303_v9, %v16264_v16  ;;  %v16526_v16 = vpack.c.bf16 %v3704_v55, %v3703_v50  ;;  %v3713_v22 = vld [vmem:[#allocation2 + $0xa3] sm:$0xff] }
 0x127   :  { %18963 = vst [vmem:[#allocation97_spill] sm:$0xff] %v16485_v39  ;;  %18964 = vst [vmem:[#allocation98_spill] sm:$0xff] %v16489_v42  ;;  %v16509_v42 = vpack.c.bf16 %v16497_v23, %v16495_v18  ;;  %13272 = vmatmul.mubr.msk.bf16.gmra.mrb[36].mxu0 %vm324_vm2, %v372_v3  ;;  %v16519_v39 = vpack.c.bf16 %v3702_v63, %v16514_v38  ;;  %v16522_v3 = vld [vmem:[#allocation2 + $0xa0] sm:$0xff] }
 0x128   :  { %18965 = vst [vmem:[#allocation99_spill] sm:$0xff] %v16493_v61  ;;  %18966 = vst [vmem:[#allocation100_spill] sm:$0xff] %v16495_v18  ;;  %13275 = vmatprep.mubr.msk.bf16.mxu0 %vm324_vm2, %v373_v8  ;;  %v3705_v61 = vld [vmem:[#allocation2 + $0x3b] sm:$0xff]  ;;  %v3711_v18 = vld [vmem:[#allocation2 + $0x93] sm:$0xff] }
 0x129   :  { %18967 = vst [vmem:[#allocation101_spill] sm:$0xff] %v16497_v23  ;;  %18968 = vst [vmem:[#allocation102_spill] sm:$0xff] %v16505_v26  ;;  %13352 = vmatmul.mubr.msk.bf16.gmra.mrb[4].mxu1 %vm324_vm2, %v1229_v0  ;;  %v3706_v26 = vld [vmem:[#allocation2 + $0x43] sm:$0xff]  ;;  %v3710_v0 = vld [vmem:[#allocation2 + $0x8b] sm:$0xff] }
 0x12a   :  { %18969 = vst [vmem:[#allocation103_spill] sm:$0xff] %v16509_v42  ;;  %18970 = vst [vmem:[#allocation104_spill] sm:$0xff] %v16514_v38  ;;  %13355 = vmatprep.mubr.msk.bf16.mxu1 %vm324_vm2, %v1230_v19  ;;  %v16524_v42 = vld [vmem:[#allocation2 + $0xa5] sm:$0xff]  ;;  %v16528_v9 = vpack.c.bf16 %v3706_v26, %v3705_v61  ;;  %v3712_v8 = vld [vmem:[#allocation2 + $0x9b] sm:$0xff]  ;;  %v374_v19 = vpack.c.bf16 %v16522_v3, %v16241_v59 }
 0x12b   :  { %18971 = vst [vmem:[#allocation105_spill] sm:$0xff] %v16519_v39  ;;  %18972 = vst [vmem:[#allocation106_spill] sm:$0xff] %v16526_v16  ;;  %v3709_v23 = vld [vmem:[#allocation2 + $0x83] sm:$0xff]  ;;  %v16532_v63 = vpack.c.bf16 %v3712_v8, %v3711_v18  ;;  %v16534_v39 = vpack.c.bf16 %v3714_v47, %v3713_v22  ;;  %v1231_v26 = vpack.c.bf16 %v16524_v42, %v16305_v62  ;;  %v3889_v16 = vld [vmem:[#allocation2 + $0x94] sm:$0xff] }
 0x12c   :  { %18973 = vst [vmem:[#allocation107_spill] sm:$0xff] %v16528_v9  ;;  %v16530_v41 = vpack.c.bf16 %v3710_v0, %v3709_v23  ;;  %v674_v38 = vld [vmem:[#allocation2 + $0x2] sm:$0xff]  ;;  %v3888_v9 = vld [vmem:[#allocation2 + $0x8c] sm:$0xff]  ;;  %v1403_v62 = vpack.c.bf16 %v16053_v6, %v16013_v53  ;;  %v1404_v18 = vpack.c.bf16 %v16100_v28, %v16069_v13 }
 0x12d   :  { %v1386_v50 = vld [vmem:[#allocation2 + $0x6] sm:$0xff]  ;;  %v690_v61 = vpack.c.bf16 %v16005_v49, %v674_v38  ;;  %v3890_v2 = vld [vmem:[#allocation2 + $0x9c] sm:$0xff]  ;;  %v691_v49 = vpack.c.bf16 %v16051_v5, %v16011_v52  ;;  %v15655_v6 = vld [vmem:[%s18720_s2 + $0x80] sm:$0xff]  }
 0x12e   :  { %v3887_v55 = vld [vmem:[#allocation2 + $0x84] sm:$0xff]  ;;  %v1402_v23 = vpack.c.bf16 %v16009_v51, %v1386_v50  ;;  %v16545_v22 = vpack.c.bf16 %v3890_v2, %v3889_v16  ;;  %v692_v2 = vpack.c.bf16 %v16098_v27, %v16055_v7  ;;  %v16569_v52 = vld [vmem:[#allocation2 + $0x3a] sm:$0xff]  ;;  %v1394_v7 = vld [vmem:[#allocation2 + $0x6e] sm:$0xff] }
 0x12f   :  { %13276 = vmatmul.mubr.msk.bf16.gmra.mrb[40].mxu0 %vm324_vm2, %v374_v19  ;;  %v16543_v47 = vpack.c.bf16 %v3888_v9, %v3887_v55  ;;  %v15652_v51 = vld [vmem:[%s18720_s2 + $0x38] sm:$0xff]   ;;  %v16572_v53 = vld [vmem:[#allocation2 + $0x3e] sm:$0xff]  ;;  %v693_v13 = vpack.c.bf16 %v16569_v52, %v16106_v34  ;;  %v695_v34 = vpack.c.bf16 %v16270_v43, %v16230_v14 }
 0x130   :  { %13283 = vmatprep.mubr.msk.bf16.mxu0 %vm324_vm2, %v690_v61  ;;  %v15654_v38 = vld [vmem:[%s18720_s2 + $0x78] sm:$0xff]   ;;  %v1405_v27 = vpack.c.bf16 %v16572_v53, %v16108_v35  ;;  %v1407_v35 = vpack.c.bf16 %v16281_v60, %v16243_v56  ;;  %v16616_v16 = vld [vmem:[#allocation2 + $0x1b] sm:$0xff] }
 0x131   :  { %13356 = vmatmul.mubr.msk.bf16.gmra.mrb[8].mxu1 %vm324_vm2, %v1231_v26  ;;  %v682_v5 = vld [vmem:[#allocation2 + $0x6a] sm:$0xff]  ;;  %v18974_v0 = vld [vmem:[#allocation28_spill] sm:$0xff]  ;;  %v18976_v55 = vld [vmem:[#allocation31_spill] sm:$0xff] }
 0x132   :  { %13363 = vmatprep.mubr.msk.bf16.mxu1 %vm324_vm2, %v1402_v23  ;;  %v694_v28 = vpack.c.bf16 %v16226_v25, %v682_v5  ;;  %v696_v25 = vpack.c.bf16 %v16314_v11, %v16272_v44  ;;  %v16602_v43 = vld [vmem:[#allocation2 + $0xa6] sm:$0xff]  ;;  %v15656_v23 = vld [vmem:[%s18720_s2 + $0x88] sm:$0xff]  }
 0x133   :  { %v16604_v14 = vld [vmem:[#allocation2 + $0xb] sm:$0xff]  ;;  %v852_v11 = vld [vmem:[#allocation2 + $0x3] sm:$0xff]  ;;  %v1409_v60 = vpack.c.bf16 %v16602_v43, %v16326_v37  ;;  %v858_v5 = vld [vmem:[#allocation2 + $0x33] sm:$0xff] }
 0x134   :  { %v1564_v56 = vld [vmem:[#allocation2 + $0x7] sm:$0xff] }
 0x135   :  { %v16620_v9 = vld [vmem:[#allocation2 + $0x2b] sm:$0xff]  ;;  %v16626_v50 = vld [vmem:[#allocation2 + $0x23] sm:$0xff] }
 0x136   :  { %v18975_v8 = vld [vmem:[#allocation29_spill] sm:$0xff]  ;;  %v18977_v26 = vld [vmem:[#allocation32_spill] sm:$0xff] }
 0x137   :  { %13284 = vmatmul.mubr.msk.bf16.vlgmr.msra.gmra.mrb[28].mxu0 %vm324_vm2, %v691_v49  ;;  %v1581_v19 = vpack.c.bf16 %v18975_v8, %v18974_v0  ;;  %v1582_v61 = vpack.c.bf16 %v18977_v26, %v18976_v55  ;;  %v15657_v49 = vld [vmem:[%s18720_s2 + $0x280] sm:$0xff]   ;;  %v1030_v0 = vld [vmem:[#allocation2 + $0x4] sm:$0xff] }
 0x138   :  { %13300 = vmatpush3.bf16.msra.mxu0 %v16383_v48  ;;  %13287 = vmatprep.mubr.msk.bf16.mxu0 %vm324_vm2, %v692_v2  ;;  %v1406_v48 = vpack.c.bf16 %v16228_v46, %v1394_v7  ;;  %v1408_v46 = vpack.c.bf16 %v16324_v30, %v16283_v4  ;;  %v868_v30 = vpack.c.bf16 %v16604_v14, %v852_v11  ;;  %v18978_v2 = vld [vmem:[#allocation6_spill] sm:$0xff]  ;;  %v18984_v55 = vld [vmem:[#allocation37_spill] sm:$0xff] }
 0x139   :  { %13364 = vmatmul.mubr.msk.bf16.vlgmr.msra.gmra.mrb[12].mxu1 %vm324_vm2, %v1403_v62  ;;  %13301 = vmatprep.subr.bf16.mxu0 %v15652_v51  ;;  %v1580_v4 = vpack.c.bf16 %v16110_v36, %v1564_v56  ;;  %v870_v36 = vpack.c.bf16 %v16620_v9, %v16626_v50  ;;  %v16643_v62 = vld [vmem:[#allocation2 + $0x3b] sm:$0xff]  ;;  %v1572_v7 = vld [vmem:[#allocation2 + $0x6f] sm:$0xff]  ;;  %v1585_v11 = vpack.c.bf16 %v16343_v20, %v16341_v45  ;;  %v867_v56 = vld [vmem:[#allocation2 + $0xa3] sm:$0xff] }
 0x13a   :  { %13367 = vmatprep.mubr.msk.bf16.mxu1 %vm324_vm2, %v1404_v18  ;;  %13380 = vmatpush3.bf16.msra.mxu1 %v16390_v1  ;;  %v16600_v1 = vld [vmem:[#allocation2 + $0xa2] sm:$0xff]  ;;  %v860_v18 = vld [vmem:[#allocation2 + $0x6b] sm:$0xff]  ;;  %v18980_v20 = vld [vmem:[#allocation35_spill] sm:$0xff] }
 0x13b   :  { %13381 = vmatprep.subr.bf16.mxu1 %v15654_v38  ;;  %v697_v44 = vpack.c.bf16 %v16600_v1, %v16316_v33  ;;  %v16618_v33 = vld [vmem:[#allocation2 + $0x13] sm:$0xff]  ;;  %v1046_v8 = vpack.c.bf16 %v18980_v20, %v1030_v0  ;;  %v19003_v0 = vld [vmem:[#allocation25_spill] sm:$0xff] }
 0x13c   :  { %13302 = vmatpush3.bf16.msra.mxu0 %v15652_v51  ;;  %v869_v37 = vpack.c.bf16 %v16616_v16, %v16618_v33  ;;  %v16645_v51 = vld [vmem:[#allocation2 + $0x3f] sm:$0xff]  ;;  %v15664_v20 = vld [vmem:[%s18720_s2 + $0x298] sm:$0xff]  }
 0x13d   :  { %13319 = vmatprep.subr.bf16.mxu0 %v15961_v29 }
 0x13e   :  { %13382 = vmatpush3.bf16.msra.mxu1 %v15654_v38  ;;  %v16648_v38 = vld [vmem:[#allocation2 + $0x73] sm:$0xff] }
 0x13f   :  { %13288 = vmatmul.mubr.msk.bf16.gmra.mrb[32].mxu0 %vm324_vm2, %v693_v13  ;;  %13399 = vmatprep.subr.bf16.mxu1 %v15655_v6  ;;  %v871_v13 = vpack.c.bf16 %v16643_v62, %v858_v5 }
 0x140   :  { %13291 = vmatprep.mubr.msk.bf16.mxu0 %vm324_vm2, %v694_v28 }
 0x141   :  { %13368 = vmatmul.mubr.msk.bf16.gmra.mrb[0].mxu1 %vm324_vm2, %v1405_v27  ;;  %v18979_v27 = vld [vmem:[#allocation33_spill] sm:$0xff] }
 0x142   :  { %13371 = vmatprep.mubr.msk.bf16.mxu1 %vm324_vm2, %v1406_v48  ;;  %v1583_v28 = vpack.c.bf16 %v16645_v51, %v18979_v27  ;;  %v1584_v48 = vpack.c.bf16 %v16339_v15, %v1572_v7 }
 0x147   :  { %13292 = vmatmul.mubr.msk.bf16.gmra.mrb[36].mxu0 %vm324_vm2, %v695_v34  ;;  %v862_v34 = vld [vmem:[#allocation2 + $0x7b] sm:$0xff] }
 0x148   :  { %13295 = vmatprep.mubr.msk.bf16.mxu0 %vm324_vm2, %v696_v25  ;;  %v864_v25 = vld [vmem:[#allocation2 + $0x8b] sm:$0xff] }
 0x149   :  { %13372 = vmatmul.mubr.msk.bf16.gmra.mrb[4].mxu1 %vm324_vm2, %v1407_v35  ;;  %v16663_v35 = vld [vmem:[#allocation2 + $0x83] sm:$0xff] }
 0x14a   :  { %13375 = vmatprep.mubr.msk.bf16.mxu1 %vm324_vm2, %v1408_v46  ;;  %v16665_v46 = vld [vmem:[#allocation2 + $0x93] sm:$0xff] }
 0x14b   :  { %v874_v15 = vpack.c.bf16 %v16665_v46, %v864_v25 }
 0x14f   :  { %13296 = vmatmul.mubr.msk.bf16.gmra.mrb[40].mxu0 %vm324_vm2, %v697_v44  ;;  %v873_v44 = vpack.c.bf16 %v16663_v35, %v862_v34 }
 0x150   :  { %13303 = vmatprep.mubr.msk.bf16.mxu0 %vm324_vm2, %v868_v30  ;;  %v866_v30 = vld [vmem:[#allocation2 + $0x9b] sm:$0xff] }
 0x151   :  { %13376 = vmatmul.mubr.msk.bf16.gmra.mrb[8].mxu1 %vm324_vm2, %v1409_v60  ;;  %v1586_v60 = vpack.c.bf16 %v16355_v40, %v16345_v57  ;;  %v18981_v57 = vld [vmem:[#allocation10_spill] sm:$0xff]  ;;  %v18982_v40 = vld [vmem:[#allocation7_spill] sm:$0xff] }
 0x152   :  { %13383 = vmatprep.mubr.msk.bf16.mxu1 %vm324_vm2, %v1580_v4  ;;  %v16677_v4 = vld [vmem:[#allocation2 + $0xa7] sm:$0xff] }
 0x153   :  { %v1587_v45 = vpack.c.bf16 %v16677_v4, %v16357_v32  ;;  %v15658_v32 = vld [vmem:[%s18720_s2 + $0x288] sm:$0xff]  }
 0x157   :  { %13304 = vmatmul.mubr.msk.bf16.vlgmr.msra.gmra.mrb[28].mxu0 %vm324_vm2, %v869_v37  ;;  %v875_v37 = vpack.c.bf16 %v867_v56, %v866_v30 }
 0x158   :  { %13320 = vmatpush3.bf16.msra.mxu0 %v15961_v29  ;;  %13307 = vmatprep.mubr.msk.bf16.mxu0 %vm324_vm2, %v870_v36  ;;  %v15661_v29 = vld [vmem:[%s18720_s2 + $0x90] sm:$0xff]  }
 0x159   :  { %13384 = vmatmul.mubr.msk.bf16.vlgmr.msra.gmra.mrb[12].mxu1 %vm324_vm2, %v1581_v19  ;;  %13321 = vmatprep.subr.bf16.mxu0 %v18978_v2  ;;  %v18983_v19 = vpack.c.bf16 %v18981_v57, %v18982_v40  ;;  %v16689_v36 = vld [vmem:[#allocation2 + $0x1c] sm:$0xff]  ;;  %v19005_v57 = vld [vmem:[#allocation46_spill] sm:$0xff]  ;;  %v19006_v40 = vld [vmem:[#allocation45_spill] sm:$0xff] }
 0x15a   :  { %13387 = vmatprep.mubr.msk.bf16.mxu1 %vm324_vm2, %v1582_v61  ;;  %13400 = vmatpush3.bf16.msra.mxu1 %v15655_v6  ;;  %v872_v6 = vpack.c.bf16 %v16648_v38, %v860_v18  ;;  %v1047_v26 = vpack.c.bf16 %v16689_v36, %v18984_v55  ;;  %v16699_v61 = vpack.c.bf16 %v16618_v33, %v16604_v14  ;;  %v18986_v18 = vld [vmem:[#allocation16_spill] sm:$0xff]  ;;  %v19008_v55 = vld [vmem:[#allocation26_spill] sm:$0xff] }
 0x15b   :  { %13401 = vmatprep.subr.bf16.mxu1 %v15656_v23  ;;  %v15659_v14 = vld [vmem:[%s18720_s2 + $0x270] sm:$0xff]  }
 0x15c   :  { %13322 = vmatpush3.bf16.msra.mxu0 %v18978_v2  ;;  %v18985_v2 = vld [vmem:[#allocation17_spill] sm:$0xff]  ;;  %v16717_v33 = vld [vmem:[#allocation2 + $0x40] sm:$0xff] }
 0x15d   :  { %14019 = vmatprep.subr.bf16.mxu0 %v15657_v49  ;;  %v18987_v7 = vpack.c.bf16 %v18985_v2, %v18986_v18  ;;  %v19009_v2 = vld [vmem:[#allocation51_spill] sm:$0xff] }
 0x15e   :  { %13402 = vmatpush3.bf16.msra.mxu1 %v15656_v23  ;;  %v15662_v23 = vld [vmem:[%s18720_s2 + $0x98] sm:$0xff]   ;;  %v19010_v18 = vld [vmem:[#allocation47_spill] sm:$0xff] }
 0x15f   :  { %13308 = vmatmul.mubr.msk.bf16.gmra.mrb[32].mxu0 %vm324_vm2, %v871_v13  ;;  %13419 = vmatprep.subr.bf16.mxu1 %v15661_v29  ;;  %v18988_v13 = vld [vmem:[#allocation23_spill] sm:$0xff] }
 0x160   :  { %13311 = vmatprep.mubr.msk.bf16.mxu0 %vm324_vm2, %v872_v6  ;;  %v18989_v27 = vpack.c.bf16 %v16092_v24, %v18988_v13  ;;  %v16724_v24 = vpack.c.bf16 %v16626_v50, %v16616_v16  ;;  %v16734_v6 = vpack.c.bf16 %v858_v5, %v16620_v9  ;;  %v18990_v16 = vpack.c.bf16 %v16189_v17, %v16200_v54  ;;  %v2283_v50 = vld [vmem:[#allocation2 + $0x43] sm:$0xff]  ;;  %v19012_v13 = vld [vmem:[#allocation50_spill] sm:$0xff] }
 0x161   :  { %13388 = vmatmul.mubr.msk.bf16.gmra.mrb[0].mxu1 %vm324_vm2, %v1583_v28  ;;  %v1761_v28 = vpack.c.bf16 %v16717_v33, %v16396_v12  ;;  %v15663_v12 = vld [vmem:[%s18720_s2 + $0x290] sm:$0xff]   ;;  %v16747_v9 = vpack.c.bf16 %v2283_v50, %v16643_v62  ;;  %v16750_v5 = vpack.c.bf16 %v862_v34, %v16648_v38  ;;  %v18991_v54 = vpack.c.bf16 %v16207_v10, %v16218_v31  ;;  %v16764_v62 = vld [vmem:[#allocation2 + $0xa8] sm:$0xff] }
 0x162   :  { %13391 = vmatprep.mubr.msk.bf16.mxu1 %vm324_vm2, %v1584_v48  ;;  %v18992_v17 = vpack.c.bf16 %v16241_v59, %v16262_v58  ;;  %v16767_v38 = vpack.c.bf16 %v864_v25, %v16663_v35  ;;  %v1765_v48 = vpack.c.bf16 %v16764_v62, %v16522_v3  ;;  %v16772_v31 = vpack.c.bf16 %v866_v30, %v16665_v46  ;;  %v18993_v58 = vld [vmem:[#allocation9_spill] sm:$0xff]  ;;  %v18994_v10 = vld [vmem:[#allocation8_spill] sm:$0xff]  ;;  %v15666_v3 = vld [vmem:[%s18720_s2 + $0xa8] sm:$0xff]  }
 0x163   :  { %v18995_v59 = vpack.c.bf16 %v18993_v58, %v18994_v10  ;;  %v2291_v34 = vld [vmem:[#allocation2 + $0xab] sm:$0xff]  ;;  %v18996_v25 = vld [vmem:[#allocation15_spill] sm:$0xff] }
 0x164   :  { %v16783_v35 = vpack.c.bf16 %v2291_v34, %v867_v56  ;;  %v18997_v46 = vld [vmem:[#allocation14_spill] sm:$0xff]  ;;  %v15669_v56 = vld [vmem:[%s18720_s2 + $0xb0] sm:$0xff]   ;;  %v19020_v58 = vld [vmem:[#allocation39_spill] sm:$0xff] }
 0x165   :  { %v16848_v50 = vld [vmem:[#allocation2 + $0xaa] sm:$0xff]  ;;  %v2471_v10 = vpack.c.bf16 %v19020_v58, %v16689_v36  ;;  %v19021_v34 = vld [vmem:[#allocation40_spill] sm:$0xff] }
 0x166   :  { %v15671_v36 = vld [vmem:[%s18720_s2 + $0x2b0] sm:$0xff]  }
 0x167   :  { %13312 = vmatmul.mubr.msk.bf16.gmra.mrb[36].mxu0 %vm324_vm2, %v873_v44  ;;  %v18998_v44 = vpack.c.bf16 %v18996_v25, %v18997_v46  ;;  %v16880_v46 = vld [vmem:[#allocation2 + $0x44] sm:$0xff] }
 0x168   :  { %13315 = vmatprep.mubr.msk.bf16.mxu0 %vm324_vm2, %v874_v15  ;;  %v19000_v15 = vld [vmem:[#allocation21_spill] sm:$0xff] }
 0x169   :  { %13392 = vmatmul.mubr.msk.bf16.gmra.mrb[4].mxu1 %vm324_vm2, %v1585_v11  ;;  %v18999_v11 = vld [vmem:[#allocation12_spill] sm:$0xff] }
 0x16a   :  { %13395 = vmatprep.mubr.msk.bf16.mxu1 %vm324_vm2, %v1586_v60  ;;  %v19001_v60 = vld [vmem:[#allocation20_spill] sm:$0xff] }
 0x16b   :  { %v19002_v30 = vpack.c.bf16 %v19000_v15, %v19001_v60  ;;  %v19024_v15 = vld [vmem:[#allocation48_spill] sm:$0xff]  ;;  %v19025_v60 = vld [vmem:[#allocation54_spill] sm:$0xff] }
 0x16c   :  { %v17030_v58 = vld [vmem:[#allocation2 + $0x47] sm:$0xff] }
 0x16f   :  { %13316 = vmatmul.mubr.msk.bf16.gmra.mrb[40].mxu0 %vm324_vm2, %v875_v37  ;;  %v16803_v37 = vld [vmem:[#allocation2 + $0x41] sm:$0xff] }
 0x170   :  { %13323 = vmatprep.mubr.msk.bf16.mxu0 %vm324_vm2, %v1046_v8  ;;  %v19004_v8 = vld [vmem:[#allocation19_spill] sm:$0xff] }
 0x171   :  { %13396 = vmatmul.mubr.msk.bf16.gmra.mrb[8].mxu1 %vm324_vm2, %v1587_v45  ;;  %v1939_v45 = vpack.c.bf16 %v16803_v37, %v19003_v0  ;;  %v19027_v0 = vld [vmem:[#allocation60_spill] sm:$0xff] }
 0x172   :  { %13403 = vmatprep.mubr.msk.bf16.mxu1 %vm324_vm2, %v18983_v19  ;;  %v19007_v19 = vpack.c.bf16 %v19005_v57, %v19006_v40  ;;  %v15672_v57 = vld [vmem:[%s18720_s2 + $0x2b8] sm:$0xff]   ;;  %v19029_v40 = vld [vmem:[#allocation18_spill] sm:$0xff] }
 0x177   :  { %13324 = vmatmul.mubr.msk.bf16.vlgmr.msra.gmra.mrb[28].mxu0 %vm324_vm2, %v1047_v26  ;;  %v15667_v26 = vld [vmem:[%s18720_s2 + $0x2a0] sm:$0xff]  }
 0x178   :  { %14020 = vmatpush3.bf16.msra.mxu0 %v15657_v49  ;;  %14023 = vmatprep.mubr.msk.bf16.mxu0 %vm324_vm2, %v16699_v61  ;;  %v15665_v49 = vld [vmem:[%s18720_s2 + $0xa0] sm:$0xff]  }
 0x179   :  { %13404 = vmatmul.mubr.msk.bf16.vlgmr.msra.gmra.mrb[12].mxu1 %vm324_vm2, %v18987_v7  ;;  %14021 = vmatprep.subr.bf16.mxu0 %v15658_v32  ;;  %v19011_v7 = vpack.c.bf16 %v19009_v2, %v19010_v18  ;;  %v19035_v2 = vld [vmem:[#allocation22_spill] sm:$0xff]  ;;  %v19036_v18 = vld [vmem:[#allocation27_spill] sm:$0xff] }
 0x17a   :  { %13407 = vmatprep.mubr.msk.bf16.mxu1 %vm324_vm2, %v18989_v27  ;;  %13420 = vmatpush3.bf16.msra.mxu1 %v15661_v29  ;;  %v15660_v29 = vld [vmem:[%s18720_s2 + $0x278] sm:$0xff]  }
 0x17b   :  { %13421 = vmatprep.subr.bf16.mxu1 %v15662_v23  ;;  %v19013_v27 = vld [vmem:[#allocation57_spill] sm:$0xff] }
 0x17c   :  { %14022 = vmatpush3.bf16.msra.mxu0 %v15658_v32  ;;  %v16822_v32 = vld [vmem:[#allocation2 + $0x42] sm:$0xff] }
 0x17d   :  { %14039 = vmatprep.subr.bf16.mxu0 %v15659_v14 }
 0x17e   :  { %13422 = vmatpush3.bf16.msra.mxu1 %v15662_v23  ;;  %v2117_v23 = vpack.c.bf16 %v16822_v32, %v16569_v52 }
 0x17f   :  { %14024 = vmatmul.mubr.msk.bf16.vlgmr.msra.gmra.mrb[44].mxu0 %vm324_vm2, %v16724_v24  ;;  %13439 = vmatprep.subr.bf16.mxu1 %v15665_v49 }
 0x180   :  { %14040 = vmatpush3.bf16.msra.mxu0 %v15659_v14  ;;  %14027 = vmatprep.mubr.msk.bf16.mxu0 %vm324_vm2, %v16734_v6  ;;  %v19014_v14 = vld [vmem:[#allocation52_spill] sm:$0xff] }
 0x181   :  { %13408 = vmatmul.mubr.msk.bf16.gmra.mrb[0].mxu1 %vm324_vm2, %v1761_v28  ;;  %14041 = vmatprep.subr.bf16.mxu0 %v15660_v29  ;;  %v16837_v28 = vld [vmem:[#allocation2 + $0xa9] sm:$0xff] }
 0x182   :  { %13411 = vmatprep.mubr.msk.bf16.mxu1 %vm324_vm2, %v18990_v16  ;;  %v19017_v16 = vld [vmem:[#allocation56_spill] sm:$0xff] }
 0x184   :  { %14042 = vmatpush3.bf16.msra.mxu0 %v15660_v29  ;;  %v19016_v29 = vld [vmem:[#allocation58_spill] sm:$0xff] }
 0x185   :  { %14059 = vmatprep.subr.bf16.mxu0 %v15663_v12  ;;  %v1943_v52 = vpack.c.bf16 %v16837_v28, %v19016_v29  ;;  %v16997_v29 = vld [vmem:[#allocation2 + $0xae] sm:$0xff] }
 0x187   :  { %14028 = vmatmul.mubr.msk.bf16.gmra.mrb[48].mxu0 %vm324_vm2, %v16747_v9 }
 0x188   :  { %14031 = vmatprep.mubr.msk.bf16.mxu0 %vm324_vm2, %v16750_v5 }
 0x189   :  { %13412 = vmatmul.mubr.msk.bf16.gmra.mrb[4].mxu1 %vm324_vm2, %v18991_v54  ;;  %v2121_v54 = vpack.c.bf16 %v16848_v50, %v16600_v1  ;;  %v15673_v1 = vld [vmem:[%s18720_s2 + $0xc0] sm:$0xff]  }
 0x18a   :  { %13415 = vmatprep.mubr.msk.bf16.mxu1 %vm324_vm2, %v18992_v17  ;;  %v15670_v17 = vld [vmem:[%s18720_s2 + $0xb8] sm:$0xff]  }
 0x18f   :  { %14032 = vmatmul.mubr.msk.bf16.gmra.mrb[52].mxu0 %vm324_vm2, %v16767_v38 }
 0x190   :  { %14035 = vmatprep.mubr.msk.bf16.mxu0 %vm324_vm2, %v16772_v31 }
 0x191   :  { %13416 = vmatmul.mubr.msk.bf16.gmra.mrb[8].mxu1 %vm324_vm2, %v1765_v48  ;;  %v19019_v48 = vld [vmem:[#allocation38_spill] sm:$0xff] }
 0x192   :  { %13423 = vmatprep.mubr.msk.bf16.mxu1 %vm324_vm2, %v18995_v59  ;;  %v15668_v59 = vld [vmem:[%s18720_s2 + $0x2a8] sm:$0xff]  }
 0x197   :  { %14036 = vmatmul.mubr.msk.bf16.gmra.mrb[56].mxu0 %vm324_vm2, %v16783_v35 }
 0x198   :  { %14043 = vmatprep.mubr.msk.bf16.mxu0 %vm324_vm2, %v18999_v11 }
 0x199   :  { %13424 = vmatmul.mubr.msk.bf16.vlgmr.msra.gmra.mrb[12].mxu1 %vm324_vm2, %v18998_v44  ;;  %v19023_v44 = vld [vmem:[#allocation42_spill] sm:$0xff] }
 0x19a   :  { %13427 = vmatprep.mubr.msk.bf16.mxu1 %vm324_vm2, %v19002_v30  ;;  %13440 = vmatpush3.bf16.msra.mxu1 %v15665_v49  ;;  %v19015_v49 = vpack.c.bf16 %v19013_v27, %v19014_v14  ;;  %v19026_v30 = vld [vmem:[#allocation61_spill] sm:$0xff] }
 0x19b   :  { %13441 = vmatprep.subr.bf16.mxu1 %v15666_v3  ;;  %v19037_v14 = vld [vmem:[#allocation53_spill] sm:$0xff] }
 0x19e   :  { %13442 = vmatpush3.bf16.msra.mxu1 %v15666_v3  ;;  %v19022_v3 = vld [vmem:[#allocation41_spill] sm:$0xff] }
 0x19f   :  { %13459 = vmatprep.subr.bf16.mxu1 %v15669_v56  ;;  %14044 = vmatmul.mubr.msk.bf16.vlgmr.msra.gmra.mrb[44].mxu0 %vm324_vm2, %v19004_v8  ;;  %v2472_v25 = vpack.c.bf16 %v19022_v3, %v19021_v34  ;;  %v19045_v34 = vld [vmem:[#allocation66_spill] sm:$0xff] }
 0x1a0   :  { %14060 = vmatpush3.bf16.msra.mxu0 %v15663_v12  ;;  %14047 = vmatprep.mubr.msk.bf16.mxu0 %vm324_vm2, %v19008_v55  ;;  %v19018_v12 = vld [vmem:[#allocation63_spill] sm:$0xff] }
 0x1a1   :  { %13428 = vmatmul.mubr.msk.bf16.gmra.mrb[0].mxu1 %vm324_vm2, %v1939_v45  ;;  %14061 = vmatprep.subr.bf16.mxu0 %v15664_v20 }
 0x1a2   :  { %13431 = vmatprep.mubr.msk.bf16.mxu1 %vm324_vm2, %v19007_v19  ;;  %v16929_v19 = vld [vmem:[#allocation2 + $0x45] sm:$0xff] }
 0x1a4   :  { %14062 = vmatpush3.bf16.msra.mxu0 %v15664_v20  ;;  %v15674_v20 = vld [vmem:[%s18720_s2 + $0xc8] sm:$0xff]  }
 0x1a5   :  { %14079 = vmatprep.subr.bf16.mxu0 %v15667_v26 }
 0x1a7   :  { %14048 = vmatmul.mubr.msk.bf16.gmra.mrb[48].mxu0 %vm324_vm2, %v2117_v23 }
 0x1a8   :  { %14051 = vmatprep.mubr.msk.bf16.mxu0 %vm324_vm2, %v19012_v13 }
 0x1a9   :  { %13432 = vmatmul.mubr.msk.bf16.gmra.mrb[4].mxu1 %vm324_vm2, %v19011_v7  ;;  %v15679_v7 = vld [vmem:[%s18720_s2 + $0x2d0] sm:$0xff]  }
 0x1aa   :  { %13435 = vmatprep.mubr.msk.bf16.mxu1 %vm324_vm2, %v19015_v49  ;;  %v19038_v49 = vld [vmem:[#allocation59_spill] sm:$0xff] }
 0x1af   :  { %14052 = vmatmul.mubr.msk.bf16.gmra.mrb[52].mxu0 %vm324_vm2, %v19017_v16 }
 0x1b0   :  { %14055 = vmatprep.mubr.msk.bf16.mxu0 %vm324_vm2, %v19018_v12 }
 0x1b1   :  { %13436 = vmatmul.mubr.msk.bf16.gmra.mrb[8].mxu1 %vm324_vm2, %v1943_v52  ;;  %v17001_v52 = vpack.c.bf16 %v16997_v29, %v16602_v43  ;;  %v15685_v43 = vld [vmem:[%s18720_s2 + $0xf0] sm:$0xff]  }
 0x1b2   :  { %13443 = vmatprep.mubr.msk.bf16.mxu1 %vm324_vm2, %v18999_v11  ;;  %v2473_v11 = vpack.c.bf16 %v16880_v46, %v19023_v44  ;;  %v3166_v44 = vld [vmem:[#allocation2 + $0x10] sm:$0xff] }
 0x1b7   :  { %14056 = vmatmul.mubr.msk.bf16.gmra.mrb[56].mxu0 %vm324_vm2, %v2121_v54 }
 0x1b8   :  { %14063 = vmatprep.mubr.msk.bf16.mxu0 %vm324_vm2, %v19019_v48 }
 0x1b9   :  { %13444 = vmatmul.mubr.msk.bf16.vlgmr.msra.gmra.mrb[12].mxu1 %vm324_vm2, %v19004_v8  ;;  %v19028_v8 = vld [vmem:[#allocation11_spill] sm:$0xff] }
 0x1ba   :  { %13447 = vmatprep.mubr.msk.bf16.mxu1 %vm324_vm2, %v19008_v55  ;;  %13460 = vmatpush3.bf16.msra.mxu1 %v15669_v56  ;;  %v16898_v56 = vld [vmem:[#allocation2 + $0xac] sm:$0xff]  ;;  %v2651_v55 = vpack.c.bf16 %v16929_v19, %v16407_v21 }
 0x1bb   :  { %13461 = vmatprep.subr.bf16.mxu1 %v15670_v17  ;;  %v2477_v45 = vpack.c.bf16 %v16898_v56, %v19027_v0  ;;  %v16948_v21 = vld [vmem:[#allocation2 + $0xad] sm:$0xff] }
 0x1be   :  { %13462 = vmatpush3.bf16.msra.mxu1 %v15670_v17  ;;  %v19041_v17 = vld [vmem:[#allocation34_spill] sm:$0xff] }
 0x1bf   :  { %13479 = vmatprep.subr.bf16.mxu1 %v15673_v1  ;;  %14064 = vmatmul.mubr.msk.bf16.vlgmr.msra.gmra.mrb[44].mxu0 %vm324_vm2, %v2471_v10 }
 0x1c0   :  { %14080 = vmatpush3.bf16.msra.mxu0 %v15667_v26  ;;  %14067 = vmatprep.mubr.msk.bf16.mxu0 %vm324_vm2, %v2472_v25  ;;  %v19033_v26 = vld [vmem:[#allocation62_spill] sm:$0xff] }
 0x1c1   :  { %13448 = vmatmul.mubr.msk.bf16.gmra.mrb[0].mxu1 %vm324_vm2, %v2117_v23  ;;  %14081 = vmatprep.subr.bf16.mxu0 %v15668_v59  ;;  %v15681_v23 = vld [vmem:[%s18720_s2 + $0xe0] sm:$0xff]  }
 0x1c2   :  { %13451 = vmatprep.mubr.msk.bf16.mxu1 %vm324_vm2, %v19012_v13  ;;  %v16976_v13 = vld [vmem:[#allocation2 + $0x46] sm:$0xff] }
 0x1c3   :  { %v16980_v27 = vpack.c.bf16 %v16976_v13, %v16572_v53  ;;  %v19039_v53 = vld [vmem:[#allocation64_spill] sm:$0xff] }
 0x1c4   :  { %14082 = vmatpush3.bf16.msra.mxu0 %v15668_v59  ;;  %v19044_v59 = vld [vmem:[#allocation65_spill] sm:$0xff] }
 0x1c5   :  { %14099 = vmatprep.subr.bf16.mxu0 %v15671_v36 }
 0x1c7   :  { %14068 = vmatmul.mubr.msk.bf16.gmra.mrb[48].mxu0 %vm324_vm2, %v2473_v11 }
 0x1c8   :  { %14071 = vmatprep.mubr.msk.bf16.mxu0 %vm324_vm2, %v19024_v15 }
 0x1c9   :  { %13452 = vmatmul.mubr.msk.bf16.gmra.mrb[4].mxu1 %vm324_vm2, %v19017_v16  ;;  %v15682_v16 = vld [vmem:[%s18720_s2 + $0xe8] sm:$0xff]  }
 0x1ca   :  { %13455 = vmatprep.mubr.msk.bf16.mxu1 %vm324_vm2, %v19018_v12  ;;  %v19040_v12 = vld [vmem:[#allocation30_spill] sm:$0xff] }
 0x1cf   :  { %14072 = vmatmul.mubr.msk.bf16.gmra.mrb[52].mxu0 %vm324_vm2, %v19025_v60 }
 0x1d0   :  { %14075 = vmatprep.mubr.msk.bf16.mxu0 %vm324_vm2, %v19026_v30 }
 0x1d1   :  { %13456 = vmatmul.mubr.msk.bf16.gmra.mrb[8].mxu1 %vm324_vm2, %v2121_v54  ;;  %v15680_v54 = vld [vmem:[%s18720_s2 + $0x2d8] sm:$0xff]  }
 0x1d2   :  { %13463 = vmatprep.mubr.msk.bf16.mxu1 %vm324_vm2, %v16699_v61  ;;  %v15677_v61 = vld [vmem:[%s18720_s2 + $0xd0] sm:$0xff]  }
 0x1d7   :  { %14076 = vmatmul.mubr.msk.bf16.gmra.mrb[56].mxu0 %vm324_vm2, %v2477_v45 }
 0x1d8   :  { %14083 = vmatprep.mubr.msk.bf16.mxu0 %vm324_vm2, %v19028_v8 }
 0x1d9   :  { %13464 = vmatmul.mubr.msk.bf16.vlgmr.msra.gmra.mrb[12].mxu1 %vm324_vm2, %v16724_v24  ;;  %v19030_v24 = vld [vmem:[#allocation24_spill] sm:$0xff] }
 0x1da   :  { %13467 = vmatprep.mubr.msk.bf16.mxu1 %vm324_vm2, %v16734_v6  ;;  %13480 = vmatpush3.bf16.msra.mxu1 %v15673_v1  ;;  %v15675_v6 = vld [vmem:[%s18720_s2 + $0x2c0] sm:$0xff]  }
 0x1db   :  { %13481 = vmatprep.subr.bf16.mxu1 %v15674_v20  ;;  %v15683_v1 = vld [vmem:[%s18720_s2 + $0x2e0] sm:$0xff]  }
 0x1de   :  { %13482 = vmatpush3.bf16.msra.mxu1 %v15674_v20  ;;  %v15689_v20 = vld [vmem:[%s18720_s2 + $0x100] sm:$0xff]  }
 0x1df   :  { %13499 = vmatprep.subr.bf16.mxu1 %v15677_v61  ;;  %14084 = vmatmul.mubr.msk.bf16.vlgmr.msra.gmra.mrb[44].mxu0 %vm324_vm2, %v19029_v40 }
 0x1e0   :  { %14100 = vmatpush3.bf16.msra.mxu0 %v15671_v36  ;;  %14087 = vmatprep.mubr.msk.bf16.mxu0 %vm324_vm2, %v19030_v24 }
 0x1e1   :  { %13468 = vmatmul.mubr.msk.bf16.gmra.mrb[0].mxu1 %vm324_vm2, %v16747_v9  ;;  %14101 = vmatprep.subr.bf16.mxu0 %v15672_v57  ;;  %v19031_v9 = vld [vmem:[#allocation49_spill] sm:$0xff] }
 0x1e2   :  { %13471 = vmatprep.mubr.msk.bf16.mxu1 %vm324_vm2, %v16750_v5  ;;  %v19032_v5 = vld [vmem:[#allocation55_spill] sm:$0xff] }
 0x1e4   :  { %14102 = vmatpush3.bf16.msra.mxu0 %v15672_v57  ;;  %v17088_v57 = vld [vmem:[#allocation2 + $0x38] sm:$0xff] }
 0x1e5   :  { %14119 = vmatprep.subr.bf16.mxu0 %v15675_v6 }
 0x1e7   :  { %14088 = vmatmul.mubr.msk.bf16.gmra.mrb[48].mxu0 %vm324_vm2, %v2651_v55 }
 0x1e8   :  { %14091 = vmatprep.mubr.msk.bf16.mxu0 %vm324_vm2, %v19031_v9 }
 0x1e9   :  { %13472 = vmatmul.mubr.msk.bf16.gmra.mrb[4].mxu1 %vm324_vm2, %v16767_v38  ;;  %v2655_v38 = vpack.c.bf16 %v16948_v21, %v16524_v42  ;;  %v15676_v42 = vld [vmem:[%s18720_s2 + $0x2c8] sm:$0xff]  }
 0x1ea   :  { %13475 = vmatprep.mubr.msk.bf16.mxu1 %vm324_vm2, %v16772_v31  ;;  %v15678_v31 = vld [vmem:[%s18720_s2 + $0xd8] sm:$0xff]  }
 0x1ef   :  { %14092 = vmatmul.mubr.msk.bf16.gmra.mrb[52].mxu0 %vm324_vm2, %v19032_v5 }
 0x1f0   :  { %14095 = vmatprep.mubr.msk.bf16.mxu0 %vm324_vm2, %v19033_v26 }
 0x1f1   :  { %13476 = vmatmul.mubr.msk.bf16.gmra.mrb[8].mxu1 %vm324_vm2, %v16783_v35  ;;  %v19034_v35 = vld [vmem:[#allocation13_spill] sm:$0xff] }
 0x1f2   :  { %13483 = vmatprep.mubr.msk.bf16.mxu1 %vm324_vm2, %v19019_v48  ;;  %v19042_v48 = vld [vmem:[#allocation36_spill] sm:$0xff] }
 0x1f7   :  { %14096 = vmatmul.mubr.msk.bf16.gmra.mrb[56].mxu0 %vm324_vm2, %v2655_v38 }
 0x1f8   :  { %14103 = vmatprep.mubr.msk.bf16.mxu0 %vm324_vm2, %v19034_v35 }
 0x1f9   :  { %13484 = vmatmul.mubr.msk.bf16.vlgmr.msra.gmra.mrb[12].mxu1 %vm324_vm2, %v2471_v10  ;;  %v17034_v10 = vpack.c.bf16 %v17030_v58, %v16645_v51  ;;  %v19046_v51 = vld [vmem:[#allocation67_spill] sm:$0xff] }
 0x1fa   :  { %13487 = vmatprep.mubr.msk.bf16.mxu1 %vm324_vm2, %v2472_v25  ;;  %13500 = vmatpush3.bf16.msra.mxu1 %v15677_v61  ;;  %v17053_v25 = vld [vmem:[#allocation2 + $0xaf] sm:$0xff] }
 0x1fb   :  { %13501 = vmatprep.subr.bf16.mxu1 %v15678_v31  ;;  %19043 = vst [vmem:[#allocation28_spill] sm:$0xff] %v17034_v10 }
 0x1fe   :  { %13502 = vmatpush3.bf16.msra.mxu1 %v15678_v31 }
 0x1ff   :  { %13519 = vmatprep.subr.bf16.mxu1 %v15681_v23  ;;  %14104 = vmatmul.mubr.msk.bf16.vlgmr.msra.gmra.mrb[44].mxu0 %vm324_vm2, %v19035_v2 }
 0x200   :  { %14120 = vmatpush3.bf16.msra.mxu0 %v15675_v6  ;;  %14107 = vmatprep.mubr.msk.bf16.mxu0 %vm324_vm2, %v19036_v18  ;;  %v19058_v6 = vld [vmem:[#allocation70_spill] sm:$0xff] }
 0x201   :  { %13488 = vmatmul.mubr.msk.bf16.gmra.mrb[0].mxu1 %vm324_vm2, %v2473_v11  ;;  %14121 = vmatprep.subr.bf16.mxu0 %v15676_v42 }
 0x202   :  { %13491 = vmatprep.mubr.msk.bf16.mxu1 %vm324_vm2, %v19024_v15 }
 0x204   :  { %14122 = vmatpush3.bf16.msra.mxu0 %v15676_v42 }
 0x205   :  { %14139 = vmatprep.subr.bf16.mxu0 %v15679_v7 }
 0x207   :  { %14108 = vmatmul.mubr.msk.bf16.gmra.mrb[48].mxu0 %vm324_vm2, %v16980_v27 }
 0x208   :  { %14111 = vmatprep.mubr.msk.bf16.mxu0 %vm324_vm2, %v19037_v14 }
 0x209   :  { %13492 = vmatmul.mubr.msk.bf16.gmra.mrb[4].mxu1 %vm324_vm2, %v19025_v60  ;;  %v17063_v60 = vpack.c.bf16 %v17053_v25, %v16677_v4 }
 0x20a   :  { %13495 = vmatprep.mubr.msk.bf16.mxu1 %vm324_vm2, %v19026_v30  ;;  %v19052_v30 = vld [vmem:[#allocation68_spill] sm:$0xff] }
 0x20b   :  { %19051 = vst [vmem:[#allocation33_spill] sm:$0xff] %v17063_v60  ;;  %v17066_v0 = vpack.c.bf16 %v19052_v30, %v3166_v44  ;;  %v19069_v44 = vld [vmem:[#allocation74_spill] sm:$0xff]  ;;  %v19070_v30 = vld [vmem:[#allocation76_spill] sm:$0xff] }
 0x20f   :  { %14112 = vmatmul.mubr.msk.bf16.gmra.mrb[52].mxu0 %vm324_vm2, %v19038_v49 }
 0x210   :  { %14115 = vmatprep.mubr.msk.bf16.mxu0 %vm324_vm2, %v19039_v53 }
 0x211   :  { %13496 = vmatmul.mubr.msk.bf16.gmra.mrb[8].mxu1 %vm324_vm2, %v2477_v45  ;;  %v15686_v45 = vld [vmem:[%s18720_s2 + $0xf8] sm:$0xff]  }
 0x212   :  { %13503 = vmatprep.mubr.msk.bf16.mxu1 %vm324_vm2, %v19028_v8 }
 0x217   :  { %14116 = vmatmul.mubr.msk.bf16.gmra.mrb[56].mxu0 %vm324_vm2, %v17001_v52 }
 0x218   :  { %14123 = vmatprep.mubr.msk.bf16.mxu0 %vm324_vm2, %v19040_v12 }
 0x219   :  { %13504 = vmatmul.mubr.msk.bf16.vlgmr.msra.gmra.mrb[12].mxu1 %vm324_vm2, %v19029_v40 }
 0x21a   :  { %13507 = vmatprep.mubr.msk.bf16.mxu1 %vm324_vm2, %v19030_v24  ;;  %13520 = vmatpush3.bf16.msra.mxu1 %v15681_v23  ;;  %v19057_v24 = vld [vmem:[#allocation69_spill] sm:$0xff] }
 0x21b   :  { %13521 = vmatprep.subr.bf16.mxu1 %v15682_v16 }
 0x21e   :  { %13522 = vmatpush3.bf16.msra.mxu1 %v15682_v16 }
 0x21f   :  { %13539 = vmatprep.subr.bf16.mxu1 %v15685_v43  ;;  %14124 = vmatmul.mubr.msk.bf16.vlgmr.msra.gmra.mrb[44].mxu0 %vm324_vm2, %v19041_v17 }
 0x220   :  { %14140 = vmatpush3.bf16.msra.mxu0 %v15679_v7  ;;  %14127 = vmatprep.mubr.msk.bf16.mxu0 %vm324_vm2, %v19042_v48  ;;  %v3174_v7 = vld [vmem:[#allocation2 + $0x78] sm:$0xff] }
 0x221   :  { %13508 = vmatmul.mubr.msk.bf16.gmra.mrb[0].mxu1 %vm324_vm2, %v2651_v55  ;;  %14141 = vmatprep.subr.bf16.mxu0 %v15680_v54  ;;  %v17094_v55 = vpack.c.bf16 %v19058_v6, %v19057_v24 }
 0x222   :  { %13511 = vmatprep.mubr.msk.bf16.mxu1 %vm324_vm2, %v19031_v9  ;;  %v15684_v9 = vld [vmem:[%s18720_s2 + $0x2e8] sm:$0xff]  }
 0x224   :  { %14142 = vmatpush3.bf16.msra.mxu0 %v15680_v54 }
 0x225   :  { %14159 = vmatprep.subr.bf16.mxu0 %v15683_v1 }
 0x227   :  { %14128 = vmatmul.mubr.msk.bf16.gmra.mrb[48].mxu0 %vm324_vm2, %v17034_v10 }
 0x228   :  { %14131 = vmatprep.mubr.msk.bf16.mxu0 %vm324_vm2, %v19044_v59 }
 0x229   :  { %13512 = vmatmul.mubr.msk.bf16.gmra.mrb[4].mxu1 %vm324_vm2, %v19032_v5  ;;  %v19059_v5 = vld [vmem:[#allocation71_spill] sm:$0xff] }
 0x22a   :  { %13515 = vmatprep.mubr.msk.bf16.mxu1 %vm324_vm2, %v19033_v26  ;;  %v17103_v26 = vpack.c.bf16 %v17088_v57, %v19059_v5  ;;  %v19072_v5 = vld [vmem:[#allocation79_spill] sm:$0xff] }
 0x22f   :  { %14132 = vmatmul.mubr.msk.bf16.gmra.mrb[52].mxu0 %vm324_vm2, %v19045_v34 }
 0x230   :  { %14135 = vmatprep.mubr.msk.bf16.mxu0 %vm324_vm2, %v19046_v51 }
 0x231   :  { %13516 = vmatmul.mubr.msk.bf16.gmra.mrb[8].mxu1 %vm324_vm2, %v2655_v38  ;;  %v15687_v38 = vld [vmem:[%s18720_s2 + $0x2f0] sm:$0xff]  }
 0x232   :  { %13523 = vmatprep.mubr.msk.bf16.mxu1 %vm324_vm2, %v19034_v35  ;;  %v17051_v3 = vpop.f32.mrb[32].mxu0  ;;  %v17116_v35 = vld [vmem:[#allocation2 + $0x48] sm:$0xff] }
 0x233   :  { %19047 = vst [vmem:[#allocation29_spill] sm:$0xff] %v17051_v3  ;;  %v17055_v36 = vpop.f32.mrb[33].mxu0  ;;  %v19099_v3 = vld [vmem:[#allocation100_spill] sm:$0xff] }
 0x234   :  { %19048 = vst [vmem:[#allocation31_spill] sm:$0xff] %v17055_v36  ;;  %v17057_v11 = vpop.f32.mrb[34].mxu0 }
 0x235   :  { %19049 = vst [vmem:[#allocation32_spill] sm:$0xff] %v17057_v11  ;;  %v17059_v15 = vpop.f32.mrb[35].mxu0 }
 0x236   :  { %19050 = vst [vmem:[#allocation6_spill] sm:$0xff] %v17059_v15  ;;  %v15692_v15 = vld [vmem:[%s18720_s2 + $0x308] sm:$0xff]  }
 0x237   :  { %14136 = vmatmul.mubr.msk.bf16.gmra.mrb[56].mxu0 %vm324_vm2, %v17063_v60 }
 0x238   :  { %14143 = vmatprep.mubr.msk.bf16.mxu0 %vm324_vm2, %v17066_v0 }
 0x239   :  { %13524 = vmatmul.mubr.msk.bf16.vlgmr.msra.gmra.mrb[12].mxu1 %vm324_vm2, %v19035_v2 }
 0x23a   :  { %13527 = vmatprep.mubr.msk.bf16.mxu1 %vm324_vm2, %v19036_v18  ;;  %13540 = vmatpush3.bf16.msra.mxu1 %v15685_v43  ;;  %v17079_v4 = vpop.f32.mrb[36].mxu0  ;;  %v17126_v18 = vpack.c.bf16 %v17116_v35, %v16717_v33  ;;  %v17143_v43 = vld [vmem:[#allocation2 + $0xa0] sm:$0xff] }
 0x23b   :  { %19053 = vst [vmem:[#allocation35_spill] sm:$0xff] %v17079_v4  ;;  %13541 = vmatprep.subr.bf16.mxu1 %v15686_v45  ;;  %v17084_v8 = vpop.f32.mrb[37].mxu0 }
 0x23c   :  { %19054 = vst [vmem:[#allocation10_spill] sm:$0xff] %v17084_v8  ;;  %v17086_v61 = vpop.f32.mrb[38].mxu0  ;;  %v19091_v8 = vld [vmem:[#allocation94_spill] sm:$0xff] }
 0x23d   :  { %19055 = vst [vmem:[#allocation7_spill] sm:$0xff] %v17086_v61  ;;  %v17090_v40 = vpop.f32.mrb[39].mxu0  ;;  %v15694_v61 = vld [vmem:[%s18720_s2 + $0x118] sm:$0xff]  }
 0x23e   :  { %19056 = vst [vmem:[#allocation37_spill] sm:$0xff] %v17090_v40  ;;  %13542 = vmatpush3.bf16.msra.mxu1 %v15686_v45  ;;  %v17151_v45 = vpack.c.bf16 %v19070_v30, %v19069_v44  ;;  %v19074_v44 = vld [vmem:[#allocation81_spill] sm:$0xff]  ;;  %v19075_v30 = vld [vmem:[#allocation82_spill] sm:$0xff] }
 0x23f   :  { %13559 = vmatprep.subr.bf16.mxu1 %v15689_v20  ;;  %14144 = vmatmul.mubr.msk.bf16.vlgmr.msra.gmra.mrb[44].mxu0 %vm324_vm2, %v17094_v55 }
 0x240   :  { %14160 = vmatpush3.bf16.msra.mxu0 %v15683_v1  ;;  %14147 = vmatprep.mubr.msk.bf16.mxu0 %vm324_vm2, %v17103_v26 }
 0x241   :  { %13528 = vmatmul.mubr.msk.bf16.gmra.mrb[0].mxu1 %vm324_vm2, %v16980_v27  ;;  %14161 = vmatprep.subr.bf16.mxu0 %v15684_v9  ;;  %v19064_v27 = vld [vmem:[#allocation73_spill] sm:$0xff] }
 0x242   :  { %13531 = vmatprep.mubr.msk.bf16.mxu1 %vm324_vm2, %v19037_v14  ;;  %v17114_v31 = vpop.f32.mrb[40].mxu0  ;;  %v17129_v14 = vpack.c.bf16 %v19064_v27, %v3174_v7  ;;  %v17188_v27 = vld [vmem:[#allocation2 + $0x39] sm:$0xff] }
 0x243   :  { %19060 = vst [vmem:[#allocation17_spill] sm:$0xff] %v17114_v31  ;;  %v17118_v23 = vpop.f32.mrb[41].mxu0  ;;  %v17247_v31 = vld [vmem:[#allocation2 + $0xb1] sm:$0xff] }
 0x244   :  { %19061 = vst [vmem:[#allocation16_spill] sm:$0xff] %v17118_v23  ;;  %v17120_v42 = vpop.f32.mrb[42].mxu0  ;;  %14162 = vmatpush3.bf16.msra.mxu0 %v15684_v9  ;;  %v3344_v9 = vld [vmem:[#allocation2 + $0x11] sm:$0xff] }
 0x245   :  { %19062 = vst [vmem:[#allocation23_spill] sm:$0xff] %v17120_v42  ;;  %v17122_v2 = vpop.f32.mrb[43].mxu0  ;;  %14179 = vmatprep.subr.bf16.mxu0 %v15687_v38  ;;  %v17172_v7 = vpack.c.bf16 %v19072_v5, %v3344_v9  ;;  %v15688_v9 = vld [vmem:[%s18720_s2 + $0x2f8] sm:$0xff]   ;;  %v19083_v42 = vld [vmem:[#allocation88_spill] sm:$0xff] }
 0x246   :  { %19063 = vst [vmem:[#allocation9_spill] sm:$0xff] %v17122_v2 }
 0x247   :  { %14148 = vmatmul.mubr.msk.bf16.gmra.mrb[48].mxu0 %vm324_vm2, %v17126_v18  ;;  %19073 = vst [vmem:[#allocation21_spill] sm:$0xff] %v17172_v7 }
 0x248   :  { %14151 = vmatprep.mubr.msk.bf16.mxu0 %vm324_vm2, %v17129_v14 }
 0x249   :  { %13532 = vmatmul.mubr.msk.bf16.gmra.mrb[4].mxu1 %vm324_vm2, %v19038_v49  ;;  %v19071_v49 = vld [vmem:[#allocation77_spill] sm:$0xff] }
 0x24a   :  { %13535 = vmatprep.mubr.msk.bf16.mxu1 %vm324_vm2, %v19039_v53  ;;  %v17139_v16 = vpop.f32.mrb[28].mxu0  ;;  %v17155_v24 = vpack.c.bf16 %v17143_v43, %v19071_v49  ;;  %v17165_v53 = vld [vmem:[#allocation2 + $0xb0] sm:$0xff]  ;;  %v17192_v49 = vpack.c.bf16 %v19075_v30, %v19074_v44  ;;  %v3352_v30 = vld [vmem:[#allocation2 + $0x79] sm:$0xff] }
 0x24b   :  { %19065 = vst [vmem:[#allocation8_spill] sm:$0xff] %v17139_v16  ;;  %v17141_v33 = vpop.f32.mrb[29].mxu0  ;;  %v17169_v6 = vpack.c.bf16 %v17165_v53, %v16764_v62  ;;  %v15693_v62 = vld [vmem:[%s18720_s2 + $0x110] sm:$0xff]   ;;  %v17212_v44 = vld [vmem:[#allocation2 + $0x49] sm:$0xff]  ;;  %v15698_v16 = vld [vmem:[%s18720_s2 + $0x128] sm:$0xff]  }
 0x24c   :  { %19066 = vst [vmem:[#allocation15_spill] sm:$0xff] %v17141_v33  ;;  %v17145_v54 = vpop.f32.mrb[30].mxu0  ;;  %19076 = vst [vmem:[#allocation20_spill] sm:$0xff] %v17192_v49 }
 0x24d   :  { %19067 = vst [vmem:[#allocation14_spill] sm:$0xff] %v17145_v54  ;;  %v17147_v1 = vpop.f32.mrb[31].mxu0  ;;  %v17329_v54 = vld [vmem:[#allocation2 + $0xb2] sm:$0xff] }
 0x24e   :  { %19068 = vst [vmem:[#allocation12_spill] sm:$0xff] %v17147_v1 }
 0x24f   :  { %14152 = vmatmul.mubr.msk.bf16.gmra.mrb[52].mxu0 %vm324_vm2, %v17151_v45 }
 0x250   :  { %14155 = vmatprep.mubr.msk.bf16.mxu0 %vm324_vm2, %v17155_v24 }
 0x251   :  { %13536 = vmatmul.mubr.msk.bf16.gmra.mrb[8].mxu1 %vm324_vm2, %v17001_v52  ;;  %v15690_v52 = vld [vmem:[%s18720_s2 + $0x108] sm:$0xff]  }
 0x252   :  { %13543 = vmatprep.mubr.msk.bf16.mxu1 %vm324_vm2, %v19040_v12 }
 0x257   :  { %14156 = vmatmul.mubr.msk.bf16.gmra.mrb[56].mxu0 %vm324_vm2, %v17169_v6 }
 0x258   :  { %14163 = vmatprep.mubr.msk.bf16.mxu0 %vm324_vm2, %v17172_v7 }
 0x259   :  { %13544 = vmatmul.mubr.msk.bf16.vlgmr.msra.gmra.mrb[12].mxu1 %vm324_vm2, %v19041_v17 }
 0x25a   :  { %13547 = vmatprep.mubr.msk.bf16.mxu1 %vm324_vm2, %v19042_v48  ;;  %13560 = vmatpush3.bf16.msra.mxu1 %v15689_v20  ;;  %v19077_v20 = vld [vmem:[#allocation83_spill] sm:$0xff] }
 0x25b   :  { %13561 = vmatprep.subr.bf16.mxu1 %v15690_v52  ;;  %v17201_v5 = vpack.c.bf16 %v17188_v27, %v19077_v20  ;;  %v17216_v20 = vpack.c.bf16 %v17212_v44, %v16803_v37  ;;  %v19082_v37 = vld [vmem:[#allocation87_spill] sm:$0xff] }
 0x25c   :  { %v17233_v23 = vpack.c.bf16 %v19083_v42, %v19082_v37  ;;  %v17251_v42 = vpack.c.bf16 %v17247_v31, %v16837_v28  ;;  %v3522_v37 = vld [vmem:[#allocation2 + $0x12] sm:$0xff] }
 0x25d   :  { %19078 = vst [vmem:[#allocation25_spill] sm:$0xff] %v17201_v5  ;;  %19079 = vst [vmem:[#allocation19_spill] sm:$0xff] %v17216_v20  ;;  %v15697_v28 = vld [vmem:[%s18720_s2 + $0x120] sm:$0xff]  }
 0x25e   :  { %13562 = vmatpush3.bf16.msra.mxu1 %v15690_v52  ;;  %v15691_v52 = vld [vmem:[%s18720_s2 + $0x300] sm:$0xff]   ;;  %19084 = vst [vmem:[#allocation45_spill] sm:$0xff] %v17233_v23  ;;  %19087 = vst [vmem:[#allocation51_spill] sm:$0xff] %v17251_v42 }
 0x25f   :  { %13579 = vmatprep.subr.bf16.mxu1 %v15693_v62  ;;  %14164 = vmatmul.mubr.msk.bf16.vlgmr.msra.gmra.mrb[44].mxu0 %vm324_vm2, %v17192_v49  ;;  %v4060_v48 = vld [vmem:[#allocation2 + $0x35] sm:$0xff] }
 0x260   :  { %14180 = vmatpush3.bf16.msra.mxu0 %v15687_v38  ;;  %14167 = vmatprep.mubr.msk.bf16.mxu0 %vm324_vm2, %v17201_v5  ;;  %v19080_v38 = vld [vmem:[#allocation86_spill] sm:$0xff] }
 0x261   :  { %13548 = vmatmul.mubr.msk.bf16.gmra.mrb[0].mxu1 %vm324_vm2, %v17034_v10  ;;  %14181 = vmatprep.subr.bf16.mxu0 %v15688_v9  ;;  %v17219_v2 = vpack.c.bf16 %v19080_v38, %v3352_v30  ;;  %v19085_v30 = vld [vmem:[#allocation89_spill] sm:$0xff] }
 0x262   :  { %13551 = vmatprep.mubr.msk.bf16.mxu1 %vm324_vm2, %v19044_v59 }
 0x263   :  { %19081 = vst [vmem:[#allocation46_spill] sm:$0xff] %v17219_v2 }
 0x264   :  { %14182 = vmatpush3.bf16.msra.mxu0 %v15688_v9  ;;  %v17229_v9 = vld [vmem:[#allocation2 + $0xa1] sm:$0xff] }
 0x265   :  { %14199 = vmatprep.subr.bf16.mxu0 %v15691_v52  ;;  %v17237_v38 = vpack.c.bf16 %v17229_v9, %v19085_v30  ;;  %v19088_v30 = vld [vmem:[#allocation91_spill] sm:$0xff] }
 0x266   :  { %v17254_v40 = vpack.c.bf16 %v19088_v30, %v3522_v37  ;;  %v17270_v37 = vld [vmem:[#allocation2 + $0x3a] sm:$0xff] }
 0x267   :  { %14168 = vmatmul.mubr.msk.bf16.gmra.mrb[48].mxu0 %vm324_vm2, %v17216_v20  ;;  %19086 = vst [vmem:[#allocation26_spill] sm:$0xff] %v17237_v38  ;;  %v19090_v30 = vld [vmem:[#allocation92_spill] sm:$0xff] }
 0x268   :  { %14171 = vmatprep.mubr.msk.bf16.mxu0 %vm324_vm2, %v17219_v2  ;;  %19089 = vst [vmem:[#allocation47_spill] sm:$0xff] %v17254_v40  ;;  %v17274_v4 = vpack.c.bf16 %v19091_v8, %v19090_v30  ;;  %v15695_v8 = vld [vmem:[%s18720_s2 + $0x310] sm:$0xff]  }
 0x269   :  { %13552 = vmatmul.mubr.msk.bf16.gmra.mrb[4].mxu1 %vm324_vm2, %v19045_v34  ;;  %v3530_v30 = vld [vmem:[#allocation2 + $0x7a] sm:$0xff]  ;;  %v15782_v34 = vld [vmem:[#allocation2 + $0xa3] sm:$0xff] }
 0x26a   :  { %13555 = vmatprep.mubr.msk.bf16.mxu1 %vm324_vm2, %v19046_v51  ;;  %19092 = vst [vmem:[#allocation50_spill] sm:$0xff] %v17274_v4  ;;  %v15781_v51 = vld [vmem:[#allocation2 + $0x9b] sm:$0xff] }
 0x26f   :  { %14172 = vmatmul.mubr.msk.bf16.gmra.mrb[52].mxu0 %vm324_vm2, %v17233_v23 }
 0x270   :  { %14175 = vmatprep.mubr.msk.bf16.mxu0 %vm324_vm2, %v17237_v38 }
 0x271   :  { %13556 = vmatmul.mubr.msk.bf16.gmra.mrb[8].mxu1 %vm324_vm2, %v17063_v60 }
 0x272   :  { %13563 = vmatprep.mubr.msk.bf16.mxu1 %vm324_vm2, %v17066_v0 }
 0x277   :  { %14176 = vmatmul.mubr.msk.bf16.gmra.mrb[56].mxu0 %vm324_vm2, %v17251_v42 }
 0x278   :  { %14183 = vmatprep.mubr.msk.bf16.mxu0 %vm324_vm2, %v17254_v40 }
 0x279   :  { %13564 = vmatmul.mubr.msk.bf16.vlgmr.msra.gmra.mrb[12].mxu1 %vm324_vm2, %v17094_v55 }
 0x27a   :  { %13567 = vmatprep.mubr.msk.bf16.mxu1 %vm324_vm2, %v17103_v26  ;;  %13580 = vmatpush3.bf16.msra.mxu1 %v15693_v62  ;;  %v19093_v62 = vld [vmem:[#allocation95_spill] sm:$0xff] }
 0x27b   :  { %13581 = vmatprep.subr.bf16.mxu1 %v15694_v61  ;;  %v17283_v11 = vpack.c.bf16 %v17270_v37, %v19093_v62 }
 0x27d   :  { %19094 = vst [vmem:[#allocation57_spill] sm:$0xff] %v17283_v11 }
 0x27e   :  { %13582 = vmatpush3.bf16.msra.mxu1 %v15694_v61  ;;  %v17294_v61 = vld [vmem:[#allocation2 + $0x4a] sm:$0xff] }
 0x27f   :  { %13599 = vmatprep.subr.bf16.mxu1 %v15697_v28  ;;  %14184 = vmatmul.mubr.msk.bf16.vlgmr.msra.gmra.mrb[44].mxu0 %vm324_vm2, %v17274_v4  ;;  %v17298_v62 = vpack.c.bf16 %v17294_v61, %v16822_v32  ;;  %v19098_v32 = vld [vmem:[#allocation99_spill] sm:$0xff] }
 0x280   :  { %14200 = vmatpush3.bf16.msra.mxu0 %v15691_v52  ;;  %14187 = vmatprep.mubr.msk.bf16.mxu0 %vm324_vm2, %v17283_v11  ;;  %v19096_v52 = vld [vmem:[#allocation97_spill] sm:$0xff]  ;;  %v17315_v1 = vpack.c.bf16 %v19099_v3, %v19098_v32  ;;  %v17333_v3 = vpack.c.bf16 %v17329_v54, %v16848_v50  ;;  %v3700_v32 = vld [vmem:[#allocation2 + $0x13] sm:$0xff]  ;;  %v15701_v50 = vld [vmem:[%s18720_s2 + $0x130] sm:$0xff]  }
 0x281   :  { %13568 = vmatmul.mubr.msk.bf16.gmra.mrb[0].mxu1 %vm324_vm2, %v17126_v18  ;;  %14201 = vmatprep.subr.bf16.mxu0 %v15692_v15  ;;  %19095 = vst [vmem:[#allocation52_spill] sm:$0xff] %v17298_v62  ;;  %v17301_v36 = vpack.c.bf16 %v19096_v52, %v3530_v30  ;;  %v19101_v30 = vld [vmem:[#allocation101_spill] sm:$0xff] }
 0x282   :  { %13571 = vmatprep.mubr.msk.bf16.mxu1 %vm324_vm2, %v17129_v14  ;;  %19100 = vst [vmem:[#allocation56_spill] sm:$0xff] %v17315_v1  ;;  %19103 = vst [vmem:[#allocation38_spill] sm:$0xff] %v17333_v3 }
 0x283   :  { %19097 = vst [vmem:[#allocation58_spill] sm:$0xff] %v17301_v36 }
 0x284   :  { %14202 = vmatpush3.bf16.msra.mxu0 %v15692_v15  ;;  %v17311_v15 = vld [vmem:[#allocation2 + $0xa2] sm:$0xff] }
 0x285   :  { %14219 = vmatprep.subr.bf16.mxu0 %v15695_v8  ;;  %v17319_v52 = vpack.c.bf16 %v17311_v15, %v19101_v30  ;;  %v19104_v30 = vld [vmem:[#allocation104_spill] sm:$0xff] }
 0x286   :  { %v17336_v33 = vpack.c.bf16 %v19104_v30, %v3700_v32  ;;  %v15773_v32 = vld [vmem:[#allocation2 + $0x23] sm:$0xff]  ;;  %v15774_v30 = vld [vmem:[#allocation2 + $0x2b] sm:$0xff] }
 0x287   :  { %14188 = vmatmul.mubr.msk.bf16.gmra.mrb[48].mxu0 %vm324_vm2, %v17298_v62  ;;  %19102 = vst [vmem:[#allocation63_spill] sm:$0xff] %v17319_v52 }
 0x288   :  { %14191 = vmatprep.mubr.msk.bf16.mxu0 %vm324_vm2, %v17301_v36  ;;  %19105 = vst [vmem:[#allocation39_spill] sm:$0xff] %v17336_v33 }
 0x289   :  { %13572 = vmatmul.mubr.msk.bf16.gmra.mrb[4].mxu1 %vm324_vm2, %v17151_v45 }
 0x28a   :  { %13575 = vmatprep.mubr.msk.bf16.mxu1 %vm324_vm2, %v17155_v24 }
 0x28f   :  { %14192 = vmatmul.mubr.msk.bf16.gmra.mrb[52].mxu0 %vm324_vm2, %v17315_v1 }
 0x290   :  { %14195 = vmatprep.mubr.msk.bf16.mxu0 %vm324_vm2, %v17319_v52 }
 0x291   :  { %13576 = vmatmul.mubr.msk.bf16.gmra.mrb[8].mxu1 %vm324_vm2, %v17169_v6 }
 0x292   :  { %13583 = vmatprep.mubr.msk.bf16.mxu1 %vm324_vm2, %v17172_v7  ;;  %v17352_v7 = vpack.c.bf16 %v15774_v30, %v15773_v32  ;;  %v17370_v32 = vld [vmem:[#allocation2 + $0x4b] sm:$0xff]  ;;  %v3708_v30 = vld [vmem:[#allocation2 + $0x7b] sm:$0xff] }
 0x294   :  { %19106 = vst [vmem:[#allocation40_spill] sm:$0xff] %v17352_v7 }
 0x297   :  { %14196 = vmatmul.mubr.msk.bf16.gmra.mrb[56].mxu0 %vm324_vm2, %v17333_v3 }
 0x298   :  { %14203 = vmatprep.mubr.msk.bf16.mxu0 %vm324_vm2, %v17336_v33 }
 0x299   :  { %13584 = vmatmul.mubr.msk.bf16.vlgmr.msra.gmra.mrb[12].mxu1 %vm324_vm2, %v17192_v49  ;;  %v15696_v49 = vld [vmem:[%s18720_s2 + $0x318] sm:$0xff]  }
 0x29a   :  { %13587 = vmatprep.mubr.msk.bf16.mxu1 %vm324_vm2, %v17201_v5  ;;  %13600 = vmatpush3.bf16.msra.mxu1 %v15697_v28  ;;  %v15775_v5 = vld [vmem:[#allocation2 + $0x33] sm:$0xff]  ;;  %v15776_v28 = vld [vmem:[#allocation2 + $0x3b] sm:$0xff] }
 0x29b   :  { %13601 = vmatprep.subr.bf16.mxu1 %v15698_v16  ;;  %v17359_v60 = vpack.c.bf16 %v15776_v28, %v15775_v5  ;;  %v15777_v5 = vld [vmem:[#allocation2 + $0x43] sm:$0xff] }
 0x29c   :  { %v17373_v28 = vpack.c.bf16 %v17370_v32, %v15777_v5 }
 0x29d   :  { %19107 = vst [vmem:[#allocation41_spill] sm:$0xff] %v17359_v60 }
 0x29e   :  { %13602 = vmatpush3.bf16.msra.mxu1 %v15698_v16  ;;  %v15699_v16 = vld [vmem:[%s18720_s2 + $0x320] sm:$0xff]  }
 0x29f   :  { %13619 = vmatprep.subr.bf16.mxu1 %v15701_v50  ;;  %14204 = vmatmul.mubr.msk.bf16.vlgmr.msra.gmra.mrb[44].mxu0 %vm324_vm2, %v17352_v7 }
 0x2a0   :  { %14220 = vmatpush3.bf16.msra.mxu0 %v15695_v8  ;;  %14207 = vmatprep.mubr.msk.bf16.mxu0 %vm324_vm2, %v17359_v60  ;;  %v15778_v8 = vld [vmem:[#allocation2 + $0x83] sm:$0xff] }
 0x2a1   :  { %13588 = vmatmul.mubr.msk.bf16.gmra.mrb[0].mxu1 %vm324_vm2, %v17216_v20  ;;  %14221 = vmatprep.subr.bf16.mxu0 %v15696_v49  ;;  %v17375_v20 = vpack.c.bf16 %v15778_v8, %v3708_v30  ;;  %v17387_v30 = vpack.c.bf16 %v15782_v34, %v15781_v51  ;;  %v17397_v8 = vld [vmem:[#allocation2 + $0xb3] sm:$0xff] }
 0x2a2   :  { %13591 = vmatprep.mubr.msk.bf16.mxu1 %vm324_vm2, %v17219_v2  ;;  %v15780_v2 = vld [vmem:[#allocation2 + $0x93] sm:$0xff] }
 0x2a3   :  { %19108 = vst [vmem:[#allocation42_spill] sm:$0xff] %v17375_v20  ;;  %19110 = vst [vmem:[#allocation54_spill] sm:$0xff] %v17387_v30  ;;  %v3878_v51 = vld [vmem:[#allocation2 + $0x14] sm:$0xff] }
 0x2a4   :  { %14222 = vmatpush3.bf16.msra.mxu0 %v15696_v49  ;;  %v15779_v49 = vld [vmem:[#allocation2 + $0x8b] sm:$0xff] }
 0x2a5   :  { %14239 = vmatprep.subr.bf16.mxu0 %v15699_v16  ;;  %v17385_v5 = vpack.c.bf16 %v15780_v2, %v15779_v49  ;;  %v17399_v2 = vld [vmem:[#allocation2 + $0x1c] sm:$0xff]  ;;  %v15783_v49 = vld [vmem:[#allocation2 + $0xab] sm:$0xff] }
 0x2a6   :  { %v17402_v34 = vpack.c.bf16 %v17397_v8, %v15783_v49  ;;  %v15705_v49 = vld [vmem:[%s18720_s2 + $0x140] sm:$0xff]  }
 0x2a7   :  { %14208 = vmatmul.mubr.msk.bf16.gmra.mrb[48].mxu0 %vm324_vm2, %v17373_v28  ;;  %19109 = vst [vmem:[#allocation48_spill] sm:$0xff] %v17385_v5 }
 0x2a8   :  { %14211 = vmatprep.mubr.msk.bf16.mxu0 %vm324_vm2, %v17375_v20 }
 0x2a9   :  { %13592 = vmatmul.mubr.msk.bf16.gmra.mrb[4].mxu1 %vm324_vm2, %v17233_v23 }
 0x2aa   :  { %13595 = vmatprep.mubr.msk.bf16.mxu1 %vm324_vm2, %v17237_v38  ;;  %v17405_v38 = vpack.c.bf16 %v17399_v2, %v3878_v51  ;;  %v15700_v51 = vld [vmem:[%s18720_s2 + $0x328] sm:$0xff]  }
 0x2ac   :  { %19111 = vst [vmem:[#allocation61_spill] sm:$0xff] %v17405_v38 }
 0x2af   :  { %14212 = vmatmul.mubr.msk.bf16.gmra.mrb[52].mxu0 %vm324_vm2, %v17385_v5 }
 0x2b0   :  { %14215 = vmatprep.mubr.msk.bf16.mxu0 %vm324_vm2, %v17387_v30 }
 0x2b1   :  { %13596 = vmatmul.mubr.msk.bf16.gmra.mrb[8].mxu1 %vm324_vm2, %v17251_v42  ;;  %v15702_v42 = vld [vmem:[%s18720_s2 + $0x138] sm:$0xff]  }
 0x2b2   :  { %13603 = vmatprep.mubr.msk.bf16.mxu1 %vm324_vm2, %v17254_v40  ;;  %v19112_v40 = vld [vmem:[#allocation43_spill] sm:$0xff] }
 0x2b7   :  { %14216 = vmatmul.mubr.msk.bf16.gmra.mrb[56].mxu0 %vm324_vm2, %v17402_v34 }
 0x2b8   :  { %14223 = vmatprep.mubr.msk.bf16.mxu0 %vm324_vm2, %v17405_v38 }
 0x2b9   :  { %13604 = vmatmul.mubr.msk.bf16.vlgmr.msra.gmra.mrb[12].mxu1 %vm324_vm2, %v17274_v4  ;;  %v3886_v4 = vld [vmem:[#allocation2 + $0x7c] sm:$0xff] }
 0x2ba   :  { %13607 = vmatprep.mubr.msk.bf16.mxu1 %vm324_vm2, %v17283_v11  ;;  %13620 = vmatpush3.bf16.msra.mxu1 %v15701_v50  ;;  %v19113_v50 = vld [vmem:[#allocation44_spill] sm:$0xff]  ;;  %v17435_v11 = vld [vmem:[#allocation2 + $0x4c] sm:$0xff] }
 0x2bb   :  { %13621 = vmatprep.subr.bf16.mxu1 %v15702_v42  ;;  %v17439_v23 = vpack.c.bf16 %v17435_v11, %v16880_v46  ;;  %v15785_v46 = vld [vmem:[#allocation2 + $0x8c] sm:$0xff] }
 0x2be   :  { %13622 = vmatpush3.bf16.msra.mxu1 %v15702_v42  ;;  %v15703_v42 = vld [vmem:[%s18720_s2 + $0x330] sm:$0xff]  }
 0x2bf   :  { %13639 = vmatprep.subr.bf16.mxu1 %v15705_v49  ;;  %14224 = vmatmul.mubr.msk.bf16.vlgmr.msra.gmra.mrb[44].mxu0 %vm324_vm2, %v19112_v40 }
 0x2c0   :  { %14240 = vmatpush3.bf16.msra.mxu0 %v15699_v16  ;;  %14227 = vmatprep.mubr.msk.bf16.mxu0 %vm324_vm2, %v19113_v50  ;;  %v15784_v16 = vld [vmem:[#allocation2 + $0x84] sm:$0xff] }
 0x2c1   :  { %13608 = vmatmul.mubr.msk.bf16.gmra.mrb[0].mxu1 %vm324_vm2, %v17298_v62  ;;  %14241 = vmatprep.subr.bf16.mxu0 %v15700_v51  ;;  %v17441_v62 = vpack.c.bf16 %v15784_v16, %v3886_v4  ;;  %v15787_v4 = vld [vmem:[#allocation2 + $0x9c] sm:$0xff] }
 0x2c2   :  { %13611 = vmatprep.mubr.msk.bf16.mxu1 %vm324_vm2, %v17301_v36  ;;  %v15786_v36 = vld [vmem:[#allocation2 + $0x94] sm:$0xff] }
 0x2c3   :  { %19114 = vst [vmem:[#allocation60_spill] sm:$0xff] %v17441_v62  ;;  %v17453_v59 = vpack.c.bf16 %v15786_v36, %v15785_v46  ;;  %v4057_v36 = vld [vmem:[#allocation2 + $0x1d] sm:$0xff] }
 0x2c4   :  { %14242 = vmatpush3.bf16.msra.mxu0 %v15700_v51  ;;  %v17451_v51 = vld [vmem:[#allocation2 + $0xa4] sm:$0xff] }
 0x2c5   :  { %14259 = vmatprep.subr.bf16.mxu0 %v15703_v42  ;;  %19115 = vst [vmem:[#allocation11_spill] sm:$0xff] %v17453_v59  ;;  %v17456_v16 = vpack.c.bf16 %v17451_v51, %v15787_v4  ;;  %v4056_v4 = vld [vmem:[#allocation2 + $0x15] sm:$0xff] }
 0x2c7   :  { %14228 = vmatmul.mubr.msk.bf16.gmra.mrb[48].mxu0 %vm324_vm2, %v17439_v23  ;;  %19116 = vst [vmem:[#allocation18_spill] sm:$0xff] %v17456_v16 }
 0x2c8   :  { %14231 = vmatprep.mubr.msk.bf16.mxu0 %vm324_vm2, %v17441_v62 }
 0x2c9   :  { %13612 = vmatmul.mubr.msk.bf16.gmra.mrb[4].mxu1 %vm324_vm2, %v17315_v1  ;;  %v17472_v1 = vpack.c.bf16 %v4057_v36, %v4056_v4  ;;  %v15709_v36 = vld [vmem:[%s18720_s2 + $0x150] sm:$0xff]  }
 0x2ca   :  { %13615 = vmatprep.mubr.msk.bf16.mxu1 %vm324_vm2, %v17319_v52  ;;  %v17466_v52 = vld [vmem:[#allocation2 + $0xb4] sm:$0xff]  ;;  %v4058_v4 = vld [vmem:[#allocation2 + $0x25] sm:$0xff] }
 0x2cb   :  { %v17470_v46 = vpack.c.bf16 %v17466_v52, %v16898_v56  ;;  %19117 = vst [vmem:[#allocation24_spill] sm:$0xff] %v17472_v1  ;;  %v4059_v56 = vld [vmem:[#allocation2 + $0x2d] sm:$0xff] }
 0x2cc   :  { %v17488_v10 = vpack.c.bf16 %v4059_v56, %v4058_v4  ;;  %v4063_v56 = vld [vmem:[#allocation2 + $0x4d] sm:$0xff]  ;;  %v4064_v4 = vld [vmem:[#allocation2 + $0x7d] sm:$0xff] }
 0x2ce   :  { %19118 = vst [vmem:[#allocation49_spill] sm:$0xff] %v17488_v10 }
 0x2cf   :  { %14232 = vmatmul.mubr.msk.bf16.gmra.mrb[52].mxu0 %vm324_vm2, %v17453_v59 }
 0x2d0   :  { %14235 = vmatprep.mubr.msk.bf16.mxu0 %vm324_vm2, %v17456_v16 }
 0x2d1   :  { %13616 = vmatmul.mubr.msk.bf16.gmra.mrb[8].mxu1 %vm324_vm2, %v17333_v3  ;;  %v15706_v3 = vld [vmem:[%s18720_s2 + $0x148] sm:$0xff]  }
 0x2d2   :  { %13623 = vmatprep.mubr.msk.bf16.mxu1 %vm324_vm2, %v17336_v33  ;;  %v4061_v33 = vld [vmem:[#allocation2 + $0x3d] sm:$0xff] }
 0x2d7   :  { %14236 = vmatmul.mubr.msk.bf16.gmra.mrb[56].mxu0 %vm324_vm2, %v17470_v46 }
 0x2d8   :  { %14243 = vmatprep.mubr.msk.bf16.mxu0 %vm324_vm2, %v17472_v1 }
 0x2d9   :  { %13624 = vmatmul.mubr.msk.bf16.vlgmr.msra.gmra.mrb[12].mxu1 %vm324_vm2, %v17352_v7  ;;  %v15704_v7 = vld [vmem:[%s18720_s2 + $0x338] sm:$0xff]  }
 0x2da   :  { %13627 = vmatprep.mubr.msk.bf16.mxu1 %vm324_vm2, %v17359_v60  ;;  %13640 = vmatpush3.bf16.msra.mxu1 %v15705_v49  ;;  %v17495_v49 = vpack.c.bf16 %v4061_v33, %v4060_v48  ;;  %v4065_v60 = vld [vmem:[#allocation2 + $0x85] sm:$0xff]  ;;  %v17507_v48 = vpack.c.bf16 %v4063_v56, %v16929_v19 }
 0x2db   :  { %13641 = vmatprep.subr.bf16.mxu1 %v15706_v3  ;;  %v17509_v33 = vpack.c.bf16 %v4065_v60, %v4064_v4  ;;  %v4069_v19 = vld [vmem:[#allocation2 + $0xa5] sm:$0xff]  ;;  %v4071_v4 = vld [vmem:[#allocation2 + $0xb5] sm:$0xff] }
 0x2dc   :  { %19119 = vst [vmem:[#allocation55_spill] sm:$0xff] %v17495_v49 }
 0x2dd   :  { %19120 = vst [vmem:[#allocation62_spill] sm:$0xff] %v17509_v33 }
 0x2de   :  { %13642 = vmatpush3.bf16.msra.mxu1 %v15706_v3  ;;  %v15707_v3 = vld [vmem:[%s18720_s2 + $0x340] sm:$0xff]  }
 0x2df   :  { %13659 = vmatprep.subr.bf16.mxu1 %v15709_v36  ;;  %14244 = vmatmul.mubr.msk.bf16.vlgmr.msra.gmra.mrb[44].mxu0 %vm324_vm2, %v17488_v10 }
 0x2e0   :  { %14260 = vmatpush3.bf16.msra.mxu0 %v15703_v42  ;;  %14247 = vmatprep.mubr.msk.bf16.mxu0 %vm324_vm2, %v17495_v49  ;;  %v4066_v42 = vld [vmem:[#allocation2 + $0x8d] sm:$0xff] }
 0x2e1   :  { %13628 = vmatmul.mubr.msk.bf16.gmra.mrb[0].mxu1 %vm324_vm2, %v17373_v28  ;;  %14261 = vmatprep.subr.bf16.mxu0 %v15704_v7 }
 0x2e2   :  { %13631 = vmatprep.mubr.msk.bf16.mxu1 %vm324_vm2, %v17375_v20  ;;  %v4068_v20 = vld [vmem:[#allocation2 + $0x9d] sm:$0xff] }
 0x2e3   :  { %v17521_v60 = vpack.c.bf16 %v4069_v19, %v4068_v20  ;;  %v4236_v19 = vld [vmem:[#allocation2 + $0x26] sm:$0xff] }
 0x2e4   :  { %14262 = vmatpush3.bf16.msra.mxu0 %v15704_v7  ;;  %v4067_v7 = vld [vmem:[#allocation2 + $0x95] sm:$0xff] }
 0x2e5   :  { %14279 = vmatprep.subr.bf16.mxu0 %v15707_v3  ;;  %v17519_v56 = vpack.c.bf16 %v4067_v7, %v4066_v42  ;;  %19121 = vst [vmem:[#allocation13_spill] sm:$0xff] %v17521_v60  ;;  %v4234_v42 = vld [vmem:[#allocation2 + $0x16] sm:$0xff]  ;;  %v15710_v7 = vld [vmem:[%s18720_s2 + $0x158] sm:$0xff]  }
 0x2e7   :  { %14248 = vmatmul.mubr.msk.bf16.gmra.mrb[48].mxu0 %vm324_vm2, %v17507_v48 }
 0x2e8   :  { %14251 = vmatprep.mubr.msk.bf16.mxu0 %vm324_vm2, %v17509_v33 }
 0x2e9   :  { %13632 = vmatmul.mubr.msk.bf16.gmra.mrb[4].mxu1 %vm324_vm2, %v17385_v5  ;;  %v17532_v5 = vpack.c.bf16 %v4071_v4, %v16948_v21  ;;  %v4237_v21 = vld [vmem:[#allocation2 + $0x2e] sm:$0xff]  ;;  %v4239_v4 = vld [vmem:[#allocation2 + $0x3e] sm:$0xff] }
 0x2ea   :  { %13635 = vmatprep.mubr.msk.bf16.mxu1 %vm324_vm2, %v17387_v30  ;;  %v4235_v30 = vld [vmem:[#allocation2 + $0x1e] sm:$0xff] }
 0x2eb   :  { %v17534_v20 = vpack.c.bf16 %v4235_v30, %v4234_v42  ;;  %v15713_v30 = vld [vmem:[%s18720_s2 + $0x160] sm:$0xff]   ;;  %v17550_v42 = vpack.c.bf16 %v4237_v21, %v4236_v19  ;;  %v4242_v19 = vld [vmem:[#allocation2 + $0x7e] sm:$0xff] }
 0x2ec   :  { %v4241_v21 = vld [vmem:[#allocation2 + $0x4e] sm:$0xff] }
 0x2ed   :  { %19122 = vst [vmem:[#allocation22_spill] sm:$0xff] %v17550_v42 }
 0x2ef   :  { %14252 = vmatmul.mubr.msk.bf16.gmra.mrb[52].mxu0 %vm324_vm2, %v17519_v56 }
 0x2f0   :  { %14255 = vmatprep.mubr.msk.bf16.mxu0 %vm324_vm2, %v17521_v60 }
 0x2f1   :  { %13636 = vmatmul.mubr.msk.bf16.gmra.mrb[8].mxu1 %vm324_vm2, %v17402_v34 }
 0x2f2   :  { %13643 = vmatprep.mubr.msk.bf16.mxu1 %vm324_vm2, %v17405_v38  ;;  %v4238_v38 = vld [vmem:[#allocation2 + $0x36] sm:$0xff] }
 0x2f7   :  { %14256 = vmatmul.mubr.msk.bf16.gmra.mrb[56].mxu0 %vm324_vm2, %v17532_v5 }
 0x2f8   :  { %14263 = vmatprep.mubr.msk.bf16.mxu0 %vm324_vm2, %v17534_v20 }
 0x2f9   :  { %13644 = vmatmul.mubr.msk.bf16.vlgmr.msra.gmra.mrb[12].mxu1 %vm324_vm2, %v19112_v40  ;;  %v15708_v40 = vld [vmem:[%s18720_s2 + $0x348] sm:$0xff]  }
 0x2fa   :  { %13647 = vmatprep.mubr.msk.bf16.mxu1 %vm324_vm2, %v19113_v50  ;;  %13660 = vmatpush3.bf16.msra.mxu1 %v15709_v36  ;;  %v17557_v36 = vpack.c.bf16 %v4239_v4, %v4238_v38  ;;  %v4243_v50 = vld [vmem:[#allocation2 + $0x86] sm:$0xff]  ;;  %v17569_v38 = vpack.c.bf16 %v4241_v21, %v16976_v13  ;;  %v4244_v4 = vld [vmem:[#allocation2 + $0x8e] sm:$0xff] }
 0x2fb   :  { %13661 = vmatprep.subr.bf16.mxu1 %v15710_v7  ;;  %v4247_v13 = vld [vmem:[#allocation2 + $0xa6] sm:$0xff] }
 0x2fe   :  { %13662 = vmatpush3.bf16.msra.mxu1 %v15710_v7  ;;  %v15711_v7 = vld [vmem:[%s18720_s2 + $0x350] sm:$0xff]  }
 0x2ff   :  { %13679 = vmatprep.subr.bf16.mxu1 %v15713_v30  ;;  %14264 = vmatmul.mubr.msk.bf16.vlgmr.msra.gmra.mrb[44].mxu0 %vm324_vm2, %v17550_v42 }
 0x300   :  { %14280 = vmatpush3.bf16.msra.mxu0 %v15707_v3  ;;  %14267 = vmatprep.mubr.msk.bf16.mxu0 %vm324_vm2, %v17557_v36  ;;  %v17571_v3 = vpack.c.bf16 %v4243_v50, %v4242_v19  ;;  %v4249_v19 = vld [vmem:[#allocation2 + $0xb6] sm:$0xff] }
 0x301   :  { %13648 = vmatmul.mubr.msk.bf16.gmra.mrb[0].mxu1 %vm324_vm2, %v17439_v23  ;;  %14281 = vmatprep.subr.bf16.mxu0 %v15708_v40 }
 0x302   :  { %13651 = vmatprep.mubr.msk.bf16.mxu1 %vm324_vm2, %v17441_v62  ;;  %19123 = vst [vmem:[#allocation27_spill] sm:$0xff] %v17571_v3  ;;  %v4246_v62 = vld [vmem:[#allocation2 + $0x9e] sm:$0xff] }
 0x303   :  { %v17583_v50 = vpack.c.bf16 %v4247_v13, %v4246_v62  ;;  %v4414_v13 = vld [vmem:[#allocation2 + $0x27] sm:$0xff] }
 0x304   :  { %14282 = vmatpush3.bf16.msra.mxu0 %v15708_v40  ;;  %v4245_v40 = vld [vmem:[#allocation2 + $0x96] sm:$0xff] }
 0x305   :  { %14299 = vmatprep.subr.bf16.mxu0 %v15711_v7  ;;  %v17581_v21 = vpack.c.bf16 %v4245_v40, %v4244_v4  ;;  %v4412_v4 = vld [vmem:[#allocation2 + $0x17] sm:$0xff] }
 0x306   :  { %v15714_v40 = vld [vmem:[%s18720_s2 + $0x168] sm:$0xff]  }
 0x307   :  { %14268 = vmatmul.mubr.msk.bf16.gmra.mrb[48].mxu0 %vm324_vm2, %v17569_v38 }
 0x308   :  { %14271 = vmatprep.mubr.msk.bf16.mxu0 %vm324_vm2, %v17571_v3 }
 0x309   :  { %13652 = vmatmul.mubr.msk.bf16.gmra.mrb[4].mxu1 %vm324_vm2, %v17453_v59  ;;  %v17594_v59 = vpack.c.bf16 %v4249_v19, %v16997_v29  ;;  %v4415_v29 = vld [vmem:[#allocation2 + $0x2f] sm:$0xff]  ;;  %v4417_v19 = vld [vmem:[#allocation2 + $0x3f] sm:$0xff] }
 0x30a   :  { %13655 = vmatprep.mubr.msk.bf16.mxu1 %vm324_vm2, %v17456_v16  ;;  %v4413_v16 = vld [vmem:[#allocation2 + $0x1f] sm:$0xff] }
 0x30b   :  { %19124 = vst [vmem:[#allocation53_spill] sm:$0xff] %v17594_v59  ;;  %v17596_v62 = vpack.c.bf16 %v4413_v16, %v4412_v4  ;;  %v15717_v16 = vld [vmem:[%s18720_s2 + $0x170] sm:$0xff]   ;;  %v17612_v4 = vpack.c.bf16 %v4415_v29, %v4414_v13  ;;  %v4419_v29 = vld [vmem:[#allocation2 + $0x4f] sm:$0xff] }
 0x30c   :  { %v4420_v13 = vld [vmem:[#allocation2 + $0x7f] sm:$0xff] }
 0x30d   :  { %19125 = vst [vmem:[#allocation59_spill] sm:$0xff] %v17596_v62  ;;  %19126 = vst [vmem:[#allocation64_spill] sm:$0xff] %v17612_v4 }
 0x30f   :  { %14272 = vmatmul.mubr.msk.bf16.gmra.mrb[52].mxu0 %vm324_vm2, %v17581_v21 }
 0x310   :  { %14275 = vmatprep.mubr.msk.bf16.mxu0 %vm324_vm2, %v17583_v50 }
 0x311   :  { %13656 = vmatmul.mubr.msk.bf16.gmra.mrb[8].mxu1 %vm324_vm2, %v17470_v46 }
 0x312   :  { %13663 = vmatprep.mubr.msk.bf16.mxu1 %vm324_vm2, %v17472_v1  ;;  %v4416_v1 = vld [vmem:[#allocation2 + $0x37] sm:$0xff] }
 0x317   :  { %14276 = vmatmul.mubr.msk.bf16.gmra.mrb[56].mxu0 %vm324_vm2, %v17594_v59 }
 0x318   :  { %14283 = vmatprep.mubr.msk.bf16.mxu0 %vm324_vm2, %v17596_v62 }
 0x319   :  { %13664 = vmatmul.mubr.msk.bf16.vlgmr.msra.gmra.mrb[12].mxu1 %vm324_vm2, %v17488_v10  ;;  %v15712_v10 = vld [vmem:[%s18720_s2 + $0x358] sm:$0xff]  }
 0x31a   :  { %13667 = vmatprep.mubr.msk.bf16.mxu1 %vm324_vm2, %v17495_v49  ;;  %13680 = vmatpush3.bf16.msra.mxu1 %v15713_v30  ;;  %v17619_v30 = vpack.c.bf16 %v4417_v19, %v4416_v1  ;;  %v4421_v49 = vld [vmem:[#allocation2 + $0x87] sm:$0xff]  ;;  %v17631_v1 = vpack.c.bf16 %v4419_v29, %v17030_v58  ;;  %v4422_v19 = vld [vmem:[#allocation2 + $0x8f] sm:$0xff] }
 0x31b   :  { %13681 = vmatprep.subr.bf16.mxu1 %v15714_v40  ;;  %v4425_v58 = vld [vmem:[#allocation2 + $0xa7] sm:$0xff] }
 0x31c   :  { %19127 = vst [vmem:[#allocation30_spill] sm:$0xff] %v17631_v1 }
 0x31e   :  { %13682 = vmatpush3.bf16.msra.mxu1 %v15714_v40  ;;  %v15715_v40 = vld [vmem:[%s18720_s2 + $0x360] sm:$0xff]  }
 0x31f   :  { %13699 = vmatprep.subr.bf16.mxu1 %v15717_v16  ;;  %14284 = vmatmul.mubr.msk.bf16.vlgmr.msra.gmra.mrb[44].mxu0 %vm324_vm2, %v17612_v4 }
 0x320   :  { %14300 = vmatpush3.bf16.msra.mxu0 %v15711_v7  ;;  %14287 = vmatprep.mubr.msk.bf16.mxu0 %vm324_vm2, %v17619_v30  ;;  %v17633_v7 = vpack.c.bf16 %v4421_v49, %v4420_v13  ;;  %v4427_v13 = vld [vmem:[#allocation2 + $0xb7] sm:$0xff] }
 0x321   :  { %13668 = vmatmul.mubr.msk.bf16.gmra.mrb[0].mxu1 %vm324_vm2, %v17507_v48  ;;  %14301 = vmatprep.subr.bf16.mxu0 %v15712_v10 }
 0x322   :  { %13671 = vmatprep.mubr.msk.bf16.mxu1 %vm324_vm2, %v17509_v33  ;;  %19128 = vst [vmem:[#allocation34_spill] sm:$0xff] %v17633_v7  ;;  %v4424_v33 = vld [vmem:[#allocation2 + $0x9f] sm:$0xff] }
 0x323   :  { %v17645_v49 = vpack.c.bf16 %v4425_v58, %v4424_v33  ;;  %v15718_v33 = vld [vmem:[%s18720_s2 + $0x178] sm:$0xff]   ;;  %v15716_v58 = vld [vmem:[%s18720_s2 + $0x368] sm:$0xff]  }
 0x324   :  { %14302 = vmatpush3.bf16.msra.mxu0 %v15712_v10  ;;  %v4423_v10 = vld [vmem:[#allocation2 + $0x97] sm:$0xff] }
 0x325   :  { %14319 = vmatprep.subr.bf16.mxu0 %v15715_v40  ;;  %v17643_v29 = vpack.c.bf16 %v4423_v10, %v4422_v19  ;;  %v19129_v19 = vld [vmem:[#allocation72_spill] sm:$0xff] }
 0x326   :  { %v4595_v10 = vld [vmem:[#allocation2 + $0x40] sm:$0xff] }
 0x327   :  { %14288 = vmatmul.mubr.msk.bf16.gmra.mrb[48].mxu0 %vm324_vm2, %v17631_v1 }
 0x328   :  { %14291 = vmatprep.mubr.msk.bf16.mxu0 %vm324_vm2, %v17633_v7 }
 0x329   :  { %13672 = vmatmul.mubr.msk.bf16.gmra.mrb[4].mxu1 %vm324_vm2, %v17519_v56 }
 0x32a   :  { %13675 = vmatprep.mubr.msk.bf16.mxu1 %vm324_vm2, %v17521_v60  ;;  %v17656_v60 = vpack.c.bf16 %v4427_v13, %v17053_v25  ;;  %v15721_v25 = vld [vmem:[%s18720_s2 + $0x180] sm:$0xff]   ;;  %v19130_v13 = vld [vmem:[#allocation75_spill] sm:$0xff] }
 0x32f   :  { %14292 = vmatmul.mubr.msk.bf16.gmra.mrb[52].mxu0 %vm324_vm2, %v17643_v29 }
 0x330   :  { %14295 = vmatprep.mubr.msk.bf16.mxu0 %vm324_vm2, %v17645_v49 }
 0x331   :  { %13676 = vmatmul.mubr.msk.bf16.gmra.mrb[8].mxu1 %vm324_vm2, %v17532_v5 }
 0x332   :  { %13683 = vmatprep.mubr.msk.bf16.mxu1 %vm324_vm2, %v17534_v20 }
 0x337   :  { %14296 = vmatmul.mubr.msk.bf16.gmra.mrb[56].mxu0 %vm324_vm2, %v17656_v60 }
 0x338   :  { %14303 = vmatprep.mubr.msk.bf16.mxu0 %vm324_vm2, %v19129_v19 }
 0x339   :  { %13684 = vmatmul.mubr.msk.bf16.vlgmr.msra.gmra.mrb[12].mxu1 %vm324_vm2, %v17550_v42  ;;  %v17678_v42 = vpack.c.bf16 %v4595_v10, %v17088_v57  ;;  %v4603_v10 = vld [vmem:[#allocation2 + $0xa8] sm:$0xff] }
 0x33a   :  { %13687 = vmatprep.mubr.msk.bf16.mxu1 %vm324_vm2, %v17557_v36  ;;  %13700 = vmatpush3.bf16.msra.mxu1 %v15717_v16  ;;  %v15719_v16 = vld [vmem:[%s18720_s2 + $0x370] sm:$0xff]  }
 0x33b   :  { %13701 = vmatprep.subr.bf16.mxu1 %v15718_v33 }
 0x33e   :  { %13702 = vmatpush3.bf16.msra.mxu1 %v15718_v33  ;;  %v4597_v33 = vld [vmem:[#allocation2 + $0x50] sm:$0xff] }
 0x33f   :  { %13719 = vmatprep.subr.bf16.mxu1 %v15721_v25  ;;  %14304 = vmatmul.mubr.msk.bf16.vlgmr.msra.gmra.mrb[44].mxu0 %vm324_vm2, %v19130_v13  ;;  %v17690_v57 = vpack.c.bf16 %v4597_v33, %v17116_v35  ;;  %v4605_v35 = vld [vmem:[#allocation2 + $0xb8] sm:$0xff] }
 0x340   :  { %14320 = vmatpush3.bf16.msra.mxu0 %v15715_v40  ;;  %14307 = vmatprep.mubr.msk.bf16.mxu0 %vm324_vm2, %v17678_v42  ;;  %v19131_v40 = vld [vmem:[#allocation78_spill] sm:$0xff]  ;;  %v17712_v33 = vpack.c.bf16 %v4605_v35, %v17165_v53  ;;  %v15725_v53 = vld [vmem:[%s18720_s2 + $0x190] sm:$0xff]  }
 0x341   :  { %13688 = vmatmul.mubr.msk.bf16.gmra.mrb[0].mxu1 %vm324_vm2, %v17569_v38  ;;  %14321 = vmatprep.subr.bf16.mxu0 %v15716_v58  ;;  %v4773_v35 = vld [vmem:[#allocation2 + $0x41] sm:$0xff] }
 0x342   :  { %13691 = vmatprep.mubr.msk.bf16.mxu1 %vm324_vm2, %v17571_v3  ;;  %v17701_v3 = vpack.c.bf16 %v4603_v10, %v17143_v43  ;;  %v15722_v43 = vld [vmem:[%s18720_s2 + $0x188] sm:$0xff]   ;;  %v19133_v10 = vld [vmem:[#allocation84_spill] sm:$0xff] }
 0x344   :  { %14322 = vmatpush3.bf16.msra.mxu0 %v15716_v58  ;;  %v19132_v58 = vld [vmem:[#allocation80_spill] sm:$0xff] }
 0x345   :  { %14339 = vmatprep.subr.bf16.mxu0 %v15719_v16 }
 0x347   :  { %14308 = vmatmul.mubr.msk.bf16.gmra.mrb[48].mxu0 %vm324_vm2, %v17690_v57 }
 0x348   :  { %14311 = vmatprep.mubr.msk.bf16.mxu0 %vm324_vm2, %v19131_v40 }
 0x349   :  { %13692 = vmatmul.mubr.msk.bf16.gmra.mrb[4].mxu1 %vm324_vm2, %v17581_v21 }
 0x34a   :  { %13695 = vmatprep.mubr.msk.bf16.mxu1 %vm324_vm2, %v17583_v50 }
 0x34f   :  { %14312 = vmatmul.mubr.msk.bf16.gmra.mrb[52].mxu0 %vm324_vm2, %v19132_v58 }
 0x350   :  { %14315 = vmatprep.mubr.msk.bf16.mxu0 %vm324_vm2, %v17701_v3 }
 0x351   :  { %13696 = vmatmul.mubr.msk.bf16.gmra.mrb[8].mxu1 %vm324_vm2, %v17594_v59  ;;  %v17734_v59 = vpack.c.bf16 %v4773_v35, %v17188_v27  ;;  %v4781_v35 = vld [vmem:[#allocation2 + $0xa9] sm:$0xff] }
 0x352   :  { %13703 = vmatprep.mubr.msk.bf16.mxu1 %vm324_vm2, %v17596_v62  ;;  %v15720_v62 = vld [vmem:[%s18720_s2 + $0x378] sm:$0xff]  }
 0x357   :  { %14316 = vmatmul.mubr.msk.bf16.gmra.mrb[56].mxu0 %vm324_vm2, %v17712_v33 }
 0x358   :  { %14323 = vmatprep.mubr.msk.bf16.mxu0 %vm324_vm2, %v19133_v10 }
 0x359   :  { %13704 = vmatmul.mubr.msk.bf16.vlgmr.msra.gmra.mrb[12].mxu1 %vm324_vm2, %v17612_v4  ;;  %v19134_v4 = vld [vmem:[#allocation85_spill] sm:$0xff] }
 0x35a   :  { %13707 = vmatprep.mubr.msk.bf16.mxu1 %vm324_vm2, %v17619_v30  ;;  %13720 = vmatpush3.bf16.msra.mxu1 %v15721_v25  ;;  %v15723_v25 = vld [vmem:[%s18720_s2 + $0x380] sm:$0xff]  }
 0x35b   :  { %13721 = vmatprep.subr.bf16.mxu1 %v15722_v43 }
 0x35e   :  { %13722 = vmatpush3.bf16.msra.mxu1 %v15722_v43  ;;  %v4775_v43 = vld [vmem:[#allocation2 + $0x51] sm:$0xff] }
 0x35f   :  { %13739 = vmatprep.subr.bf16.mxu1 %v15725_v53  ;;  %14324 = vmatmul.mubr.msk.bf16.vlgmr.msra.gmra.mrb[44].mxu0 %vm324_vm2, %v19134_v4  ;;  %v4787_v27 = vpack.c.bf16 %v4775_v43, %v17212_v44  ;;  %v4783_v44 = vld [vmem:[#allocation2 + $0xb9] sm:$0xff] }
 0x360   :  { %14340 = vmatpush3.bf16.msra.mxu0 %v15719_v16  ;;  %14327 = vmatprep.mubr.msk.bf16.mxu0 %vm324_vm2, %v17734_v59  ;;  %v19135_v16 = vld [vmem:[#allocation90_spill] sm:$0xff]  ;;  %v19137_v43 = vld [vmem:[#allocation96_spill] sm:$0xff] }
 0x361   :  { %13708 = vmatmul.mubr.msk.bf16.gmra.mrb[0].mxu1 %vm324_vm2, %v17631_v1  ;;  %14341 = vmatprep.subr.bf16.mxu0 %v15720_v62  ;;  %v19136_v1 = vld [vmem:[#allocation93_spill] sm:$0xff] }
 0x362   :  { %13711 = vmatprep.mubr.msk.bf16.mxu1 %vm324_vm2, %v17633_v7  ;;  %v17754_v7 = vpack.c.bf16 %v4781_v35, %v17229_v9  ;;  %v15726_v9 = vld [vmem:[%s18720_s2 + $0x198] sm:$0xff]   ;;  %v15724_v35 = vld [vmem:[%s18720_s2 + $0x388] sm:$0xff]  }
 0x364   :  { %14342 = vmatpush3.bf16.msra.mxu0 %v15720_v62  ;;  %v17765_v62 = vpack.c.bf16 %v4783_v44, %v17247_v31  ;;  %v15729_v31 = vld [vmem:[%s18720_s2 + $0x1a0] sm:$0xff]  }
 0x365   :  { %14359 = vmatprep.subr.bf16.mxu0 %v15723_v25 }
 0x367   :  { %14328 = vmatmul.mubr.msk.bf16.gmra.mrb[48].mxu0 %vm324_vm2, %v4787_v27 }
 0x368   :  { %14331 = vmatprep.mubr.msk.bf16.mxu0 %vm324_vm2, %v19135_v16 }
 0x369   :  { %13712 = vmatmul.mubr.msk.bf16.gmra.mrb[4].mxu1 %vm324_vm2, %v17643_v29 }
 0x36a   :  { %13715 = vmatprep.mubr.msk.bf16.mxu1 %vm324_vm2, %v17645_v49 }
 0x36f   :  { %14332 = vmatmul.mubr.msk.bf16.gmra.mrb[52].mxu0 %vm324_vm2, %v19136_v1 }
 0x370   :  { %14335 = vmatprep.mubr.msk.bf16.mxu0 %vm324_vm2, %v17754_v7 }
 0x371   :  { %13716 = vmatmul.mubr.msk.bf16.gmra.mrb[8].mxu1 %vm324_vm2, %v17656_v60 }
 0x372   :  { %13723 = vmatprep.mubr.msk.bf16.mxu1 %vm324_vm2, %v19129_v19  ;;  %v4951_v19 = vld [vmem:[#allocation2 + $0x42] sm:$0xff] }
 0x373   :  { %v4964_v44 = vpack.c.bf16 %v4951_v19, %v17270_v37  ;;  %v19139_v37 = vld [vmem:[#allocation102_spill] sm:$0xff] }
 0x377   :  { %14336 = vmatmul.mubr.msk.bf16.gmra.mrb[56].mxu0 %vm324_vm2, %v17765_v62 }
 0x378   :  { %14343 = vmatprep.mubr.msk.bf16.mxu0 %vm324_vm2, %v19137_v43 }
 0x379   :  { %13724 = vmatmul.mubr.msk.bf16.vlgmr.msra.gmra.mrb[12].mxu1 %vm324_vm2, %v19130_v13  ;;  %v19138_v13 = vld [vmem:[#allocation98_spill] sm:$0xff] }
 0x37a   :  { %13727 = vmatprep.mubr.msk.bf16.mxu1 %vm324_vm2, %v17678_v42  ;;  %13740 = vmatpush3.bf16.msra.mxu1 %v15725_v53  ;;  %v15727_v42 = vld [vmem:[%s18720_s2 + $0x390] sm:$0xff]   ;;  %v4953_v53 = vld [vmem:[#allocation2 + $0x52] sm:$0xff] }
 0x37b   :  { %13741 = vmatprep.subr.bf16.mxu1 %v15726_v9 }
 0x37e   :  { %13742 = vmatpush3.bf16.msra.mxu1 %v15726_v9  ;;  %v17796_v9 = vpack.c.bf16 %v4953_v53, %v17294_v61  ;;  %v4961_v61 = vld [vmem:[#allocation2 + $0xba] sm:$0xff]  ;;  %v15735_v53 = vld [vmem:[%s18720_s2 + $0x3a0] sm:$0xff]  }
 0x37f   :  { %13759 = vmatprep.subr.bf16.mxu1 %v15729_v31  ;;  %14344 = vmatmul.mubr.msk.bf16.vlgmr.msra.gmra.mrb[44].mxu0 %vm324_vm2, %v19138_v13 }
 0x380   :  { %14360 = vmatpush3.bf16.msra.mxu0 %v15723_v25  ;;  %14347 = vmatprep.mubr.msk.bf16.mxu0 %vm324_vm2, %v4964_v44  ;;  %v19140_v25 = vld [vmem:[#allocation103_spill] sm:$0xff] }
 0x381   :  { %13728 = vmatmul.mubr.msk.bf16.gmra.mrb[0].mxu1 %vm324_vm2, %v17690_v57  ;;  %14361 = vmatprep.subr.bf16.mxu0 %v15724_v35  ;;  %v4959_v57 = vld [vmem:[#allocation2 + $0xaa] sm:$0xff] }
 0x382   :  { %13731 = vmatprep.mubr.msk.bf16.mxu1 %vm324_vm2, %v19131_v40  ;;  %v17807_v40 = vpack.c.bf16 %v4959_v57, %v17311_v15  ;;  %v15730_v15 = vld [vmem:[%s18720_s2 + $0x1a8] sm:$0xff]  }
 0x383   :  { %v5309_v57 = vld [vmem:[#allocation2 + $0x54] sm:$0xff] }
 0x384   :  { %14362 = vmatpush3.bf16.msra.mxu0 %v15724_v35  ;;  %v5307_v35 = vld [vmem:[#allocation2 + $0x44] sm:$0xff] }
 0x385   :  { %14379 = vmatprep.subr.bf16.mxu0 %v15727_v42 }
 0x387   :  { %14348 = vmatmul.mubr.msk.bf16.gmra.mrb[48].mxu0 %vm324_vm2, %v17796_v9 }
 0x388   :  { %14351 = vmatprep.mubr.msk.bf16.mxu0 %vm324_vm2, %v19139_v37 }
 0x389   :  { %13732 = vmatmul.mubr.msk.bf16.gmra.mrb[4].mxu1 %vm324_vm2, %v19132_v58  ;;  %v17818_v58 = vpack.c.bf16 %v4961_v61, %v17329_v54  ;;  %v15733_v54 = vld [vmem:[%s18720_s2 + $0x1b0] sm:$0xff]   ;;  %v5321_v61 = vpack.c.bf16 %v5309_v57, %v17435_v11 }
 0x38a   :  { %13735 = vmatprep.mubr.msk.bf16.mxu1 %vm324_vm2, %v17701_v3  ;;  %v19141_v3 = vld [vmem:[#allocation105_spill] sm:$0xff]  ;;  %v5317_v11 = vld [vmem:[#allocation2 + $0xbc] sm:$0xff] }
 0x38f   :  { %14352 = vmatmul.mubr.msk.bf16.gmra.mrb[52].mxu0 %vm324_vm2, %v19140_v25 }
 0x390   :  { %14355 = vmatprep.mubr.msk.bf16.mxu0 %vm324_vm2, %v17807_v40 }
 0x391   :  { %13736 = vmatmul.mubr.msk.bf16.gmra.mrb[8].mxu1 %vm324_vm2, %v17712_v33  ;;  %v15728_v33 = vld [vmem:[%s18720_s2 + $0x398] sm:$0xff]  }
 0x392   :  { %13743 = vmatprep.mubr.msk.bf16.mxu1 %vm324_vm2, %v19133_v10  ;;  %v19142_v10 = vld [vmem:[#allocation106_spill] sm:$0xff] }
 0x397   :  { %14356 = vmatmul.mubr.msk.bf16.gmra.mrb[56].mxu0 %vm324_vm2, %v17818_v58 }
 0x398   :  { %14363 = vmatprep.mubr.msk.bf16.mxu0 %vm324_vm2, %v19141_v3 }
 0x399   :  { %13744 = vmatmul.mubr.msk.bf16.vlgmr.msra.gmra.mrb[12].mxu1 %vm324_vm2, %v19134_v4  ;;  %v15731_v4 = vld [vmem:[%s18720_s2 + $0x3b0] sm:$0xff]  }
 0x39a   :  { %13747 = vmatprep.mubr.msk.bf16.mxu1 %vm324_vm2, %v17734_v59  ;;  %13760 = vmatpush3.bf16.msra.mxu1 %v15729_v31  ;;  %v19143_v59 = vld [vmem:[#allocation107_spill] sm:$0xff] }
 0x39b   :  { %13761 = vmatprep.subr.bf16.mxu1 %v15730_v15  ;;  %v5131_v31 = vld [vmem:[#allocation2 + $0x53] sm:$0xff] }
 0x39c   :  { %v17848_v19 = vpack.c.bf16 %v5131_v31, %v17370_v32  ;;  %v5139_v32 = vld [vmem:[#allocation2 + $0xbb] sm:$0xff]  ;;  %v5486_v31 = vld [vmem:[#allocation2 + $0x4d] sm:$0xff] }
 0x39e   :  { %13762 = vmatpush3.bf16.msra.mxu1 %v15730_v15  ;;  %v5485_v15 = vld [vmem:[#allocation2 + $0x45] sm:$0xff] }
 0x39f   :  { %13779 = vmatprep.subr.bf16.mxu1 %v15733_v54  ;;  %14364 = vmatmul.mubr.msk.bf16.vlgmr.msra.gmra.mrb[44].mxu0 %vm324_vm2, %v19142_v10 }
 0x3a0   :  { %14380 = vmatpush3.bf16.msra.mxu0 %v15727_v42  ;;  %14367 = vmatprep.mubr.msk.bf16.mxu0 %vm324_vm2, %v19143_v59 }
 0x3a1   :  { %13748 = vmatmul.mubr.msk.bf16.gmra.mrb[0].mxu1 %vm324_vm2, %v4787_v27  ;;  %14381 = vmatprep.subr.bf16.mxu0 %v15728_v33  ;;  %v17867_v27 = vpack.c.bf16 %v5139_v32, %v17397_v8  ;;  %v5304_v8 = vld [vmem:[#allocation2 + $0x2c] sm:$0xff] }
 0x3a2   :  { %13751 = vmatprep.mubr.msk.bf16.mxu1 %vm324_vm2, %v19135_v16  ;;  %v5489_v32 = vld [vmem:[#allocation2 + $0x8d] sm:$0xff] }
 0x3a4   :  { %14382 = vmatpush3.bf16.msra.mxu0 %v15728_v33  ;;  %v19149_v33 = vld [vmem:[#allocation33_spill] sm:$0xff] }
 0x3a5   :  { %14399 = vmatprep.subr.bf16.mxu0 %v15731_v4 }
 0x3a7   :  { %14368 = vmatmul.mubr.msk.bf16.gmra.mrb[48].mxu0 %vm324_vm2, %v17848_v19 }
 0x3a8   :  { %14371 = vmatprep.mubr.msk.bf16.mxu0 %vm324_vm2, %v16530_v41 }
 0x3a9   :  { %13752 = vmatmul.mubr.msk.bf16.gmra.mrb[4].mxu1 %vm324_vm2, %v19136_v1  ;;  %v5303_v1 = vld [vmem:[#allocation2 + $0x24] sm:$0xff] }
 0x3aa   :  { %13755 = vmatprep.mubr.msk.bf16.mxu1 %vm324_vm2, %v17754_v7  ;;  %v17870_v16 = vpack.c.bf16 %v5303_v1, %v17399_v2  ;;  %v15734_v7 = vld [vmem:[%s18720_s2 + $0x1b8] sm:$0xff]   ;;  %v15737_v2 = vld [vmem:[%s18720_s2 + $0x1c0] sm:$0xff]  }
 0x3af   :  { %14372 = vmatmul.mubr.msk.bf16.gmra.mrb[52].mxu0 %vm324_vm2, %v16532_v63 }
 0x3b0   :  { %14375 = vmatprep.mubr.msk.bf16.mxu0 %vm324_vm2, %v16534_v39 }
 0x3b1   :  { %13756 = vmatmul.mubr.msk.bf16.gmra.mrb[8].mxu1 %vm324_vm2, %v17765_v62  ;;  %v5305_v62 = vld [vmem:[#allocation2 + $0x34] sm:$0xff] }
 0x3b2   :  { %13763 = vmatprep.mubr.msk.bf16.mxu1 %vm324_vm2, %v19137_v43  ;;  %v5306_v43 = vld [vmem:[#allocation2 + $0x3c] sm:$0xff]  ;;  %v5319_v42 = vpack.c.bf16 %v5305_v62, %v5304_v8  ;;  %v19152_v62 = vld [vmem:[#allocation25_spill] sm:$0xff] }
 0x3b7   :  { %14376 = vmatmul.mubr.msk.bf16.gmra.mrb[56].mxu0 %vm324_vm2, %v17867_v27 }
 0x3b8   :  { %14383 = vmatprep.mubr.msk.bf16.mxu0 %vm324_vm2, %v17870_v16 }
 0x3b9   :  { %13764 = vmatmul.mubr.msk.bf16.vlgmr.msra.gmra.mrb[12].mxu1 %vm324_vm2, %v19138_v13  ;;  %v15732_v13 = vld [vmem:[%s18720_s2 + $0x3b8] sm:$0xff]  }
 0x3ba   :  { %13767 = vmatprep.mubr.msk.bf16.mxu1 %vm324_vm2, %v4964_v44  ;;  %13780 = vmatpush3.bf16.msra.mxu1 %v15733_v54  ;;  %v5320_v44 = vpack.c.bf16 %v5307_v35, %v5306_v43  ;;  %v15746_v54 = vld [vmem:[%s18720_s2 + $0x1e8] sm:$0xff]   ;;  %v5493_v35 = vld [vmem:[#allocation2 + $0xad] sm:$0xff] }
 0x3bb   :  { %13781 = vmatprep.subr.bf16.mxu1 %v15734_v7  ;;  %v5491_v43 = vld [vmem:[#allocation2 + $0x9d] sm:$0xff] }
 0x3be   :  { %13782 = vmatpush3.bf16.msra.mxu1 %v15734_v7  ;;  %v19151_v7 = vld [vmem:[#allocation20_spill] sm:$0xff] }
 0x3bf   :  { %13799 = vmatprep.subr.bf16.mxu1 %v15737_v2  ;;  %14384 = vmatmul.mubr.msk.bf16.vlgmr.msra.gmra.mrb[44].mxu0 %vm324_vm2, %v5319_v42 }
 0x3c0   :  { %14400 = vmatpush3.bf16.msra.mxu0 %v15731_v4  ;;  %14387 = vmatprep.mubr.msk.bf16.mxu0 %vm324_vm2, %v5320_v44  ;;  %v15749_v4 = vld [vmem:[%s18720_s2 + $0x1f0] sm:$0xff]  }
 0x3c1   :  { %13768 = vmatmul.mubr.msk.bf16.gmra.mrb[0].mxu1 %vm324_vm2, %v17796_v9  ;;  %14401 = vmatprep.subr.bf16.mxu0 %v15732_v13  ;;  %v5315_v9 = vld [vmem:[#allocation2 + $0xac] sm:$0xff] }
 0x3c2   :  { %13771 = vmatprep.mubr.msk.bf16.mxu1 %vm324_vm2, %v19139_v37  ;;  %v5324_v37 = vpack.c.bf16 %v5315_v9, %v17451_v51  ;;  %v15736_v51 = vld [vmem:[%s18720_s2 + $0x3a8] sm:$0xff]  }
 0x3c3   :  { %v5494_v9 = vld [vmem:[#allocation2 + $0xb5] sm:$0xff] }
 0x3c4   :  { %14402 = vmatpush3.bf16.msra.mxu0 %v15732_v13 }
 0x3c5   :  { %14419 = vmatprep.subr.bf16.mxu0 %v15735_v53 }
 0x3c7   :  { %14388 = vmatmul.mubr.msk.bf16.gmra.mrb[48].mxu0 %vm324_vm2, %v5321_v61 }
 0x3c8   :  { %14391 = vmatprep.mubr.msk.bf16.mxu0 %vm324_vm2, %v16543_v47 }
 0x3c9   :  { %13772 = vmatmul.mubr.msk.bf16.gmra.mrb[4].mxu1 %vm324_vm2, %v19140_v25  ;;  %v5325_v25 = vpack.c.bf16 %v5317_v11, %v17466_v52  ;;  %v15741_v52 = vld [vmem:[%s18720_s2 + $0x1d0] sm:$0xff]  }
 0x3ca   :  { %13775 = vmatprep.mubr.msk.bf16.mxu1 %vm324_vm2, %v17807_v40  ;;  %v15738_v40 = vld [vmem:[%s18720_s2 + $0x1c8] sm:$0xff]  }
 0x3cb   :  { %v5658_v11 = vld [vmem:[#allocation2 + $0x1e] sm:$0xff] }
 0x3cf   :  { %14392 = vmatmul.mubr.msk.bf16.gmra.mrb[52].mxu0 %vm324_vm2, %v16545_v22 }
 0x3d0   :  { %14395 = vmatprep.mubr.msk.bf16.mxu0 %vm324_vm2, %v5324_v37 }
 0x3d1   :  { %13776 = vmatmul.mubr.msk.bf16.gmra.mrb[8].mxu1 %vm324_vm2, %v17818_v58  ;;  %v5484_v58 = vld [vmem:[#allocation2 + $0x3d] sm:$0xff] }
 0x3d2   :  { %13783 = vmatprep.mubr.msk.bf16.mxu1 %vm324_vm2, %v19141_v3 }
 0x3d7   :  { %14396 = vmatmul.mubr.msk.bf16.gmra.mrb[56].mxu0 %vm324_vm2, %v5325_v25 }
 0x3d8   :  { %14403 = vmatprep.mubr.msk.bf16.mxu0 %vm324_vm2, %v17066_v0  ;;  %v15739_v0 = vld [vmem:[%s18720_s2 + $0x3c0] sm:$0xff]  }
 0x3d9   :  { %13784 = vmatmul.mubr.msk.bf16.vlgmr.msra.gmra.mrb[12].mxu1 %vm324_vm2, %v19142_v10  ;;  %v5498_v10 = vpack.c.bf16 %v5485_v15, %v5484_v58  ;;  %v5666_v58 = vld [vmem:[#allocation2 + $0x86] sm:$0xff]  ;;  %v15748_v15 = vld [vmem:[%s18720_s2 + $0x3e8] sm:$0xff]  }
 0x3da   :  { %13787 = vmatprep.mubr.msk.bf16.mxu1 %vm324_vm2, %v19143_v59  ;;  %13800 = vmatpush3.bf16.msra.mxu1 %v15737_v2  ;;  %v19150_v59 = vld [vmem:[#allocation21_spill] sm:$0xff]  ;;  %v15747_v2 = vld [vmem:[%s18720_s2 + $0x3e0] sm:$0xff]  }
 0x3db   :  { %13801 = vmatprep.subr.bf16.mxu1 %v15738_v40 }
 0x3de   :  { %13802 = vmatpush3.bf16.msra.mxu1 %v15738_v40 }
 0x3df   :  { %13819 = vmatprep.subr.bf16.mxu1 %v15741_v52  ;;  %14404 = vmatmul.mubr.msk.bf16.vlgmr.msra.gmra.mrb[60].mxu0 %vm324_vm2, %v17094_v55  ;;  %v15743_v55 = vld [vmem:[%s18720_s2 + $0x3d0] sm:$0xff]  }
 0x3e0   :  { %14420 = vmatpush3.bf16.msra.mxu0 %v15735_v53  ;;  %14407 = vmatprep.mubr.msk.bf16.mxu0 %vm324_vm2, %v17103_v26  ;;  %v19145_v26 = vld [vmem:[#allocation28_spill] sm:$0xff]  ;;  %v19153_v53 = vld [vmem:[#allocation19_spill] sm:$0xff] }
 0x3e1   :  { %13788 = vmatmul.mubr.msk.bf16.gmra.mrb[0].mxu1 %vm324_vm2, %v17848_v19  ;;  %14421 = vmatprep.subr.bf16.mxu0 %v15736_v51  ;;  %v5487_v19 = vld [vmem:[#allocation2 + $0x55] sm:$0xff] }
 0x3e2   :  { %13791 = vmatprep.mubr.msk.bf16.mxu1 %vm324_vm2, %v16530_v41  ;;  %v15742_v41 = vld [vmem:[%s18720_s2 + $0x1d8] sm:$0xff]   ;;  %v5499_v1 = vpack.c.bf16 %v5487_v19, %v5486_v31  ;;  %v5668_v31 = vld [vmem:[#allocation2 + $0x96] sm:$0xff] }
 0x3e4   :  { %14422 = vmatpush3.bf16.msra.mxu0 %v15736_v51 }
 0x3e5   :  { %14439 = vmatprep.subr.bf16.mxu0 %v15739_v0 }
 0x3e7   :  { %14408 = vmatmul.mubr.msk.bf16.gmra.mrb[64].mxu0 %vm324_vm2, %v17126_v18  ;;  %v5481_v18 = vld [vmem:[#allocation2 + $0x25] sm:$0xff] }
 0x3e8   :  { %14411 = vmatprep.mubr.msk.bf16.mxu0 %vm324_vm2, %v17129_v14  ;;  %v19147_v14 = vld [vmem:[#allocation66_spill] sm:$0xff] }
 0x3e9   :  { %13792 = vmatmul.mubr.msk.bf16.gmra.mrb[4].mxu1 %vm324_vm2, %v16532_v63  ;;  %v15740_v63 = vld [vmem:[%s18720_s2 + $0x3c8] sm:$0xff]  }
 0x3ea   :  { %13795 = vmatprep.mubr.msk.bf16.mxu1 %vm324_vm2, %v16534_v39  ;;  %v15745_v39 = vld [vmem:[%s18720_s2 + $0x1e0] sm:$0xff]  }
 0x3ef   :  { %14412 = vmatmul.mubr.msk.bf16.gmra.mrb[68].mxu0 %vm324_vm2, %v17151_v45 }
 0x3f0   :  { %14415 = vmatprep.mubr.msk.bf16.mxu0 %vm324_vm2, %v17155_v24  ;;  %v19148_v24 = vld [vmem:[#allocation67_spill] sm:$0xff] }
 0x3f1   :  { %13796 = vmatmul.mubr.msk.bf16.gmra.mrb[8].mxu1 %vm324_vm2, %v17867_v27  ;;  %v5488_v27 = vld [vmem:[#allocation2 + $0x85] sm:$0xff] }
 0x3f2   :  { %13803 = vmatprep.mubr.msk.bf16.mxu1 %vm324_vm2, %v17870_v16  ;;  %v15744_v16 = vld [vmem:[%s18720_s2 + $0x3d8] sm:$0xff]   ;;  %v5500_v8 = vpack.c.bf16 %v5489_v32, %v5488_v27 }
 0x3f3   :  { %v5670_v32 = vld [vmem:[#allocation2 + $0xa6] sm:$0xff] }
 0x3f7   :  { %14416 = vmatmul.mubr.msk.bf16.gmra.mrb[72].mxu0 %vm324_vm2, %v17169_v6  ;;  %v5482_v6 = vld [vmem:[#allocation2 + $0x2d] sm:$0xff] }
 0x3f8   :  { %14423 = vmatprep.mubr.msk.bf16.mxu0 %vm324_vm2, %v19040_v12  ;;  %v19144_v12 = vld [vmem:[#allocation36_spill] sm:$0xff] }
 0x3f9   :  { %13804 = vmatmul.mubr.msk.bf16.vlgmr.msra.gmra.mrb[12].mxu1 %vm324_vm2, %v5319_v42  ;;  %v5490_v42 = vld [vmem:[#allocation2 + $0x95] sm:$0xff] }
 0x3fa   :  { %13807 = vmatprep.mubr.msk.bf16.mxu1 %vm324_vm2, %v5320_v44  ;;  %13820 = vmatpush3.bf16.msra.mxu1 %v15741_v52  ;;  %v5501_v13 = vpack.c.bf16 %v5491_v43, %v5490_v42  ;;  %v5492_v44 = vld [vmem:[#allocation2 + $0xa5] sm:$0xff] }
 0x3fb   :  { %13821 = vmatprep.subr.bf16.mxu1 %v15742_v41  ;;  %v5502_v57 = vpack.c.bf16 %v5493_v35, %v5492_v44  ;;  %v19155_v52 = vld [vmem:[#allocation45_spill] sm:$0xff]  ;;  %v19163_v35 = vld [vmem:[#allocation56_spill] sm:$0xff] }
 0x3fc   :  { %v5838_v44 = vld [vmem:[#allocation2 + $0x2f] sm:$0xff] }
 0x3fe   :  { %13822 = vmatpush3.bf16.msra.mxu1 %v15742_v41  ;;  %v5660_v41 = vld [vmem:[#allocation2 + $0x2e] sm:$0xff] }
 0x3ff   :  { %13839 = vmatprep.subr.bf16.mxu1 %v15745_v39  ;;  %14424 = vmatmul.mubr.msk.bf16.vlgmr.msra.gmra.mrb[60].mxu0 %vm324_vm2, %v19041_v17  ;;  %v19146_v17 = vld [vmem:[#allocation65_spill] sm:$0xff] }
 0x400   :  { %14440 = vmatpush3.bf16.msra.mxu0 %v15739_v0  ;;  %14427 = vmatprep.mubr.msk.bf16.mxu0 %vm324_vm2, %v19144_v12  ;;  %v19156_v0 = vld [vmem:[#allocation26_spill] sm:$0xff]  ;;  %v5663_v12 = vld [vmem:[#allocation2 + $0x46] sm:$0xff] }
 0x401   :  { %13808 = vmatmul.mubr.msk.bf16.gmra.mrb[0].mxu1 %vm324_vm2, %v5321_v61  ;;  %14441 = vmatprep.subr.bf16.mxu0 %v15740_v63  ;;  %v19154_v61 = vld [vmem:[#allocation46_spill] sm:$0xff] }
 0x402   :  { %13811 = vmatprep.mubr.msk.bf16.mxu1 %vm324_vm2, %v16543_v47  ;;  %v5480_v47 = vld [vmem:[#allocation2 + $0x1d] sm:$0xff] }
 0x403   :  { %v5496_v45 = vpack.c.bf16 %v5481_v18, %v5480_v47  ;;  %v19158_v18 = vld [vmem:[#allocation47_spill] sm:$0xff] }
 0x404   :  { %14442 = vmatpush3.bf16.msra.mxu0 %v15740_v63  ;;  %v5662_v63 = vld [vmem:[#allocation2 + $0x3e] sm:$0xff] }
 0x405   :  { %14459 = vmatprep.subr.bf16.mxu0 %v15743_v55  ;;  %v5676_v47 = vpack.c.bf16 %v5663_v12, %v5662_v63  ;;  %v5844_v63 = vld [vmem:[#allocation2 + $0x87] sm:$0xff] }
 0x406   :  { %v15752_v12 = vld [vmem:[%s18720_s2 + $0x3f8] sm:$0xff]  }
 0x407   :  { %14428 = vmatmul.mubr.msk.bf16.gmra.mrb[64].mxu0 %vm324_vm2, %v19145_v26  ;;  %v15750_v26 = vld [vmem:[%s18720_s2 + $0x1f8] sm:$0xff]  }
 0x408   :  { %14431 = vmatprep.mubr.msk.bf16.mxu0 %vm324_vm2, %v19146_v17  ;;  %v19157_v17 = vld [vmem:[#allocation51_spill] sm:$0xff] }
 0x409   :  { %13812 = vmatmul.mubr.msk.bf16.gmra.mrb[4].mxu1 %vm324_vm2, %v16545_v22  ;;  %v5483_v22 = vld [vmem:[#allocation2 + $0x35] sm:$0xff] }
 0x40a   :  { %13815 = vmatprep.mubr.msk.bf16.mxu1 %vm324_vm2, %v5324_v37  ;;  %v5497_v3 = vpack.c.bf16 %v5483_v22, %v5482_v6  ;;  %v5495_v37 = vld [vmem:[#allocation2 + $0xbd] sm:$0xff]  ;;  %v5667_v6 = vld [vmem:[#allocation2 + $0x8e] sm:$0xff] }
 0x40b   :  { %v5503_v40 = vpack.c.bf16 %v5495_v37, %v5494_v9  ;;  %v15754_v37 = vld [vmem:[%s18720_s2 + $0x208] sm:$0xff]  }
 0x40f   :  { %14432 = vmatmul.mubr.msk.bf16.gmra.mrb[68].mxu0 %vm324_vm2, %v19147_v14  ;;  %v15753_v14 = vld [vmem:[%s18720_s2 + $0x200] sm:$0xff]  }
 0x410   :  { %14435 = vmatprep.mubr.msk.bf16.mxu0 %vm324_vm2, %v19148_v24  ;;  %v5665_v24 = vld [vmem:[#allocation2 + $0x56] sm:$0xff] }
 0x411   :  { %13816 = vmatmul.mubr.msk.bf16.gmra.mrb[8].mxu1 %vm324_vm2, %v5325_v25  ;;  %v5659_v25 = vld [vmem:[#allocation2 + $0x26] sm:$0xff] }
 0x412   :  { %13823 = vmatprep.mubr.msk.bf16.mxu1 %vm324_vm2, %v5496_v45  ;;  %v5674_v51 = vpack.c.bf16 %v5659_v25, %v5658_v11  ;;  %v5664_v45 = vld [vmem:[#allocation2 + $0x4e] sm:$0xff] }
 0x413   :  { %v5677_v22 = vpack.c.bf16 %v5665_v24, %v5664_v45  ;;  %v19165_v11 = vld [vmem:[#allocation38_spill] sm:$0xff] }
 0x414   :  { %v5846_v45 = vld [vmem:[#allocation2 + $0x97] sm:$0xff] }
 0x417   :  { %14436 = vmatmul.mubr.msk.bf16.gmra.mrb[72].mxu0 %vm324_vm2, %v19149_v33  ;;  %v19160_v33 = vld [vmem:[#allocation57_spill] sm:$0xff] }
 0x418   :  { %14443 = vmatprep.mubr.msk.bf16.mxu0 %vm324_vm2, %v19150_v59  ;;  %v5669_v59 = vld [vmem:[#allocation2 + $0x9e] sm:$0xff] }
 0x419   :  { %13824 = vmatmul.mubr.msk.bf16.vlgmr.msra.gmra.mrb[12].mxu1 %vm324_vm2, %v5497_v3  ;;  %v19159_v3 = vld [vmem:[#allocation50_spill] sm:$0xff]  ;;  %v5679_v19 = vpack.c.bf16 %v5669_v59, %v5668_v31  ;;  %v19170_v59 = vld [vmem:[#allocation48_spill] sm:$0xff] }
 0x41a   :  { %13827 = vmatprep.mubr.msk.bf16.mxu1 %vm324_vm2, %v5498_v10  ;;  %13840 = vmatpush3.bf16.msra.mxu1 %v15745_v39  ;;  %v5661_v39 = vld [vmem:[#allocation2 + $0x36] sm:$0xff]  ;;  %v15751_v10 = vld [vmem:[%s18720_s2 + $0x3f0] sm:$0xff]  }
 0x41b   :  { %13841 = vmatprep.subr.bf16.mxu1 %v15746_v54  ;;  %v6016_v31 = vld [vmem:[#allocation2 + $0x30] sm:$0xff] }
 0x41e   :  { %13842 = vmatpush3.bf16.msra.mxu1 %v15746_v54  ;;  %v5678_v54 = vpack.c.bf16 %v5667_v6, %v5666_v58  ;;  %v5848_v6 = vld [vmem:[#allocation2 + $0xa7] sm:$0xff]  ;;  %v19169_v58 = vld [vmem:[#allocation42_spill] sm:$0xff] }
 0x41f   :  { %13859 = vmatprep.subr.bf16.mxu1 %v15749_v4  ;;  %14444 = vmatmul.mubr.msk.bf16.vlgmr.msra.gmra.mrb[60].mxu0 %vm324_vm2, %v19151_v7  ;;  %v5672_v7 = vld [vmem:[#allocation2 + $0xb6] sm:$0xff] }
 0x420   :  { %14460 = vmatpush3.bf16.msra.mxu0 %v15743_v55  ;;  %14447 = vmatprep.mubr.msk.bf16.mxu0 %vm324_vm2, %v19152_v62  ;;  %v5675_v55 = vpack.c.bf16 %v5661_v39, %v5660_v41  ;;  %v5836_v62 = vld [vmem:[#allocation2 + $0x1f] sm:$0xff]  ;;  %v5845_v41 = vld [vmem:[#allocation2 + $0x8f] sm:$0xff] }
 0x421   :  { %13828 = vmatmul.mubr.msk.bf16.gmra.mrb[0].mxu1 %vm324_vm2, %v5499_v1  ;;  %14461 = vmatprep.subr.bf16.mxu0 %v15744_v16  ;;  %v19161_v1 = vld [vmem:[#allocation52_spill] sm:$0xff] }
 0x422   :  { %13831 = vmatprep.mubr.msk.bf16.mxu1 %vm324_vm2, %v5500_v8  ;;  %v5673_v8 = vld [vmem:[#allocation2 + $0xbe] sm:$0xff] }
 0x423   :  { %v5681_v43 = vpack.c.bf16 %v5673_v8, %v5672_v7  ;;  %v19172_v8 = vld [vmem:[#allocation61_spill] sm:$0xff] }
 0x424   :  { %14462 = vmatpush3.bf16.msra.mxu0 %v15744_v16  ;;  %v19162_v16 = vld [vmem:[#allocation58_spill] sm:$0xff] }
 0x425   :  { %14479 = vmatprep.subr.bf16.mxu0 %v15747_v2 }
 0x427   :  { %14448 = vmatmul.mubr.msk.bf16.gmra.mrb[64].mxu0 %vm324_vm2, %v19153_v53  ;;  %v5839_v53 = vld [vmem:[#allocation2 + $0x37] sm:$0xff] }
 0x428   :  { %14451 = vmatprep.mubr.msk.bf16.mxu0 %vm324_vm2, %v19154_v61  ;;  %v5841_v61 = vld [vmem:[#allocation2 + $0x47] sm:$0xff]  ;;  %v5853_v9 = vpack.c.bf16 %v5839_v53, %v5838_v44  ;;  %v19173_v44 = vld [vmem:[#allocation43_spill] sm:$0xff] }
 0x429   :  { %13832 = vmatmul.mubr.msk.bf16.gmra.mrb[4].mxu1 %vm324_vm2, %v5501_v13  ;;  %v19164_v13 = vld [vmem:[#allocation63_spill] sm:$0xff] }
 0x42a   :  { %13835 = vmatprep.mubr.msk.bf16.mxu1 %vm324_vm2, %v5502_v57  ;;  %v5840_v57 = vld [vmem:[#allocation2 + $0x3f] sm:$0xff] }
 0x42b   :  { %v5854_v25 = vpack.c.bf16 %v5841_v61, %v5840_v57  ;;  %v19174_v57 = vld [vmem:[#allocation44_spill] sm:$0xff] }
 0x42c   :  { %v18127_v61 = vld [vmem:[%s18720_s2 + $0x410] sm:$0xff]  }
 0x42f   :  { %14452 = vmatmul.mubr.msk.bf16.gmra.mrb[68].mxu0 %vm324_vm2, %v19155_v52  ;;  %v15757_v52 = vld [vmem:[%s18720_s2 + $0x210] sm:$0xff]  }
 0x430   :  { %14455 = vmatprep.mubr.msk.bf16.mxu0 %vm324_vm2, %v19156_v0  ;;  %v5843_v0 = vld [vmem:[#allocation2 + $0x57] sm:$0xff] }
 0x431   :  { %13836 = vmatmul.mubr.msk.bf16.gmra.mrb[8].mxu1 %vm324_vm2, %v5503_v40  ;;  %v19166_v40 = vld [vmem:[#allocation39_spill] sm:$0xff] }
 0x432   :  { %13843 = vmatprep.mubr.msk.bf16.mxu1 %vm324_vm2, %v5674_v51  ;;  %v5842_v51 = vld [vmem:[#allocation2 + $0x4f] sm:$0xff] }
 0x433   :  { %v5855_v39 = vpack.c.bf16 %v5843_v0, %v5842_v51  ;;  %v19175_v51 = vld [vmem:[#allocation60_spill] sm:$0xff]  ;;  %v6028_v0 = vld [vmem:[#allocation2 + $0xb8] sm:$0xff] }
 0x437   :  { %14456 = vmatmul.mubr.msk.bf16.gmra.mrb[72].mxu0 %vm324_vm2, %v19157_v17  ;;  %v19168_v17 = vld [vmem:[#allocation41_spill] sm:$0xff] }
 0x438   :  { %14463 = vmatprep.mubr.msk.bf16.mxu0 %vm324_vm2, %v19158_v18  ;;  %v5847_v18 = vld [vmem:[#allocation2 + $0x9f] sm:$0xff] }
 0x439   :  { %13844 = vmatmul.mubr.msk.bf16.vlgmr.msra.gmra.mrb[12].mxu1 %vm324_vm2, %v5675_v55  ;;  %v19167_v55 = vld [vmem:[#allocation40_spill] sm:$0xff]  ;;  %v5857_v24 = vpack.c.bf16 %v5847_v18, %v5846_v45  ;;  %v6197_v45 = vld [vmem:[#allocation2 + $0x49] sm:$0xff] }
 0x43a   :  { %13847 = vmatprep.mubr.msk.bf16.mxu1 %vm324_vm2, %v5676_v47  ;;  %13860 = vmatpush3.bf16.msra.mxu1 %v15749_v4  ;;  %v5671_v4 = vld [vmem:[#allocation2 + $0xae] sm:$0xff]  ;;  %v6195_v18 = vld [vmem:[#allocation2 + $0x39] sm:$0xff] }
 0x43b   :  { %13861 = vmatprep.subr.bf16.mxu1 %v15750_v26  ;;  %v5680_v27 = vpack.c.bf16 %v5671_v4, %v5670_v32  ;;  %v15755_v47 = vld [vmem:[%s18720_s2 + $0x400] sm:$0xff]   ;;  %v6018_v32 = vld [vmem:[#allocation2 + $0x40] sm:$0xff] }
 0x43e   :  { %13862 = vmatpush3.bf16.msra.mxu1 %v15750_v26  ;;  %v5856_v26 = vpack.c.bf16 %v5845_v41, %v5844_v63  ;;  %v6029_v41 = vld [vmem:[#allocation2 + $0xc0] sm:$0xff] }
 0x43f   :  { %13879 = vmatprep.subr.bf16.mxu1 %v15753_v14  ;;  %14464 = vmatmul.mubr.msk.bf16.vlgmr.msra.gmra.mrb[60].mxu0 %vm324_vm2, %v19159_v3  ;;  %v5851_v3 = vld [vmem:[#allocation2 + $0xbf] sm:$0xff]  ;;  %v6037_v63 = vpack.c.bf16 %v6029_v41, %v6028_v0 }
 0x440   :  { %14480 = vmatpush3.bf16.msra.mxu0 %v15747_v2  ;;  %14467 = vmatprep.mubr.msk.bf16.mxu0 %vm324_vm2, %v19160_v33  ;;  %v5837_v2 = vld [vmem:[#allocation2 + $0x27] sm:$0xff] }
 0x441   :  { %13848 = vmatmul.mubr.msk.bf16.gmra.mrb[0].mxu1 %vm324_vm2, %v5677_v22  ;;  %14481 = vmatprep.subr.bf16.mxu0 %v15748_v15  ;;  %v5852_v42 = vpack.c.bf16 %v5837_v2, %v5836_v62  ;;  %v6015_v33 = vld [vmem:[#allocation2 + $0x28] sm:$0xff]  ;;  %v15761_v62 = vld [vmem:[%s18720_s2 + $0x220] sm:$0xff]  }
 0x442   :  { %13851 = vmatprep.mubr.msk.bf16.mxu1 %vm324_vm2, %v5678_v54  ;;  %v6014_v54 = vld [vmem:[#allocation2 + $0x20] sm:$0xff]  ;;  %v6020_v2 = vld [vmem:[#allocation2 + $0x50] sm:$0xff] }
 0x443   :  { %v6030_v4 = vpack.c.bf16 %v6015_v33, %v6014_v54  ;;  %v19178_v54 = vld [vmem:[#allocation24_spill] sm:$0xff] }
 0x444   :  { %14482 = vmatpush3.bf16.msra.mxu0 %v15748_v15  ;;  %v5850_v15 = vld [vmem:[#allocation2 + $0xb7] sm:$0xff]  ;;  %v6370_v41 = vld [vmem:[#allocation2 + $0x22] sm:$0xff] }
 0x445   :  { %14499 = vmatprep.subr.bf16.mxu0 %v15751_v10 }
 0x447   :  { %14468 = vmatmul.mubr.msk.bf16.gmra.mrb[64].mxu0 %vm324_vm2, %v19161_v1  ;;  %v6019_v1 = vld [vmem:[#allocation2 + $0x48] sm:$0xff] }
 0x448   :  { %14471 = vmatprep.mubr.msk.bf16.mxu0 %vm324_vm2, %v19162_v16  ;;  %v15758_v16 = vld [vmem:[%s18720_s2 + $0x218] sm:$0xff]   ;;  %v6032_v7 = vpack.c.bf16 %v6019_v1, %v6018_v32  ;;  %v6201_v32 = vld [vmem:[#allocation2 + $0x91] sm:$0xff] }
 0x449   :  { %13852 = vmatmul.mubr.msk.bf16.gmra.mrb[4].mxu1 %vm324_vm2, %v5679_v19  ;;  %v6017_v19 = vld [vmem:[#allocation2 + $0x38] sm:$0xff] }
 0x44a   :  { %13855 = vmatprep.mubr.msk.bf16.mxu1 %vm324_vm2, %v5680_v27  ;;  %v6031_v27 = vpack.c.bf16 %v6017_v19, %v6016_v31  ;;  %v6198_v31 = vld [vmem:[#allocation2 + $0x51] sm:$0xff]  ;;  %v6200_v19 = vld [vmem:[#allocation2 + $0x89] sm:$0xff] }
 0x44f   :  { %14472 = vmatmul.mubr.msk.bf16.gmra.mrb[68].mxu0 %vm324_vm2, %v19163_v35  ;;  %v6023_v35 = vld [vmem:[#allocation2 + $0x90] sm:$0xff] }
 0x450   :  { %14475 = vmatprep.mubr.msk.bf16.mxu0 %vm324_vm2, %v19164_v13  ;;  %v15756_v13 = vld [vmem:[%s18720_s2 + $0x408] sm:$0xff]  }
 0x451   :  { %13856 = vmatmul.mubr.msk.bf16.gmra.mrb[8].mxu1 %vm324_vm2, %v5681_v43  ;;  %v6021_v43 = vld [vmem:[#allocation2 + $0x58] sm:$0xff] }
 0x452   :  { %13863 = vmatprep.mubr.msk.bf16.mxu1 %vm324_vm2, %v5852_v42  ;;  %v6033_v42 = vpack.c.bf16 %v6021_v43, %v6020_v2 }
 0x457   :  { %14476 = vmatmul.mubr.msk.bf16.gmra.mrb[72].mxu0 %vm324_vm2, %v19165_v11  ;;  %v6024_v11 = vld [vmem:[#allocation2 + $0x98] sm:$0xff] }
 0x458   :  { %14483 = vmatprep.mubr.msk.bf16.mxu0 %vm324_vm2, %v19166_v40  ;;  %v6026_v40 = vld [vmem:[#allocation2 + $0xa8] sm:$0xff] }
 0x459   :  { %13864 = vmatmul.mubr.msk.bf16.vlgmr.msra.gmra.mrb[12].mxu1 %vm324_vm2, %v5853_v9  ;;  %v6025_v9 = vld [vmem:[#allocation2 + $0xa0] sm:$0xff] }
 0x45a   :  { %13867 = vmatprep.mubr.msk.bf16.mxu1 %vm324_vm2, %v5854_v25  ;;  %13880 = vmatpush3.bf16.msra.mxu1 %v15753_v14  ;;  %v5849_v14 = vld [vmem:[#allocation2 + $0xaf] sm:$0xff]  ;;  %v6035_v25 = vpack.c.bf16 %v6025_v9, %v6024_v11 }
 0x45b   :  { %13881 = vmatprep.subr.bf16.mxu1 %v15754_v37  ;;  %v5858_v22 = vpack.c.bf16 %v5849_v14, %v5848_v6  ;;  %v6194_v6 = vld [vmem:[#allocation2 + $0x31] sm:$0xff] }
 0x45c   :  { %v19181_v9 = vld [vmem:[#allocation62_spill] sm:$0xff] }
 0x45e   :  { %13882 = vmatpush3.bf16.msra.mxu1 %v15754_v37  ;;  %v6027_v37 = vld [vmem:[#allocation2 + $0xb0] sm:$0xff] }
 0x45f   :  { %13899 = vmatprep.subr.bf16.mxu1 %v15757_v52  ;;  %14484 = vmatmul.mubr.msk.bf16.vlgmr.msra.gmra.mrb[60].mxu0 %vm324_vm2, %v19167_v55  ;;  %v19176_v55 = vld [vmem:[#allocation11_spill] sm:$0xff] }
 0x460   :  { %14500 = vmatpush3.bf16.msra.mxu0 %v15751_v10  ;;  %14487 = vmatprep.mubr.msk.bf16.mxu0 %vm324_vm2, %v19168_v17  ;;  %v5859_v10 = vpack.c.bf16 %v5851_v3, %v5850_v15  ;;  %v15762_v3 = vld [vmem:[%s18720_s2 + $0x228] sm:$0xff]  }
 0x461   :  { %13868 = vmatmul.mubr.msk.bf16.gmra.mrb[0].mxu1 %vm324_vm2, %v5855_v39  ;;  %14501 = vmatprep.subr.bf16.mxu0 %v15752_v12  ;;  %v6193_v39 = vld [vmem:[#allocation2 + $0x29] sm:$0xff] }
 0x462   :  { %13871 = vmatprep.mubr.msk.bf16.mxu1 %vm324_vm2, %v5856_v26 }
 0x464   :  { %14502 = vmatpush3.bf16.msra.mxu0 %v15752_v12  ;;  %v6192_v12 = vld [vmem:[#allocation2 + $0x21] sm:$0xff] }
 0x465   :  { %14519 = vmatprep.subr.bf16.mxu0 %v15755_v47  ;;  %v6208_v26 = vpack.c.bf16 %v6193_v39, %v6192_v12  ;;  %v6373_v12 = vld [vmem:[#allocation2 + $0x3a] sm:$0xff] }
 0x467   :  { %14488 = vmatmul.mubr.msk.bf16.gmra.mrb[64].mxu0 %vm324_vm2, %v17373_v28  ;;  %v19171_v28 = vld [vmem:[#allocation54_spill] sm:$0xff] }
 0x468   :  { %14491 = vmatprep.mubr.msk.bf16.mxu0 %vm324_vm2, %v19169_v58  ;;  %v6196_v58 = vld [vmem:[#allocation2 + $0x41] sm:$0xff] }
 0x469   :  { %13872 = vmatmul.mubr.msk.bf16.gmra.mrb[4].mxu1 %vm324_vm2, %v5857_v24  ;;  %v6210_v15 = vpack.c.bf16 %v6197_v45, %v6196_v58  ;;  %v6378_v45 = vld [vmem:[#allocation2 + $0x8a] sm:$0xff] }
 0x46a   :  { %13875 = vmatprep.mubr.msk.bf16.mxu1 %vm324_vm2, %v5858_v22  ;;  %v6209_v22 = vpack.c.bf16 %v6195_v18, %v6194_v6  ;;  %v15767_v18 = vld [vmem:[%s18720_s2 + $0x240] sm:$0xff]  }
 0x46b   :  { %v6376_v6 = vld [vmem:[#allocation2 + $0x52] sm:$0xff] }
 0x46f   :  { %14492 = vmatmul.mubr.msk.bf16.gmra.mrb[68].mxu0 %vm324_vm2, %v19170_v59  ;;  %v18158_v59 = vld [vmem:[%s18720_s2 + $0x230] sm:$0xff]  }
 0x470   :  { %14495 = vmatprep.mubr.msk.bf16.mxu0 %vm324_vm2, %v19171_v28 }
 0x471   :  { %13876 = vmatmul.mubr.msk.bf16.gmra.mrb[8].mxu1 %vm324_vm2, %v5859_v10 }
 0x472   :  { %13883 = vmatprep.mubr.msk.bf16.mxu1 %vm324_vm2, %v6030_v4 }
 0x477   :  { %14496 = vmatmul.mubr.msk.bf16.gmra.mrb[72].mxu0 %vm324_vm2, %v17402_v34  ;;  %v6022_v34 = vld [vmem:[#allocation2 + $0x88] sm:$0xff] }
 0x478   :  { %14503 = vmatprep.mubr.msk.bf16.mxu0 %vm324_vm2, %v19172_v8  ;;  %v6034_v53 = vpack.c.bf16 %v6023_v35, %v6022_v34  ;;  %v19180_v8 = vld [vmem:[#allocation55_spill] sm:$0xff] }
 0x479   :  { %13884 = vmatmul.mubr.msk.bf16.vlgmr.msra.gmra.mrb[12].mxu1 %vm324_vm2, %v6031_v27  ;;  %v19179_v27 = vld [vmem:[#allocation49_spill] sm:$0xff]  ;;  %v6202_v35 = vld [vmem:[#allocation2 + $0x99] sm:$0xff] }
 0x47a   :  { %13887 = vmatprep.mubr.msk.bf16.mxu1 %vm324_vm2, %v6032_v7  ;;  %13900 = vmatpush3.bf16.msra.mxu1 %v15757_v52  ;;  %v6036_v52 = vpack.c.bf16 %v6027_v37, %v6026_v40  ;;  %v6212_v7 = vpack.c.bf16 %v6201_v32, %v6200_v19  ;;  %v6207_v40 = vld [vmem:[#allocation2 + $0xc1] sm:$0xff] }
 0x47b   :  { %13901 = vmatprep.subr.bf16.mxu1 %v15758_v16  ;;  %v6548_v32 = vld [vmem:[#allocation2 + $0x23] sm:$0xff] }
 0x47e   :  { %13902 = vmatpush3.bf16.msra.mxu1 %v15758_v16  ;;  %v15760_v16 = vld [vmem:[%s18720_s2 + $0x418] sm:$0xff]  }
 0x47f   :  { %13919 = vmatprep.subr.bf16.mxu1 %v15761_v62  ;;  %14504 = vmatmul.mubr.msk.bf16.vlgmr.msra.gmra.mrb[60].mxu0 %vm324_vm2, %v19173_v44  ;;  %v6205_v44 = vld [vmem:[#allocation2 + $0xb1] sm:$0xff] }
 0x480   :  { %14520 = vmatpush3.bf16.msra.mxu0 %v15755_v47  ;;  %14507 = vmatprep.mubr.msk.bf16.mxu0 %vm324_vm2, %v19174_v57 }
 0x481   :  { %13888 = vmatmul.mubr.msk.bf16.gmra.mrb[0].mxu1 %vm324_vm2, %v6033_v42  ;;  %14521 = vmatprep.subr.bf16.mxu0 %v15756_v13  ;;  %v6203_v42 = vld [vmem:[#allocation2 + $0xa1] sm:$0xff] }
 0x482   :  { %13891 = vmatprep.mubr.msk.bf16.mxu1 %vm324_vm2, %v6034_v53  ;;  %v6213_v57 = vpack.c.bf16 %v6203_v42, %v6202_v35  ;;  %v6555_v35 = vld [vmem:[#allocation2 + $0x5b] sm:$0xff]  ;;  %v6556_v42 = vld [vmem:[#allocation2 + $0x8b] sm:$0xff] }
 0x484   :  { %14522 = vmatpush3.bf16.msra.mxu0 %v15756_v13  ;;  %v6204_v13 = vld [vmem:[#allocation2 + $0xa9] sm:$0xff] }
 0x485   :  { %14539 = vmatprep.subr.bf16.mxu0 %v18127_v61 }
 0x487   :  { %14508 = vmatmul.mubr.msk.bf16.gmra.mrb[64].mxu0 %vm324_vm2, %v17439_v23  ;;  %v19177_v23 = vld [vmem:[#allocation18_spill] sm:$0xff] }
 0x488   :  { %14511 = vmatprep.mubr.msk.bf16.mxu0 %vm324_vm2, %v19175_v51  ;;  %v6371_v51 = vld [vmem:[#allocation2 + $0x2a] sm:$0xff] }
 0x489   :  { %13892 = vmatmul.mubr.msk.bf16.gmra.mrb[4].mxu1 %vm324_vm2, %v6035_v25  ;;  %v6206_v25 = vld [vmem:[#allocation2 + $0xb9] sm:$0xff]  ;;  %v6386_v39 = vpack.c.bf16 %v6371_v51, %v6370_v41  ;;  %v19188_v51 = vld [vmem:[#allocation30_spill] sm:$0xff]  ;;  %v10852_v41 = vld [vmem:[%s18718_s0 + $0x12] sm:$0xff] }
 0x48a   :  { %13895 = vmatprep.mubr.msk.bf16.mxu1 %vm324_vm2, %v6036_v52  ;;  %v6215_v0 = vpack.c.bf16 %v6207_v40, %v6206_v25  ;;  %v6561_v25 = vld [vmem:[#allocation2 + $0xb3] sm:$0xff] }
 0x48f   :  { %14512 = vmatmul.mubr.msk.bf16.gmra.mrb[68].mxu0 %vm324_vm2, %v19176_v55  ;;  %v6375_v55 = vld [vmem:[#allocation2 + $0x4a] sm:$0xff] }
 0x490   :  { %14515 = vmatprep.mubr.msk.bf16.mxu0 %vm324_vm2, %v19177_v23 }
 0x491   :  { %13896 = vmatmul.mubr.msk.bf16.gmra.mrb[8].mxu1 %vm324_vm2, %v6037_v63  ;;  %v19182_v63 = vld [vmem:[#allocation13_spill] sm:$0xff] }
 0x492   :  { %13903 = vmatprep.mubr.msk.bf16.mxu1 %vm324_vm2, %v6208_v26  ;;  %v14385_v17 = vpop.f32.mrb[44].mxu0  ;;  %v6372_v26 = vld [vmem:[#allocation2 + $0x32] sm:$0xff] }
 0x493   :  { %11191 = vrot.lane.b32.xlu1 %v14385_v17, %s15812_s27  ;;  %v9619_v47 = vpop.f32.mrb[45].mxu0  ;;  %v6387_v23 = vpack.c.bf16 %v6373_v12, %v6372_v26  ;;  %v6374_v17 = vld [vmem:[#allocation2 + $0x42] sm:$0xff]  ;;  %v6727_v12 = vld [vmem:[#allocation2 + $0x2c] sm:$0xff] }
 0x494   :  { %11187 = vrot.lane.b32.xlu0 %v9619_v47, %s15812_s27  ;;  %v14386_v14 = vpop.f32.mrb[46].mxu0  ;;  %v6388_v47 = vpack.c.bf16 %v6375_v55, %v6374_v17 }
 0x495   :  { %v9622_v24 = vpop.f32.mrb[47].mxu0 }
 0x497   :  { %14516 = vmatmul.mubr.msk.bf16.gmra.mrb[72].mxu0 %vm324_vm2, %v17470_v46  ;;  %11193 = vrot.lane.b32.xlu1 %v14386_v14, %s15812_s27  ;;  %v6199_v46 = vld [vmem:[#allocation2 + $0x59] sm:$0xff] }
 0x498   :  { %14523 = vmatprep.mubr.msk.bf16.mxu0 %vm324_vm2, %v19178_v54  ;;  %11189 = vrot.lane.b32.xlu0 %v9622_v24, %s15812_s27  ;;  %v6211_v1 = vpack.c.bf16 %v6199_v46, %v6198_v31  ;;  %v6377_v14 = vld [vmem:[#allocation2 + $0x5a] sm:$0xff]  ;;  %v6379_v24 = vld [vmem:[#allocation2 + $0x92] sm:$0xff]  ;;  %v6381_v54 = vld [vmem:[#allocation2 + $0xa2] sm:$0xff] }
 0x499   :  { %13904 = vmatmul.mubr.msk.bf16.vlgmr.msra.gmra.mrb[12].mxu1 %vm324_vm2, %v6209_v22  ;;  %v15764_v22 = vld [vmem:[%s18720_s2 + $0x428] sm:$0xff]   ;;  %v6390_v58 = vpack.c.bf16 %v6379_v24, %v6378_v45  ;;  %v6549_v31 = vld [vmem:[#allocation2 + $0x2b] sm:$0xff] }
 0x49a   :  { %13907 = vmatprep.mubr.msk.bf16.mxu1 %vm324_vm2, %v6210_v15  ;;  %v14389_v33 = vpop.f32.mrb[48].mxu0  ;;  %13920 = vmatpush3.bf16.msra.mxu1 %v15761_v62  ;;  %v18176_v62 = vld [vmem:[%s18720_s2 + $0x420] sm:$0xff]  }
 0x49b   :  { %v9635_v10 = vpop.f32.mrb[49].mxu0  ;;  %13921 = vmatprep.subr.bf16.mxu1 %v15762_v3  ;;  %v12464_v15 = vld [vmem:[%s18719_s1 + $0x4] sm:$0xf]  ;;  %v10853_v24 = vld [vmem:[%s18718_s0 + $0x1a] sm:$0xff] }
 0x49c   :  { %v14390_v4 = vpop.f32.mrb[50].mxu0  ;;  %11199 = vrot.lane.b32.xlu0 %v14389_v33, %s15812_s27  ;;  %v6382_v33 = vld [vmem:[#allocation2 + $0xaa] sm:$0xff] }
 0x49d   :  { %11201 = vrot.lane.b32.xlu1 %v14390_v4, %s15812_s27  ;;  %v9638_v28 = vpop.f32.mrb[51].mxu0  ;;  %v6384_v4 = vld [vmem:[#allocation2 + $0xba] sm:$0xff] }
 0x49e   :  { %13922 = vmatpush3.bf16.msra.mxu1 %v15762_v3  ;;  %v6380_v3 = vld [vmem:[#allocation2 + $0x9a] sm:$0xff] }
 0x49f   :  { %14524 = vmatmul.mubr.msk.bf16.vlgmr.msra.gmra.mrb[60].mxu0 %vm324_vm2, %v19179_v27  ;;  %13939 = vmatprep.subr.bf16.mxu1 %v18158_v59  ;;  %v6391_v46 = vpack.c.bf16 %v6381_v54, %v6380_v3  ;;  %v6553_v27 = vld [vmem:[#allocation2 + $0x4b] sm:$0xff] }
 0x4a0   :  { %14540 = vmatpush3.bf16.msra.mxu0 %v18127_v61  ;;  %14527 = vmatprep.mubr.msk.bf16.mxu0 %vm324_vm2, %v19180_v8  ;;  %v6214_v61 = vpack.c.bf16 %v6205_v44, %v6204_v13  ;;  %v6552_v8 = vld [vmem:[#allocation2 + $0x43] sm:$0xff]  ;;  %v6554_v13 = vld [vmem:[#allocation2 + $0x53] sm:$0xff] }
 0x4a1   :  { %13908 = vmatmul.mubr.msk.bf16.gmra.mrb[0].mxu1 %vm324_vm2, %v6211_v1  ;;  %11195 = vrot.lane.b32.xlu0 %v9635_v10, %s15812_s27  ;;  %v6383_v10 = vld [vmem:[#allocation2 + $0xb2] sm:$0xff]  ;;  %v6564_v1 = vpack.c.bf16 %v6549_v31, %v6548_v32  ;;  %v6567_v44 = vpack.c.bf16 %v6555_v35, %v6554_v13  ;;  %v6733_v31 = vld [vmem:[#allocation2 + $0x5c] sm:$0xff] }
 0x4a2   :  { %13911 = vmatprep.mubr.msk.bf16.mxu1 %vm324_vm2, %v6212_v7  ;;  %11197 = vrot.lane.b32.xlu1 %v9638_v28, %s15812_s27  ;;  %v14393_v2 = vpop.f32.mrb[52].mxu0  ;;  %v6385_v28 = vld [vmem:[#allocation2 + $0xc2] sm:$0xff]  ;;  %v10869_v54 = vld [vmem:[%s18718_s0 + $0x1c] sm:$0xff] }
 0x4a3   :  { %v9651_v43 = vpop.f32.mrb[53].mxu0  ;;  %14541 = vmatprep.subr.bf16.mxu0 %v15760_v16  ;;  %v6393_v19 = vpack.c.bf16 %v6385_v28, %v6384_v4  ;;  %v18330_v4 = vld [vmem:[%s18720_s2 + $0x260] sm:$0xff]  }
 0x4a4   :  { %v14394_v34 = vpop.f32.mrb[54].mxu0  ;;  %14542 = vmatpush3.bf16.msra.mxu0 %v15760_v16  ;;  %v6550_v16 = vld [vmem:[#allocation2 + $0x33] sm:$0xff] }
 0x4a5   :  { %11207 = vrot.lane.b32.xlu0 %v14393_v2, %s15812_s27  ;;  %v9654_v53 = vpop.f32.mrb[55].mxu0  ;;  %14559 = vmatprep.subr.bf16.mxu0 %v18176_v62  ;;  %v19185_v2 = vld [vmem:[#allocation53_spill] sm:$0xff]  ;;  %v6732_v28 = vld [vmem:[#allocation2 + $0x54] sm:$0xff] }
 0x4a6   :  { %11209 = vrot.lane.b32.xlu1 %v14394_v34, %s15812_s27  ;;  %v6557_v34 = vld [vmem:[#allocation2 + $0x93] sm:$0xff]  ;;  %v6745_v35 = vpack.c.bf16 %v6733_v31, %v6732_v28 }
 0x4a7   :  { %14528 = vmatmul.mubr.msk.bf16.gmra.mrb[64].mxu0 %vm324_vm2, %v17507_v48  ;;  %v6734_v32 = vld [vmem:[#allocation2 + $0x8c] sm:$0xff] }
 0x4a8   :  { %14531 = vmatprep.mubr.msk.bf16.mxu0 %vm324_vm2, %v19181_v9  ;;  %v6558_v9 = vld [vmem:[#allocation2 + $0x9b] sm:$0xff]  ;;  %v10849_v28 = vld [vmem:[%s18718_s0 + $0xa3] sm:$0xff] }
 0x4a9   :  { %13912 = vmatmul.mubr.msk.bf16.gmra.mrb[4].mxu1 %vm324_vm2, %v6213_v57  ;;  %11203 = vrot.lane.b32.xlu0 %v9651_v43, %s15812_s27  ;;  %v19186_v43 = vld [vmem:[#allocation59_spill] sm:$0xff]  ;;  %v6568_v57 = vpack.c.bf16 %v6557_v34, %v6556_v42  ;;  %v10844_v42 = vld [vmem:[%s18718_s0 + $0x7b] sm:$0xff] }
 0x4aa   :  { %13915 = vmatprep.mubr.msk.bf16.mxu1 %vm324_vm2, %v6214_v61  ;;  %11205 = vrot.lane.b32.xlu1 %v9654_v53, %s15812_s27  ;;  %v14397_v37 = vpop.f32.mrb[56].mxu0  ;;  %v19187_v53 = vld [vmem:[#allocation64_spill] sm:$0xff]  ;;  %v10884_v61 = vlaneseq  ;;  %v10860_v34 = vld [vmem:[%s18718_s0 + $0x7a] sm:$0xff]  ;;  %v10865_v31 = vld [vmem:[%s18718_s0 + $0xa2] sm:$0xff] }
 0x4ab   :  { %v9667_v11 = vpop.f32.mrb[57].mxu0 }
 0x4ac   :  { %v14398_v52 = vpop.f32.mrb[58].mxu0 }
 0x4ad   :  { %11215 = vrot.lane.b32.xlu0 %v14397_v37, %s15812_s27  ;;  %v9670_v48 = vpop.f32.mrb[59].mxu0  ;;  %v6559_v37 = vld [vmem:[#allocation2 + $0xa3] sm:$0xff] }
 0x4ae   :  { %11217 = vrot.lane.b32.xlu1 %v14398_v52, %s15812_s27  ;;  %v6569_v40 = vpack.c.bf16 %v6559_v37, %v6558_v9  ;;  %v18262_v52 = vshrl.u32 %v10884_v61, 7  ;;  %v10873_v61 = vld [vmem:[%s18718_s0 + $0x3c] sm:$0xff]  ;;  %v10843_v37 = vld [vmem:[%s18718_s0 + $0x4b] sm:$0xff] }
 0x4af   :  { %14532 = vmatmul.mubr.msk.bf16.gmra.mrb[68].mxu0 %vm324_vm2, %v17519_v56  ;;  %v15766_v56 = vld [vmem:[%s18720_s2 + $0x238] sm:$0xff]  }
 0x4b0   :  { %14535 = vmatprep.mubr.msk.bf16.mxu0 %vm324_vm2, %v19182_v63  ;;  %vm10893_vm3 = vcmp.ge.s32.totalorder %v18262_v52, 1  ;;  %v6563_v63 = vld [vmem:[#allocation2 + $0xc3] sm:$0xff] }
 0x4b1   :  { %13916 = vmatmul.mubr.msk.bf16.gmra.mrb[8].mxu1 %vm324_vm2, %v6215_v0  ;;  %11211 = vrot.lane.b32.xlu0 %v9667_v11, %s15812_s27  ;;  %v6560_v11 = vld [vmem:[#allocation2 + $0xab] sm:$0xff] }
 0x4b2   :  { %13923 = vmatprep.mubr.msk.bf16.mxu1 %vm324_vm2, %v6386_v39  ;;  %11213 = vrot.lane.b32.xlu1 %v9670_v48, %s15812_s27  ;;  %v6570_v48 = vpack.c.bf16 %v6561_v25, %v6560_v11  ;;  %v19189_v0 = vld [vmem:[#allocation34_spill] sm:$0xff]  ;;  %v6562_v39 = vld [vmem:[#allocation2 + $0xbb] sm:$0xff] }
 0x4b3   :  { %v6571_v26 = vpack.c.bf16 %v6563_v63, %v6562_v39  ;;  %v10859_v11 = vld [vmem:[%s18718_s0 + $0x4a] sm:$0xff] }
 0x4b4   :  { %v10874_v25 = vld [vmem:[%s18718_s0 + $0x44] sm:$0xff]  ;;  %v10948_v39 = vmax.f32 %v10859_v11, %v10843_v37 }
 0x4b5   :  { %v6739_v63 = vld [vmem:[#allocation2 + $0xb4] sm:$0xff] }
 0x4b7   :  { %14536 = vmatmul.mubr.msk.bf16.gmra.mrb[72].mxu0 %vm324_vm2, %v17532_v5  ;;  %v6389_v5 = vpack.c.bf16 %v6377_v14, %v6376_v6  ;;  %v6731_v14 = vld [vmem:[#allocation2 + $0x4c] sm:$0xff]  ;;  %v6728_v6 = vld [vmem:[#allocation2 + $0x34] sm:$0xff] }
 0x4b8   :  { %14543 = vmatprep.mubr.msk.bf16.mxu0 %vm324_vm2, %v17534_v20  ;;  %v19183_v20 = vld [vmem:[#allocation22_spill] sm:$0xff] }
 0x4b9   :  { %13924 = vmatmul.mubr.msk.bf16.vlgmr.msra.gmra.mrb[12].mxu1 %vm324_vm2, %v6387_v23  ;;  %v6726_v23 = vld [vmem:[#allocation2 + $0x24] sm:$0xff] }
 0x4ba   :  { %13927 = vmatprep.mubr.msk.bf16.mxu1 %vm324_vm2, %v6388_v47  ;;  %13940 = vmatpush3.bf16.msra.mxu1 %v18158_v59  ;;  %v6392_v59 = vpack.c.bf16 %v6383_v10, %v6382_v33  ;;  %v6742_v17 = vpack.c.bf16 %v6727_v12, %v6726_v23  ;;  %v10868_v47 = vld [vmem:[%s18718_s0 + $0x14] sm:$0xff]  ;;  %v10839_v10 = vld [vmem:[%s18718_s0 + $0x2b] sm:$0xff]  ;;  %v10861_v23 = vld [vmem:[%s18718_s0 + $0x82] sm:$0xff] }
 0x4bb   :  { %13941 = vmatprep.subr.bf16.mxu1 %v15766_v56 }
 0x4be   :  { %13942 = vmatpush3.bf16.msra.mxu1 %v15766_v56 }
 0x4bf   :  { %13959 = vmatprep.subr.bf16.mxu1 %v15767_v18  ;;  %14544 = vmatmul.mubr.msk.bf16.vlgmr.msra.gmra.mrb[60].mxu0 %vm324_vm2, %v19183_v20  ;;  %v6730_v20 = vld [vmem:[#allocation2 + $0x44] sm:$0xff] }
 0x4c0   :  { %14560 = vmatpush3.bf16.msra.mxu0 %v18176_v62  ;;  %14547 = vmatprep.mubr.msk.bf16.mxu0 %vm324_vm2, %v17557_v36  ;;  %v19184_v36 = vld [vmem:[#allocation27_spill] sm:$0xff] }
 0x4c1   :  { %13928 = vmatmul.mubr.msk.bf16.gmra.mrb[0].mxu1 %vm324_vm2, %v6389_v5  ;;  %14561 = vmatprep.subr.bf16.mxu0 %v15764_v22  ;;  %v15768_v62 = vld [vmem:[%s18720_s2 + $0x248] sm:$0xff]  }
 0x4c2   :  { %13931 = vmatprep.mubr.msk.bf16.mxu1 %vm324_vm2, %v6390_v58  ;;  %v10854_v5 = vld [vmem:[%s18718_s0 + $0x22] sm:$0xff]  ;;  %v15770_v58 = vld [vmem:[%s18720_s2 + $0x258] sm:$0xff]  }
 0x4c4   :  { %14562 = vmatpush3.bf16.msra.mxu0 %v15764_v22 }
 0x4c5   :  { %14579 = vmatprep.subr.msk.mxu0 %vm125_vm0, %v12464_v15 }
 0x4c7   :  { %14548 = vmatmul.mubr.msk.bf16.gmra.mrb[64].mxu0 %vm324_vm2, %v17569_v38  ;;  %v6551_v38 = vld [vmem:[#allocation2 + $0x3b] sm:$0xff] }
 0x4c8   :  { %14551 = vmatprep.mubr.msk.bf16.mxu0 %vm324_vm2, %v19184_v36  ;;  %v6565_v7 = vpack.c.bf16 %v6551_v38, %v6550_v16  ;;  %v10856_v36 = vld [vmem:[%s18718_s0 + $0x32] sm:$0xff] }
 0x4c9   :  { %13932 = vmatmul.mubr.msk.bf16.gmra.mrb[4].mxu1 %vm324_vm2, %v6391_v46  ;;  %v10855_v46 = vld [vmem:[%s18718_s0 + $0x2a] sm:$0xff] }
 0x4ca   :  { %13935 = vmatprep.mubr.msk.bf16.mxu1 %vm324_vm2, %v6392_v59  ;;  %v10840_v59 = vld [vmem:[%s18718_s0 + $0x33] sm:$0xff]  ;;  %v10944_v38 = vmax.f32 %v10855_v46, %v10839_v10  ;;  %v6905_v10 = vld [vmem:[#allocation2 + $0x2d] sm:$0xff] }
 0x4cb   :  { %v10871_v16 = vld [vmem:[%s18718_s0 + $0x2c] sm:$0xff] }
 0x4cf   :  { %14552 = vmatmul.mubr.msk.bf16.gmra.mrb[68].mxu0 %vm324_vm2, %v17581_v21  ;;  %v6566_v21 = vpack.c.bf16 %v6553_v27, %v6552_v8  ;;  %v10841_v8 = vld [vmem:[%s18718_s0 + $0x3b] sm:$0xff] }
 0x4d0   :  { %14555 = vmatprep.mubr.msk.bf16.mxu0 %vm324_vm2, %v17583_v50  ;;  %v18252_v50 = vld [vmem:[%s18720_s2 + $0x250] sm:$0xff]  }
 0x4d1   :  { %13936 = vmatmul.mubr.msk.bf16.gmra.mrb[8].mxu1 %vm324_vm2, %v6393_v19 }
 0x4d2   :  { %13943 = vmatprep.mubr.msk.bf16.mxu1 %vm324_vm2, %v6564_v1  ;;  %v6735_v1 = vld [vmem:[#allocation2 + $0x94] sm:$0xff] }
 0x4d3   :  { %v6746_v13 = vpack.c.bf16 %v6735_v1, %v6734_v32  ;;  %v10850_v32 = vld [vmem:[%s18718_s0 + $0xab] sm:$0xff] }
 0x4d4   :  { %v10866_v1 = vld [vmem:[%s18718_s0 + $0xaa] sm:$0xff] }
 0x4d7   :  { %14556 = vmatmul.mubr.msk.bf16.gmra.mrb[72].mxu0 %vm324_vm2, %v19185_v2  ;;  %v10872_v2 = vld [vmem:[%s18718_s0 + $0x34] sm:$0xff] }
 0x4d8   :  { %14563 = vmatprep.mubr.msk.bf16.mxu0 %vm324_vm2, %v19186_v43  ;;  %v10858_v43 = vld [vmem:[%s18718_s0 + $0x42] sm:$0xff] }
 0x4d9   :  { %13944 = vmatmul.mubr.msk.bf16.vlgmr.msra.gmra.mrb[12].mxu1 %vm324_vm2, %v6565_v7  ;;  %v10945_v7 = vmax.f32 %v10856_v36, %v10840_v59  ;;  %v10879_v59 = vld [vmem:[%s18718_s0 + $0x94] sm:$0xff] }
 0x4da   :  { %13947 = vmatprep.mubr.msk.bf16.mxu1 %vm324_vm2, %v6566_v21  ;;  %13960 = vmatpush3.bf16.msra.mxu1 %v15767_v18  ;;  %v6729_v18 = vld [vmem:[#allocation2 + $0x3c] sm:$0xff]  ;;  %v10842_v21 = vld [vmem:[%s18718_s0 + $0x43] sm:$0xff] }
 0x4db   :  { %13961 = vmatprep.subr.bf16.mxu1 %v15768_v62  ;;  %v6743_v22 = vpack.c.bf16 %v6729_v18, %v6728_v6  ;;  %v10947_v9 = vmax.f32 %v10858_v43, %v10842_v21  ;;  %v10877_v6 = vld [vmem:[%s18718_s0 + $0x84] sm:$0xff]  ;;  %v10955_v21 = vmax.f32 %v10866_v1, %v10850_v32  ;;  %v10851_v43 = vld [vmem:[%s18718_s0 + $0xb3] sm:$0xff] }
 0x4dd   :  { %v10963_v12 = vmax.f32 %v10947_v9, %v10874_v25  ;;  %v6908_v25 = vld [vmem:[#allocation2 + $0x45] sm:$0xff] }
 0x4de   :  { %13962 = vmatpush3.bf16.msra.mxu1 %v15768_v62  ;;  %v10857_v62 = vld [vmem:[%s18718_s0 + $0x3a] sm:$0xff] }
 0x4df   :  { %13979 = vmatprep.subr.bf16.mxu1 %v18252_v50  ;;  %14564 = vmatmul.mubr.msk.bf16.vlgmr.msra.gmra.mrb[60].mxu0 %vm324_vm2, %v19187_v53  ;;  %v10946_v53 = vmax.f32 %v10857_v62, %v10841_v8  ;;  %v10954_v8 = vmax.f32 %v10865_v31, %v10849_v28  ;;  %v7096_v31 = vld [vmem:[#allocation2 + $0xbe] sm:$0xff] }
 0x4e0   :  { %14567 = vmatprep.mubr.msk.bf16.mxu0 %vm324_vm2, %v17619_v30  ;;  %14580 = vmatpush3.msk.msra.mxu0 %vm125_vm0, %v12464_v15  ;;  %v10836_v30 = vld [vmem:[%s18718_s0 + $0x13] sm:$0xff]  ;;  %v6744_v15 = vpack.c.bf16 %v6731_v14, %v6730_v20 }
 0x4e1   :  { %13948 = vmatmul.mubr.msk.bf16.gmra.mrb[0].mxu1 %vm324_vm2, %v6567_v44  ;;  %v10901_v55 = vsel %vm10893_vm3, %v10852_v41, %v10836_v30  ;;  %v10960_v44 = vmax.f32 %v10944_v38, %v10871_v16  ;;  %v6738_v41 = vld [vmem:[#allocation2 + $0xac] sm:$0xff]  ;;  %v10878_v20 = vld [vmem:[%s18718_s0 + $0x8c] sm:$0xff] }
 0x4e2   :  { %13951 = vmatprep.mubr.msk.bf16.mxu1 %vm324_vm2, %v6568_v57  ;;  %v10941_v56 = vmax.f32 %v10901_v55, %v10836_v30  ;;  %v10961_v57 = vmax.f32 %v10945_v7, %v10872_v2  ;;  %v10962_v30 = vmax.f32 %v10946_v53, %v10873_v61  ;;  %v6748_v14 = vpack.c.bf16 %v6739_v63, %v6738_v41  ;;  %v10881_v2 = vld [vmem:[%s18718_s0 + $0xa4] sm:$0xff] }
 0x4e3   :  { %v6910_v41 = vld [vmem:[#allocation2 + $0x55] sm:$0xff] }
 0x4e4   :  { %v10957_v45 = vmax.f32 %v10941_v56, %v10868_v47  ;;  %v10846_v56 = vld [vmem:[%s18718_s0 + $0x8b] sm:$0xff] }
 0x4e5   :  { %v10862_v47 = vld [vmem:[%s18718_s0 + $0x8a] sm:$0xff] }
 0x4e7   :  { %14568 = vmatmul.mubr.msk.bf16.gmra.mrb[64].mxu0 %vm324_vm2, %v19188_v51  ;;  %v10909_v51 = vsel %vm10893_vm3, %v10860_v34, %v10844_v42  ;;  %v10883_v34 = vld [vmem:[%s18718_s0 + $0xb4] sm:$0xff] }
 0x4e8   :  { %14571 = vmatprep.mubr.msk.bf16.mxu0 %vm324_vm2, %v19189_v0  ;;  %v6737_v0 = vld [vmem:[#allocation2 + $0xa4] sm:$0xff] }
 0x4e9   :  { %13952 = vmatmul.mubr.msk.bf16.gmra.mrb[4].mxu1 %vm324_vm2, %v6569_v40  ;;  %v10875_v40 = vld [vmem:[%s18718_s0 + $0x4c] sm:$0xff] }
 0x4ea   :  { %13955 = vmatprep.mubr.msk.bf16.mxu1 %vm324_vm2, %v6570_v48  ;;  %v6736_v48 = vld [vmem:[#allocation2 + $0x9c] sm:$0xff] }
 0x4eb   :  { %v6747_v18 = vpack.c.bf16 %v6737_v0, %v6736_v48  ;;  %v6912_v0 = vld [vmem:[#allocation2 + $0x8d] sm:$0xff] }
 0x4ef   :  { %14572 = vmatmul.mubr.msk.bf16.gmra.mrb[68].mxu0 %vm324_vm2, %v17643_v29  ;;  %v10837_v29 = vld [vmem:[%s18718_s0 + $0x1b] sm:$0xff] }
 0x4f0   :  { %14575 = vmatprep.mubr.msk.bf16.mxu0 %vm324_vm2, %v17645_v49  ;;  %v10838_v49 = vld [vmem:[%s18718_s0 + $0x23] sm:$0xff]  ;;  %v10942_v3 = vmax.f32 %v10853_v24, %v10837_v29 }
 0x4f1   :  { %13956 = vmatmul.mubr.msk.bf16.gmra.mrb[8].mxu1 %vm324_vm2, %v6571_v26  ;;  %v10943_v33 = vmax.f32 %v10854_v5, %v10838_v49  ;;  %v10949_v26 = vmax.f32 %v10909_v51, %v10844_v42  ;;  %v10951_v49 = vmax.f32 %v10862_v47, %v10846_v56  ;;  %v10847_v5 = vld [vmem:[%s18718_s0 + $0x93] sm:$0xff]  ;;  %v7083_v47 = vld [vmem:[#allocation2 + $0x2e] sm:$0xff] }
 0x4f2   :  { %13963 = vmatprep.mubr.msk.bf16.mxu1 %vm324_vm2, %v6742_v17  ;;  %v10958_v19 = vmax.f32 %v10942_v3, %v10869_v54  ;;  %v10876_v17 = vld [vmem:[%s18718_s0 + $0x7c] sm:$0xff]  ;;  %v6740_v54 = vld [vmem:[#allocation2 + $0xbc] sm:$0xff] }
 0x4f3   :  { %v10965_v24 = vmax.f32 %v10949_v26, %v10876_v17  ;;  %v10882_v42 = vld [vmem:[%s18718_s0 + $0xac] sm:$0xff]  ;;  %v6916_v26 = vld [vmem:[#allocation2 + $0xad] sm:$0xff]  ;;  %v6919_v56 = vld [vmem:[#allocation2 + $0xc5] sm:$0xff] }
 0x4f4   :  { %v10971_v61 = vmax.f32 %v10955_v21, %v10882_v42  ;;  %v6918_v17 = vld [vmem:[#allocation2 + $0xbd] sm:$0xff] }
 0x4f7   :  { %14576 = vmatmul.mubr.msk.bf16.gmra.mrb[72].mxu0 %vm324_vm2, %v17656_v60  ;;  %v10870_v60 = vld [vmem:[%s18718_s0 + $0x24] sm:$0xff] }
 0x4f8   :  { %14581 = vmatprep.mubr.msk.f32.mxu0 %vm46_vm1, %v10957_v45  ;;  %v10959_v27 = vmax.f32 %v10943_v33, %v10870_v60  ;;  %v6741_v33 = vld [vmem:[#allocation2 + $0xc4] sm:$0xff]  ;;  %v10967_v60 = vmax.f32 %v10951_v49, %v10878_v20 }
 0x4f9   :  { %13964 = vmatmul.mubr.msk.bf16.vlgmr.msra.gmra.mrb[12].mxu1 %vm324_vm2, %v6743_v22  ;;  %v10863_v22 = vld [vmem:[%s18718_s0 + $0x92] sm:$0xff]  ;;  %v6749_v38 = vpack.c.bf16 %v6741_v33, %v6740_v54 }
 0x4fa   :  { %13967 = vmatprep.mubr.msk.bf16.mxu1 %vm324_vm2, %v6744_v15  ;;  %13980 = vmatpush3.bf16.msra.mxu1 %v18252_v50  ;;  %v18351_v50 = vadd.s32 56, %v18262_v52  ;;  %v10845_v52 = vld [vmem:[%s18718_s0 + $0x83] sm:$0xff]  ;;  %v10864_v15 = vld [vmem:[%s18718_s0 + $0x9a] sm:$0xff]  ;;  %v10952_v46 = vmax.f32 %v10863_v22, %v10847_v5  ;;  %v7089_v20 = vld [vmem:[#allocation2 + $0x5e] sm:$0xff] }
 0x4fb   :  { %13981 = vmatprep.subr.bf16.mxu1 %v15770_v58  ;;  %v10950_v29 = vmax.f32 %v10861_v23, %v10845_v52  ;;  %v6917_v52 = vld [vmem:[#allocation2 + $0xb5] sm:$0xff]  ;;  %v7086_v5 = vld [vmem:[#allocation2 + $0x46] sm:$0xff] }
 0x4fc   :  { %vm10924_vm4 = vcmp.le.s32.totalorder %v18351_v50, 62  ;;  %v10968_v7 = vmax.f32 %v10952_v46, %v10879_v59  ;;  %v6911_v50 = vld [vmem:[#allocation2 + $0x5d] sm:$0xff]  ;;  %v7093_v46 = vld [vmem:[#allocation2 + $0xa6] sm:$0xff] }
 0x4fd   :  { %v10932_v55 = vsel %vm10924_vm4, %v10875_v40, %v10843_v37  ;;  %v10966_v3 = vmax.f32 %v10950_v29, %v10877_v6  ;;  %v10940_v9 = vsel %vm10924_vm4, %v10883_v34, %v10851_v43  ;;  %v6906_v37 = vld [vmem:[#allocation2 + $0x35] sm:$0xff]  ;;  %v7085_v29 = vld [vmem:[#allocation2 + $0x3e] sm:$0xff] }
 0x4fe   :  { %13982 = vmatpush3.bf16.msra.mxu1 %v15770_v58  ;;  %v10964_v45 = vmax.f32 %v10948_v39, %v10932_v55  ;;  %v10848_v58 = vld [vmem:[%s18718_s0 + $0x9b] sm:$0xff]  ;;  %v15772_v40 = vld [vmem:[%s18720_s2 + $0x268] sm:$0xff]   ;;  %v6923_v39 = vpack.c.bf16 %v6911_v50, %v6910_v41  ;;  %s15814_s2 = smov 96  }
 0x4ff   :  { %13999 = vmatprep.subr.bf16.mxu1 %v18330_v4  ;;  %14582 = vmatmul.mubr.msk.f32.vlgmr.msra.gmra.mrb[26].mxu0 %vm46_vm1, %v10958_v19  ;;  %v10953_v36 = vmax.f32 %v10864_v15, %v10848_v58  ;;  %v10880_v19 = vld [vmem:[%s18718_s0 + $0x9c] sm:$0xff]  ;;  %v7084_v6 = vld [vmem:[#allocation2 + $0x36] sm:$0xff] }
 0x500   :  { %14584 = vmatprep.mubr.msk.f32.mxu0 %vm46_vm1, %v10959_v27  ;;  %v6904_v27 = vld [vmem:[#allocation2 + $0x25] sm:$0xff]  ;;  %v7099_v49 = vpack.c.bf16 %v7085_v29, %v7084_v6  ;;  %v7090_v58 = vld [vmem:[#allocation2 + $0x8e] sm:$0xff]  ;;  %v7091_v15 = vld [vmem:[#allocation2 + $0x96] sm:$0xff] }
 0x501   :  { %13968 = vmatmul.mubr.msk.bf16.gmra.mrb[0].mxu1 %vm324_vm2, %v6745_v35  ;;  %v6920_v16 = vpack.c.bf16 %v6905_v10, %v6904_v27  ;;  %v10969_v62 = vmax.f32 %v10953_v36, %v10880_v19  ;;  %v10867_v35 = vld [vmem:[%s18718_s0 + $0xb2] sm:$0xff]  ;;  %v7102_v33 = vpack.c.bf16 %v7091_v15, %v7090_v58  ;;  %v7095_v59 = vld [vmem:[#allocation2 + $0xb6] sm:$0xff]  ;;  %s15813_s0 = smov 64  }
 0x502   :  { %13971 = vmatprep.mubr.msk.bf16.mxu1 %vm324_vm2, %v6746_v13  ;;  %v10970_v13 = vmax.f32 %v10954_v8, %v10881_v2  ;;  %v10956_v53 = vmax.f32 %v10867_v35, %v10851_v43  ;;  %v6915_v55 = vld [vmem:[#allocation2 + $0xa5] sm:$0xff] }
 0x503   :  { %14585 = vmatmul.mubr.msk.f32.gmra.mrb[76].mxu0 %vm46_vm1, %v10960_v44  ;;  %v6907_v44 = vld [vmem:[#allocation2 + $0x3d] sm:$0xff]  ;;  %v7097_v19 = vld [vmem:[#allocation2 + $0xc6] sm:$0xff] }
 0x504   :  { %14587 = vmatprep.mubr.msk.f32.mxu0 %vm46_vm1, %v10961_v57  ;;  %v6909_v57 = vld [vmem:[#allocation2 + $0x4d] sm:$0xff]  ;;  %v6921_v11 = vpack.c.bf16 %v6907_v44, %v6906_v37  ;;  %v10972_v48 = vmax.f32 %v10956_v53, %v10940_v9  ;;  %v7092_v10 = vld [vmem:[#allocation2 + $0x9e] sm:$0xff]  ;;  %v7105_v32 = vpack.c.bf16 %v7097_v19, %v7096_v31 }
 0x505   :  { %v6922_v51 = vpack.c.bf16 %v6909_v57, %v6908_v25  ;;  %v7103_v36 = vpack.c.bf16 %v7093_v46, %v7092_v10  ;;  %v19194_v46 = vld [vmem:[#allocation29_spill] sm:$0xff] }
 0x507   :  { %14588 = vmatmul.mubr.msk.f32.gmra.mrb[78].mxu0 %vm46_vm1, %v10962_v30  ;;  %v6913_v30 = vld [vmem:[#allocation2 + $0x95] sm:$0xff] }
 0x508   :  { %14590 = vmatprep.mubr.msk.f32.mxu0 %vm46_vm1, %v10963_v12  ;;  %v6924_v63 = vpack.c.bf16 %v6913_v30, %v6912_v0  ;;  %v6914_v12 = vld [vmem:[#allocation2 + $0x9d] sm:$0xff] }
 0x509   :  { %13972 = vmatmul.mubr.msk.bf16.gmra.mrb[4].mxu1 %vm324_vm2, %v6747_v18  ;;  %v6925_v23 = vpack.c.bf16 %v6915_v55, %v6914_v12  ;;  %v6927_v18 = vpack.c.bf16 %v6919_v56, %v6918_v17  ;;  %v18504_v55 = vpop.permute.xlu0 %11187 }
 0x50a   :  { %13975 = vmatprep.mubr.msk.bf16.mxu1 %vm324_vm2, %v6748_v14  ;;  %v7082_v14 = vld [vmem:[#allocation2 + $0x26] sm:$0xff] }
 0x50b   :  { %14591 = vmatmul.mubr.msk.f32.gmra.mrb[80].mxu0 %vm46_vm1, %v10964_v45  ;;  %v7098_v45 = vpack.c.bf16 %v7083_v47, %v7082_v14  ;;  %v19190_v14 = vld [vmem:[#allocation8_spill] sm:$0xff] }
 0x50c   :  { %14593 = vmatprep.mubr.msk.f32.mxu0 %vm46_vm1, %v10965_v24  ;;  %v7087_v24 = vld [vmem:[#allocation2 + $0x4e] sm:$0xff] }
 0x50d   :  { %v7100_v22 = vpack.c.bf16 %v7087_v24, %v7086_v5  ;;  %v19191_v24 = vld [vmem:[#allocation15_spill] sm:$0xff]  ;;  %v19192_v5 = vld [vmem:[#allocation14_spill] sm:$0xff] }
 0x50f   :  { %14594 = vmatmul.mubr.msk.f32.gmra.mrb[82].mxu0 %vm46_vm1, %v10966_v3  ;;  %v7088_v3 = vld [vmem:[#allocation2 + $0x56] sm:$0xff] }
 0x510   :  { %14596 = vmatprep.mubr.msk.f32.mxu0 %vm46_vm1, %v10967_v60  ;;  %v7101_v54 = vpack.c.bf16 %v7089_v20, %v7088_v3  ;;  %v7094_v60 = vld [vmem:[#allocation2 + $0xae] sm:$0xff]  ;;  %v19193_v3 = vld [vmem:[#allocation12_spill] sm:$0xff] }
 0x511   :  { %13976 = vmatmul.mubr.msk.bf16.gmra.mrb[8].mxu1 %vm324_vm2, %v6749_v38  ;;  %v7104_v28 = vpack.c.bf16 %v7095_v59, %v7094_v60 }
 0x512   :  { %13983 = vmatprep.mubr.msk.bf16.mxu1 %vm324_vm2, %v6920_v16 }
 0x513   :  { %14597 = vmatmul.mubr.msk.f32.gmra.mrb[84].mxu0 %vm46_vm1, %v10968_v7 }
 0x514   :  { %14599 = vmatprep.mubr.msk.f32.mxu0 %vm46_vm1, %v10969_v62 }
 0x517   :  { %14600 = vmatmul.mubr.msk.f32.gmra.mrb[86].mxu0 %vm46_vm1, %v10970_v13 }
 0x518   :  { %14602 = vmatprep.mubr.msk.f32.mxu0 %vm46_vm1, %v10971_v61 }
 0x519   :  { %13984 = vmatmul.mubr.msk.bf16.vlgmr.msra.gmra.mrb[12].mxu1 %vm324_vm2, %v6921_v11 }
 0x51a   :  { %13987 = vmatprep.mubr.msk.bf16.mxu1 %vm324_vm2, %v6922_v51  ;;  %14000 = vmatpush3.bf16.msra.mxu1 %v18330_v4  ;;  %v6926_v4 = vpack.c.bf16 %v6917_v52, %v6916_v26  ;;  %v11192_v26 = vpop.permute.xlu1 %11191  ;;  %v18506_v52 = vpop.permute.xlu0 %11189 }
 0x51b   :  { %14001 = vmatprep.subr.bf16.mxu1 %v15772_v40  ;;  %14603 = vmatmul.mubr.msk.f32.gmra.mrb[88].mxu0 %vm46_vm1, %v10972_v48 }
 0x51e   :  { %14002 = vmatpush3.bf16.msra.mxu1 %v15772_v40 }
 0x521   :  { %13988 = vmatmul.mubr.msk.bf16.gmra.mrb[0].mxu1 %vm324_vm2, %v6923_v39 }
 0x522   :  { %13991 = vmatprep.mubr.msk.bf16.mxu1 %vm324_vm2, %v6924_v63 }
 0x529   :  { %13992 = vmatmul.mubr.msk.bf16.gmra.mrb[4].mxu1 %vm324_vm2, %v6925_v23  ;;  %v18508_v23 = vpop.permute.xlu1 %11193 }
 0x52a   :  { %13995 = vmatprep.mubr.msk.bf16.mxu1 %vm324_vm2, %v6926_v4  ;;  %v11200_v4 = vpop.permute.xlu0 %11199 }
 0x52d   :  { %v11202_v17 = vpop.permute.xlu1 %11201 }
 0x52e   :  { %v18510_v56 = vpop.permute.xlu0 %11195 }
 0x531   :  { %13996 = vmatmul.mubr.msk.bf16.gmra.mrb[8].mxu1 %vm324_vm2, %v6927_v18  ;;  %v18512_v47 = vpop.permute.xlu1 %11197 }
 0x532   :  { %14003 = vmatprep.mubr.msk.bf16.mxu1 %vm324_vm2, %v7098_v45  ;;  %v11208_v15 = vpop.permute.xlu0 %11207 }
 0x539   :  { %14004 = vmatmul.mubr.msk.bf16.vlgmr.msra.gmra.mrb[12].mxu1 %vm324_vm2, %v7099_v49 }
 0x53a   :  { %14007 = vmatprep.mubr.msk.bf16.mxu1 %vm324_vm2, %v7100_v22 }
 0x541   :  { %14008 = vmatmul.mubr.msk.bf16.gmra.mrb[0].mxu1 %vm324_vm2, %v7101_v54 }
 0x542   :  { %14011 = vmatprep.mubr.msk.bf16.mxu1 %vm324_vm2, %v7102_v33  ;;  %v11210_v33 = vpop.permute.xlu1 %11209 }
 0x549   :  { %14012 = vmatmul.mubr.msk.bf16.gmra.mrb[4].mxu1 %vm324_vm2, %v7103_v36  ;;  %v18526_v36 = vpop.permute.xlu0 %11203 }
 0x54a   :  { %14015 = vmatprep.mubr.msk.bf16.mxu1 %vm324_vm2, %v7104_v28  ;;  %v19195_v28 = vld [vmem:[#allocation31_spill] sm:$0xff] }
 0x551   :  { %14016 = vmatmul.mubr.msk.bf16.gmra.mrb[8].mxu1 %vm324_vm2, %v7105_v32  ;;  %v19196_v32 = vld [vmem:[#allocation32_spill] sm:$0xff] }
 0x5b2   :  { %v14565_v1 = vpop.f32.mrb[60].mxu0 }
 0x5b3   :  { %11255 = vrot.lane.b32.xlu0 %v14565_v1, %s15813_s0  ;;  %v10757_v38 = vpop.f32.mrb[61].mxu0 }
 0x5b4   :  { %v14566_v27 = vpop.f32.mrb[62].mxu0 }
 0x5b5   :  { %11257 = vrot.lane.b32.xlu1 %v14566_v27, %s15813_s0  ;;  %v10760_v16 = vpop.f32.mrb[63].mxu0 }
 0x5b7   :  { %11251 = vrot.lane.b32.xlu0 %v10757_v38, %s15813_s0 }
 0x5b9   :  { %11253 = vrot.lane.b32.xlu1 %v10760_v16, %s15813_s0  ;;  %v18535_v16 = vpop.permute.xlu1 %11205 }
 0x5ba   :  { %v14569_v7 = vpop.f32.mrb[64].mxu0 }
 0x5bb   :  { %11263 = vrot.lane.b32.xlu0 %v14569_v7, %s15813_s0  ;;  %v10773_v8 = vpop.f32.mrb[65].mxu0  ;;  %v19197_v7 = vld [vmem:[#allocation6_spill] sm:$0xff] }
 0x5bc   :  { %v14570_v62 = vpop.f32.mrb[66].mxu0 }
 0x5bd   :  { %11265 = vrot.lane.b32.xlu1 %v14570_v62, %s15813_s0  ;;  %v10776_v2 = vpop.f32.mrb[67].mxu0 }
 0x5bf   :  { %11259 = vrot.lane.b32.xlu0 %v10773_v8, %s15813_s0 }
 0x5c1   :  { %11261 = vrot.lane.b32.xlu1 %v10776_v2, %s15813_s0  ;;  %v11216_v2 = vpop.permute.xlu0 %11215 }
 0x5c2   :  { %v14573_v21 = vpop.f32.mrb[68].mxu0 }
 0x5c3   :  { %11271 = vrot.lane.b32.xlu0 %v14573_v21, %s15813_s0  ;;  %v10789_v43 = vpop.f32.mrb[69].mxu0 }
 0x5c4   :  { %v14574_v35 = vpop.f32.mrb[70].mxu0 }
 0x5c5   :  { %11273 = vrot.lane.b32.xlu1 %v14574_v35, %s15813_s0  ;;  %v10792_v42 = vpop.f32.mrb[71].mxu0 }
 0x5c7   :  { %11267 = vrot.lane.b32.xlu0 %v10789_v43, %s15813_s0  ;;  %v19198_v43 = vld [vmem:[#allocation35_spill] sm:$0xff] }
 0x5c9   :  { %11269 = vrot.lane.b32.xlu1 %v10792_v42, %s15813_s0 }
 0x5ca   :  { %v14577_v34 = vpop.f32.mrb[72].mxu0 }
 0x5cb   :  { %11279 = vrot.lane.b32.xlu0 %v14577_v34, %s15813_s0  ;;  %v10805_v13 = vpop.f32.mrb[73].mxu0  ;;  %v11218_v34 = vpop.permute.xlu1 %11217 }
 0x5cc   :  { %v14578_v44 = vpop.f32.mrb[74].mxu0 }
 0x5cd   :  { %11281 = vrot.lane.b32.xlu1 %v14578_v44, %s15813_s0  ;;  %v10808_v53 = vpop.f32.mrb[75].mxu0 }
 0x5cf   :  { %11275 = vrot.lane.b32.xlu0 %v10805_v13, %s15813_s0  ;;  %v19199_v13 = vld [vmem:[#allocation10_spill] sm:$0xff] }
 0x5d1   :  { %11277 = vrot.lane.b32.xlu1 %v10808_v53, %s15813_s0 }
 0x5d2   :  { %v14583_v57 = vpop.f32.mrb[26].mxu0 }
 0x5d3   :  { %v11092_v61 = vpop.f32.mrb[27].mxu0 }
 0x5d4   :  { %11315 = vrot.lane.b32.xlu0 %v11092_v61, %s15814_s2 }
 0x5d5   :  { %11317 = vrot.lane.b32.xlu1 %v14583_v57, %s15814_s2  ;;  %v19200_v57 = vld [vmem:[#allocation7_spill] sm:$0xff] }
 0x5d6   :  { %v14586_v9 = vpop.f32.mrb[76].mxu0 }
 0x5d7   :  { %v11102_v37 = vpop.f32.mrb[77].mxu0 }
 0x5d8   :  { %11319 = vrot.lane.b32.xlu0 %v11102_v37, %s15814_s2 }
 0x5d9   :  { %11321 = vrot.lane.b32.xlu1 %v14586_v9, %s15814_s2 }
 0x5da   :  { %v14589_v11 = vpop.f32.mrb[78].mxu0 }
 0x5db   :  { %v11112_v25 = vpop.f32.mrb[79].mxu0 }
 0x5dc   :  { %11323 = vrot.lane.b32.xlu0 %v11112_v25, %s15814_s2 }
 0x5dd   :  { %11325 = vrot.lane.b32.xlu1 %v14589_v11, %s15814_s2  ;;  %v19201_v11 = vld [vmem:[#allocation37_spill] sm:$0xff] }
 0x5de   :  { %v14592_v40 = vpop.f32.mrb[80].mxu0 }
 0x5df   :  { %v11122_v51 = vpop.f32.mrb[81].mxu0 }
 0x5e0   :  { %11327 = vrot.lane.b32.xlu0 %v11122_v51, %s15814_s2  ;;  %v18557_v51 = vpop.permute.xlu0 %11211 }
 0x5e1   :  { %11329 = vrot.lane.b32.xlu1 %v14592_v40, %s15814_s2 }
 0x5e2   :  { %v14595_v48 = vpop.f32.mrb[82].mxu0 }
 0x5e3   :  { %v11132_v50 = vpop.f32.mrb[83].mxu0 }
 0x5e4   :  { %11331 = vrot.lane.b32.xlu0 %v11132_v50, %s15814_s2 }
 0x5e5   :  { %11333 = vrot.lane.b32.xlu1 %v14595_v48, %s15814_s2  ;;  %v18559_v48 = vpop.permute.xlu1 %11213 }
 0x5e6   :  { %v14598_v0 = vpop.f32.mrb[84].mxu0 }
 0x5e7   :  { %v11142_v30 = vpop.f32.mrb[85].mxu0 }
 0x5e8   :  { %11335 = vrot.lane.b32.xlu0 %v11142_v30, %s15814_s2 }
 0x5e9   :  { %11337 = vrot.lane.b32.xlu1 %v14598_v0, %s15814_s2  ;;  %v19202_v0 = vld [vmem:[#allocation17_spill] sm:$0xff] }
 0x5ea   :  { %v14601_v41 = vpop.f32.mrb[86].mxu0 }
 0x5eb   :  { %v11152_v39 = vpop.f32.mrb[87].mxu0 }
 0x5ec   :  { %11339 = vrot.lane.b32.xlu0 %v11152_v39, %s15814_s2  ;;  %v19203_v39 = vld [vmem:[#allocation16_spill] sm:$0xff] }
 0x5ed   :  { %11341 = vrot.lane.b32.xlu1 %v14601_v41, %s15814_s2 }
 0x5ee   :  { %v14604_v63 = vpop.f32.mrb[88].mxu0 }
 0x5ef   :  { %v11162_v12 = vpop.f32.mrb[89].mxu0 }
 0x5f0   :  { %11343 = vrot.lane.b32.xlu0 %v11162_v12, %s15814_s2 }
 0x5f1   :  { %11345 = vrot.lane.b32.xlu1 %v14604_v63, %s15814_s2 }
 0x60c   :  { %v14005_v18 = vpop.f32.mrb[12].mxu1 }
 0x60d   :  { %v14609_v45 = vadd.f32 %v14005_v18, %v19190_v14  ;;  %v7181_v29 = vpop.f32.mrb[13].mxu1 }
 0x60e   :  { %v18516_v6 = vadd.f32 %v7181_v29, %v19191_v24  ;;  %v14006_v49 = vpop.f32.mrb[14].mxu1 }
 0x60f   :  { %v18519_v22 = vadd.f32 %v14006_v49, %v19192_v5  ;;  %v7184_v20 = vpop.f32.mrb[15].mxu1  ;;  %v18522_v58 = vsel %vm324_vm2, %v14609_v45, %v11192_v26  ;;  %v19205_v45 = vld [vmem:[#allocation9_spill] sm:$0xff] }
 0x610   :  { %v14612_v54 = vadd.f32 %v7184_v20, %v19193_v3 }
 0x614   :  { %v14009_v10 = vpop.f32.mrb[0].mxu1 }
 0x615   :  { %v14613_v60 = vadd.f32 %v14009_v10, %v19194_v46  ;;  %v7197_v59 = vpop.f32.mrb[1].mxu1 }
 0x616   :  { %v18529_v31 = vadd.f32 %v7197_v59, %v19195_v28  ;;  %v14010_v19 = vpop.f32.mrb[2].mxu1 }
 0x617   :  { %v14615_v1 = vadd.f32 %v14010_v19, %v19196_v32  ;;  %v7200_v38 = vpop.f32.mrb[3].mxu1  ;;  %v18533_v27 = vsel %vm324_vm2, %v14613_v60, %v11200_v4  ;;  %v19204_v4 = vld [vmem:[#allocation23_spill] sm:$0xff] }
 0x618   :  { %v18538_v8 = vadd.f32 %v7200_v38, %v19197_v7  ;;  %v11363_v7 = vsel %vm324_vm2, %v18516_v6, %v18504_v55 }
 0x619   :  { %v18541_v62 = vsel %vm324_vm2, %v14615_v1, %v11202_v17 }
 0x61c   :  { %v14013_v21 = vpop.f32.mrb[4].mxu1 }
 0x61d   :  { %v14617_v35 = vadd.f32 %v14013_v21, %v19198_v43  ;;  %v7213_v42 = vpop.f32.mrb[5].mxu1  ;;  %v11364_v43 = vsel %vm324_vm2, %v14612_v54, %v18506_v52  ;;  %v11366_v54 = vsel %vm324_vm2, %v18519_v22, %v18508_v23 }
 0x61e   :  { %v18545_v44 = vadd.f32 %v7213_v42, %v19199_v13  ;;  %v14014_v53 = vpop.f32.mrb[6].mxu1 }
 0x61f   :  { %v14619_v61 = vadd.f32 %v14014_v53, %v19200_v57  ;;  %v7216_v9 = vpop.f32.mrb[7].mxu1  ;;  %v18549_v37 = vsel %vm324_vm2, %v14617_v35, %v11208_v15 }
 0x620   :  { %v18552_v25 = vadd.f32 %v7216_v9, %v19201_v11 }
 0x621   :  { %v18555_v40 = vsel %vm324_vm2, %v14619_v61, %v11210_v33 }
 0x624   :  { %v14017_v50 = vpop.f32.mrb[8].mxu1 }
 0x625   :  { %v14621_v30 = vadd.f32 %v14017_v50, %v19202_v0  ;;  %v7229_v41 = vpop.f32.mrb[9].mxu1  ;;  %v11256_v26 = vpop.permute.xlu0 %11255 }
 0x626   :  { %v18563_v63 = vadd.f32 %v7229_v41, %v19203_v39  ;;  %v14018_v12 = vpop.f32.mrb[10].mxu1  ;;  %v11382_v52 = vsel %vm11379_vm6, %v18522_v58, %v11256_v26  ;;  %v11367_v58 = vsel %vm324_vm2, %v18529_v31, %v18510_v56 }
 0x627   :  { %v14623_v17 = vadd.f32 %v14018_v12, %v19204_v4  ;;  %v7232_v18 = vpop.f32.mrb[11].mxu1  ;;  %v18567_v14 = vsel %vm324_vm2, %v14621_v30, %v11216_v2  ;;  %v11258_v24 = vpop.permute.xlu1 %11257  ;;  %v18597_v2 = vld [vmem:[%s18721_s3] ss:$0 sm:$0xff]  ;;  %v11368_v4 = vsel %vm324_vm2, %v18538_v8, %v18512_v47 }
 0x628   :  { %v18570_v29 = vadd.f32 %v7232_v18, %v19205_v45  ;;  %v11383_v11 = vsel %vm11379_vm6, %v11366_v54, %v11258_v24 }
 0x629   :  { %v18573_v49 = vsel %vm324_vm2, %v14623_v17, %v11218_v34  ;;  %v11252_v5 = vpop.permute.xlu0 %11251  ;;  %v18606_v34 = vld [vmem:[%s18721_s3 + $0x1] ss:$0 sm:$0xff]  ;;  %s15815_s3 = smov [#allocation3]  }
 0x62a   :  { %v11380_v21 = vsel %vm11379_vm6, %v11363_v7, %v11252_v5  ;;  %s11492_s19 = sshll.u32 %s15815_s3, 4  ;;  %s11493_s19 = int_to_ptr.vmem [resolvable:$true] %s11492_s19 }
 0x62b   :  { %v11254_v20 = vpop.permute.xlu1 %11253  ;;  %s15788_s20 = scalar_lea.vmem %s11493_s19, 2048  ;;  %p15793_p1 = scmp.lt.s32.totalorder %s11493_s19, %s11493_s19 }
 0x62c   :  { %v11381_v42 = vsel %vm11379_vm6, %v11364_v43, %v11254_v20  ;;  %p15789_p0 = scmp.ne.s32.totalorder %s11493_s19, %s15788_s20  ;;  %p15794_p2 = scmp.lt.s32.totalorder %s15788_s20, %s15788_s20 }
 0x62d   :  { %v11264_v15 = vpop.permute.xlu0 %11263 }
 0x62e   :  { %v11386_v8 = vsel %vm11379_vm6, %v18533_v27, %v11264_v15  ;;  %v11371_v27 = vsel %vm324_vm2, %v18545_v44, %v18526_v36  ;;  %p15795_p3 = por %p15794_p2, %p15793_p1 }
 0x62f   :  { %v11266_v3 = vpop.permute.xlu1 %11265 }
 0x630   :  { %v11387_v43 = vsel %vm11379_vm6, %v18541_v62, %v11266_v3  ;;  %v11372_v3 = vsel %vm324_vm2, %v18552_v25, %v18535_v16  ;;  %p15796_p4 = pnand %p15795_p3, %p15789_p0 }
 0x631   :  { %v11260_v33 = vpop.permute.xlu0 %11259 }
 0x632   :  { %v11384_v26 = vsel %vm11379_vm6, %v11367_v58, %v11260_v33 }
 0x633   :  { %v11262_v10 = vpop.permute.xlu1 %11261 }
 0x634   :  { %v11385_v45 = vsel %vm11379_vm6, %v11368_v4, %v11262_v10 }
 0x635   :  { %v18575_v46 = vpop.permute.xlu0 %11271 }
 0x636   :  { %v11390_v25 = vsel %vm11379_vm6, %v18549_v37, %v18575_v46  ;;  %v11375_v37 = vsel %vm324_vm2, %v18563_v63, %v18557_v51 }
 0x637   :  { %v18577_v60 = vpop.permute.xlu1 %11273 }
 0x639   :  { %v18579_v59 = vpop.permute.xlu0 %11267 }
 0x63a   :  { %v11388_v62 = vsel %vm11379_vm6, %v11371_v27, %v18579_v59 }
 0x63b   :  { %v18581_v28 = vpop.permute.xlu1 %11269 }
 0x63d   :  { %v18583_v19 = vpop.permute.xlu0 %11279 }
 0x63f   :  { %v18585_v32 = vpop.permute.xlu1 %11281 }
 0x641   :  { %v18587_v1 = vpop.permute.xlu0 %11275 }
 0x643   :  { %v18589_v38 = vpop.permute.xlu1 %11277 }
 0x646   :  { %v11316_v35 = vpop.permute.xlu0 %11315 }
 0x647   :  { %v11397_v55 = vsel %vm11396_vm5, %v11380_v21, %v11316_v35  ;;  %v11318_v6 = vpop.permute.xlu1 %11317 }
 0x648   :  { %v11419_v13 = vmul.f32 %v18597_v2, %v11397_v55  ;;  %v11398_v53 = vsel %vm11396_vm5, %v11381_v42, %v11318_v6 }
 0x649   :  { %v11420_v57 = vmul.f32 %v18597_v2, %v11398_v53 }
 0x64a   :  { %v11439_v61 = vadd.f32 %v18606_v34, %v11419_v13  ;;  %v11320_v9 = vpop.permute.xlu0 %11319 }
 0x64b   :  { %v11440_v50 = vadd.f32 %v18606_v34, %v11420_v57  ;;  %v11399_v0 = vsel %vm11396_vm5, %v11382_v52, %v11320_v9  ;;  %v11322_v30 = vpop.permute.xlu1 %11321 }
 0x64c   :  { %v11455_v41 = vmax.f32 %v11439_v61, 0.0  ;;  %v11421_v39 = vmul.f32 %v18597_v2, %v11399_v0  ;;  %v11400_v12 = vsel %vm11396_vm5, %v11383_v11, %v11322_v30  ;;  %v11389_v61 = vsel %vm11379_vm6, %v11372_v3, %v18581_v28 }
 0x64d   :  { %v11456_v23 = vmax.f32 %v11440_v50, 0.0  ;;  %v11422_v22 = vmul.f32 %v18597_v2, %v11400_v12 }
 0x64e   :  { %11471 = vst [vmem:[#allocation3] sm:$0xff] %v11455_v41  ;;  %v11441_v17 = vadd.f32 %v18606_v34, %v11421_v39  ;;  %v11324_v18 = vpop.permute.xlu0 %11323  ;;  %v11391_v41 = vsel %vm11379_vm6, %v18555_v40, %v18577_v60  ;;  %v11392_v40 = vsel %vm11379_vm6, %v11375_v37, %v18587_v1  ;;  %v11376_v60 = vsel %vm324_vm2, %v18570_v29, %v18559_v48 }
 0x64f   :  { %11472 = vst [vmem:[#allocation3 + $0x8] sm:$0xff] %v11456_v23  ;;  %v11442_v24 = vadd.f32 %v18606_v34, %v11422_v22  ;;  %v11401_v56 = vsel %vm11396_vm5, %v11384_v26, %v11324_v18  ;;  %v11326_v31 = vpop.permute.xlu1 %11325  ;;  %v11394_v29 = vsel %vm11379_vm6, %v18567_v14, %v18583_v19 }
 0x650   :  { %v11457_v5 = vmax.f32 %v11441_v17, 0.0  ;;  %v11423_v20 = vmul.f32 %v18597_v2, %v11401_v56  ;;  %v11402_v33 = vsel %vm11396_vm5, %v11385_v45, %v11326_v31  ;;  %v11393_v45 = vsel %vm11379_vm6, %v11376_v60, %v18589_v38 }
 0x651   :  { %v11458_v7 = vmax.f32 %v11442_v24, 0.0  ;;  %v11424_v47 = vmul.f32 %v18597_v2, %v11402_v33  ;;  %v11395_v33 = vsel %vm11379_vm6, %v18573_v49, %v18585_v32 }
 0x652   :  { %11473 = vst [vmem:[#allocation3 + $0x10] sm:$0xff] %v11457_v5  ;;  %v11443_v10 = vadd.f32 %v18606_v34, %v11423_v20  ;;  %v11328_v21 = vpop.permute.xlu0 %11327 }
 0x653   :  { %11474 = vst [vmem:[#allocation3 + $0x18] sm:$0xff] %v11458_v7  ;;  %v11444_v35 = vadd.f32 %v18606_v34, %v11424_v47  ;;  %v11403_v42 = vsel %vm11396_vm5, %v11386_v8, %v11328_v21  ;;  %v11330_v55 = vpop.permute.xlu1 %11329 }
 0x654   :  { %v11459_v6 = vmax.f32 %v11443_v10, 0.0  ;;  %v11425_v13 = vmul.f32 %v18597_v2, %v11403_v42  ;;  %v11404_v53 = vsel %vm11396_vm5, %v11387_v43, %v11330_v55 }
 0x655   :  { %v11460_v15 = vmax.f32 %v11444_v35, 0.0  ;;  %v11426_v57 = vmul.f32 %v18597_v2, %v11404_v53 }
 0x656   :  { %11475 = vst [vmem:[#allocation3 + $0x20] sm:$0xff] %v11459_v6  ;;  %v11445_v52 = vadd.f32 %v18606_v34, %v11425_v13  ;;  %v11332_v54 = vpop.permute.xlu0 %11331 }
 0x657   :  { %11476 = vst [vmem:[#allocation3 + $0x28] sm:$0xff] %v11460_v15  ;;  %v11446_v36 = vadd.f32 %v18606_v34, %v11426_v57  ;;  %v11405_v44 = vsel %vm11396_vm5, %v11388_v62, %v11332_v54  ;;  %v11334_v9 = vpop.permute.xlu1 %11333 }
 0x658   :  { %v11461_v11 = vmax.f32 %v11445_v52, 0.0  ;;  %v11427_v59 = vmul.f32 %v18597_v2, %v11405_v44  ;;  %v11406_v50 = vsel %vm11396_vm5, %v11389_v61, %v11334_v9 }
 0x659   :  { %v11462_v0 = vmax.f32 %v11446_v36, 0.0  ;;  %v11428_v16 = vmul.f32 %v18597_v2, %v11406_v50 }
 0x65a   :  { %11477 = vst [vmem:[#allocation3 + $0x30] sm:$0xff] %v11461_v11  ;;  %v11447_v28 = vadd.f32 %v18606_v34, %v11427_v59  ;;  %v11336_v30 = vpop.permute.xlu0 %11335 }
 0x65b   :  { %11478 = vst [vmem:[#allocation3 + $0x38] sm:$0xff] %v11462_v0  ;;  %v11448_v39 = vadd.f32 %v18606_v34, %v11428_v16  ;;  %v11407_v12 = vsel %vm11396_vm5, %v11390_v25, %v11336_v30  ;;  %v11338_v58 = vpop.permute.xlu1 %11337 }
 0x65c   :  { %v11463_v23 = vmax.f32 %v11447_v28, 0.0  ;;  %v11429_v22 = vmul.f32 %v18597_v2, %v11407_v12  ;;  %v11408_v26 = vsel %vm11396_vm5, %v11391_v41, %v11338_v58 }
 0x65d   :  { %v11464_v46 = vmax.f32 %v11448_v39, 0.0  ;;  %v11430_v4 = vmul.f32 %v18597_v2, %v11408_v26 }
 0x65e   :  { %11479 = vst [vmem:[#allocation3 + $0x40] sm:$0xff] %v11463_v23  ;;  %v11449_v17 = vadd.f32 %v18606_v34, %v11429_v22  ;;  %v11340_v18 = vpop.permute.xlu0 %11339 }
 0x65f   :  { %11480 = vst [vmem:[#allocation3 + $0x48] sm:$0xff] %v11464_v46  ;;  %v11450_v51 = vadd.f32 %v18606_v34, %v11430_v4  ;;  %v11409_v63 = vsel %vm11396_vm5, %v11392_v40, %v11340_v18  ;;  %v11342_v24 = vpop.permute.xlu1 %11341 }
 0x660   :  { %v11465_v56 = vmax.f32 %v11449_v17, 0.0  ;;  %v11431_v1 = vmul.f32 %v18597_v2, %v11409_v63  ;;  %v11410_v31 = vsel %vm11396_vm5, %v11393_v45, %v11342_v24 }
 0x661   :  { %v11466_v5 = vmax.f32 %v11450_v51, 0.0  ;;  %v11432_v48 = vmul.f32 %v18597_v2, %v11410_v31 }
 0x662   :  { %11481 = vst [vmem:[#allocation3 + $0x50] sm:$0xff] %v11465_v56  ;;  %v11451_v38 = vadd.f32 %v18606_v34, %v11431_v1  ;;  %v11344_v20 = vpop.permute.xlu0 %11343 }
 0x663   :  { %11482 = vst [vmem:[#allocation3 + $0x58] sm:$0xff] %v11466_v5  ;;  %v11452_v7 = vadd.f32 %v18606_v34, %v11432_v48  ;;  %v11411_v47 = vsel %vm11396_vm5, %v11394_v29, %v11344_v20  ;;  %v11346_v8 = vpop.permute.xlu1 %11345 }
 0x664   :  { %v11467_v10 = vmax.f32 %v11451_v38, 0.0  ;;  %v11433_v21 = vmul.f32 %v18597_v2, %v11411_v47  ;;  %v11412_v43 = vsel %vm11396_vm5, %v11395_v33, %v11346_v8 }
 0x665   :  { %v11468_v14 = vmax.f32 %v11452_v7, 0.0  ;;  %v11434_v19 = vmul.f32 %v18597_v2, %v11412_v43 }
 0x666   :  { %11483 = vst [vmem:[#allocation3 + $0x60] sm:$0xff] %v11467_v10  ;;  %v11453_v35 = vadd.f32 %v18606_v34, %v11433_v21 }
 0x667   :  { %11484 = vst [vmem:[#allocation3 + $0x68] sm:$0xff] %v11468_v14  ;;  %v11454_v49 = vadd.f32 %v18606_v34, %v11434_v19 }
 0x668   :  { %v11469_v32 = vmax.f32 %v11453_v35, 0.0 }
 0x669   :  { %v11470_v42 = vmax.f32 %v11454_v49, 0.0 }
 0x66a   :  { %11485 = vst [vmem:[#allocation3 + $0x70] sm:$0xff] %v11469_v32 }
 0x66b   :  { %11486 = vst [vmem:[#allocation3 + $0x78] sm:$0xff] %v11470_v42 }
 0x66c   :  { %15799 = shalt.err (!%p15796_p4)
}
 0x66d   :  { %s15800_s23 = scalar_lea.hbm %s18722_s4, 2048 }
 0x66e   :  { %p15801_p5 = scmp.ne.s32.totalorder %s18722_s4, %s15800_s23  ;;  %p15804_p6 = scmp.lt.u32.totalorder %s15800_s23, %s18722_s4 }
 0x670   :  { %p15806_p7 = pnand %p15804_p6, %p15801_p5 }
 0x672   :  { %15809 = shalt.err (!%p15806_p7)
}
 0x673   :  { %s15816_s28 = smov 128   ;;  %s15817_s29 = smov 8  }
 0x674   :  { %11498 = dma.vmem_to_hbm [thread:$0]  %s11493_s19, 2048, %s18722_s4, [#allocation4], %s15816_s28, %s15816_s28, %s15817_s29  }
 0x675   :  { %15810 = dma.done.wait [#allocation4], 2048  }
 0x676   :  { %15811 = vsyncadd [#allocation4], 4294965248 }
 0x677   :  { %11502 = vsyncpa [#allocation4], 1 }

</bundles_post_ra>
